<compile_context>
chip_gen: v5e
topology: v5e:2x2
jax: 0.10.0
libtpu: 0.0.40
codegen_flags: <defaults>
</compile_context>

<pallas_src>
import functools

import numpy as np
import jax
import jax.numpy as jnp
from jax.experimental import pallas as pl
from jax.experimental.pallas import tpu as pltpu


def _round_up(v, m):
    return (v + m - 1) // m * m


def _vmem_limit_bytes():
    """Per-generation VMEM budget: tight on 64 MiB parts (v7x), generous on
    128 MiB parts (v5e / v6e)."""
    cap = 128 * 1024 * 1024
    try:
        cap = int(pltpu.get_tpu_info().vmem_capacity_bytes)
    except Exception:
        pass
    return max(32 * 1024 * 1024, min(cap - 16 * 1024 * 1024, 112 * 1024 * 1024))


def _conv_stats_kernel(x_ref, w_ref, m_ref, y_ref, s1_ref, s2_ref, lhs_ref, *,
                       ksize, wpp, rows, cin_p, cout):
    """Phase 1: conv rows for one (image, H-tile) + masked partial sums.

    x_ref : (1, 1, SLAB_pad, Cin_pad)  haloed padded input slab (bf16)
    w_ref : (K*K*Cin_pad, Cout_pad)    fused per-tap weights     (bf16)
    m_ref : (1, 1, rows)               row-validity mask          (f32)
    y_ref : (1, 1, rows, Cout)         conv rows (bf16, real channels only)
    s1/s2 : (1, 1, 1, Cout)            masked sum / sum-of-squares (f32)
    lhs_ref: VMEM scratch (rows, K*K*Cin_pad)
    """
    # Gather the K*K row-shifted windows into one fused LHS so the conv is a
    # single deep-contraction MXU matmul. kh*wpp offsets are 8-aligned
    # (wpp % 8 == 0); only the +kw shifts are unaligned.
    for kh in range(ksize):
        for kw in range(ksize):
            t = kh * ksize + kw
            off = kh * wpp + kw
            lhs_ref[:, t * cin_p:(t + 1) * cin_p] = x_ref[0, 0, off:off + rows, :]

    acc = jnp.dot(lhs_ref[...], w_ref[...],
                  preferred_element_type=jnp.float32)      # (rows, Cout_pad) f32

    # Masked streaming stats on the MXU (it has slack) instead of VPU/XLU
    # axis-0 reductions:  s1 = mask_row @ acc,  s2 = mask_row @ acc^2.
    m = m_ref[0]                                            # (1, rows) f32
    s1 = jnp.dot(m, acc, preferred_element_type=jnp.float32)
    s2 = jnp.dot(m, acc * acc, preferred_element_type=jnp.float32)

    # Store only the real Cout channels, in bf16: the conv intermediate is the
    # dominant HBM tensor of the two-phase path.
    y_ref[0, 0] = acc[:, :cout].astype(y_ref.dtype)
    s1_ref[0, 0] = s1[:, :cout]
    s2_ref[0, 0] = s2[:, :cout]


def _norm_relu_kernel(y_ref, sc_ref, sh_ref, o_ref):
    """Phase 2: y * scale + shift, ReLU, emit final dtype directly."""
    y = y_ref[0, 0].astype(jnp.float32)                     # (rows, Cout)
    o_ref[0, 0] = jnp.maximum(y * sc_ref[0] + sh_ref[0], 0.0).astype(o_ref.dtype)


def conv_in_relu(x_nchw, w_oihw, gamma, beta, *, kernel=3, stride=1,
                 norm_type='BN', eps=1e-5, compute_dtype=jnp.bfloat16,
                 tile_h=None):
    """Pallas implementation of ConvINReLU.forward. Input/output are NCHW."""
    if stride != 1:
        raise NotImplementedError("stride != 1 not supported")  # TODO(synk)
    assert kernel % 2 == 1, "row-shift formulation assumes odd kernel (pad=K//2)"
    assert norm_type in ('BN', 'IN')

    N, Cin, H, W = map(int, x_nchw.shape)
    Cout = int(w_oihw.shape[0])
    K = kernel
    pad = K // 2

    is_bf16 = jnp.dtype(compute_dtype) == jnp.dtype(jnp.bfloat16)
    Cin_pad = _round_up(Cin, 16 if is_bf16 else 8)
    Cout_pad = _round_up(Cout, 128)            # lane-dense MXU output columns
    Wpp = _round_up(W + 2 * pad, 8)            # aligned padded row pitch

    # H tiling: bounds per-step VMEM and gives megacore a second parallel axis.
    if tile_h is None:
        tile_h = int(max(1, min(H, 2048 // max(Wpp, 1))))
    Hpad = _round_up(H, tile_h)
    n_ht = Hpad // tile_h
    ROWS_T = tile_h * Wpp                      # conv rows per tile (mult of 8)
    SLAB = (tile_h + K - 1) * Wpp              # padded input rows per tile
    SLAB_pad = _round_up(SLAB + K - 1, 8)      # + last tap's over-read

    # ---- host glue: layout, padding, halo duplication (input is small) ----
    x_nhwc = jnp.transpose(x_nchw, (0, 2, 3, 1)).astype(compute_dtype)
    xp = jnp.pad(x_nhwc, ((0, 0), (pad, Hpad - H + pad),
                          (pad, Wpp - W - pad), (0, Cin_pad - Cin)))
    slabs = [xp[:, i * tile_h: i * tile_h + tile_h + K - 1]
             for i in range(n_ht)]
    xb = jnp.stack(slabs, axis=1).reshape(N, n_ht, SLAB, Cin_pad)
    xb = jnp.pad(xb, ((0, 0), (0, 0), (0, SLAB_pad - SLAB), (0, 0)))

    # torch weight (Cout, Cin, kh, kw) -> fused (K*K*Cin_pad, Cout_pad)
    w_taps = jnp.transpose(w_oihw, (2, 3, 1, 0)).reshape(K * K, Cin, Cout)
    w_taps = jnp.pad(w_taps, ((0, 0), (0, Cin_pad - Cin), (0, Cout_pad - Cout)))
    w_fused = w_taps.reshape(K * K * Cin_pad, Cout_pad).astype(compute_dtype)

    # Per-tile row-validity mask: row r = h_local*Wpp + w is a real output iff
    # w < W and (tile*tile_h + h_local) < H.  Tiny f32 input (ROWS_T per tile).
    rr = np.arange(ROWS_T)
    w_ok = (rr % Wpp) < W
    h_loc = rr // Wpp
    mask = np.stack([w_ok & ((i * tile_h + h_loc) < H) for i in range(n_ht)])
    mask = jnp.asarray(mask[:, None, :], dtype=jnp.float32)   # (n_ht, 1, ROWS_T)

    cparams = pltpu.CompilerParams(
        dimension_semantics=("parallel", "parallel"),
        vmem_limit_bytes=_vmem_limit_bytes())

    grid = (N, n_ht)
    x_spec = pl.BlockSpec((1, 1, SLAB_pad, Cin_pad), lambda n, h: (n, h, 0, 0))
    w_spec = pl.BlockSpec((K * K * Cin_pad, Cout_pad), lambda n, h: (0, 0))
    m_spec = pl.BlockSpec((1, 1, ROWS_T), lambda n, h: (h, 0, 0))
    y_spec = pl.BlockSpec((1, 1, ROWS_T, Cout), lambda n, h: (n, h, 0, 0))
    s_spec = pl.BlockSpec((1, 1, 1, Cout), lambda n, h: (n, h, 0, 0))
    v_spec = pl.BlockSpec((1, 1, Cout), lambda n, h: (n, 0, 0))

    # ---- phase 1: conv + masked partial stats, per (image, H-tile) ----
    conv_rows, ps1, ps2 = pl.pallas_call(
        functools.partial(_conv_stats_kernel, ksize=K, wpp=Wpp, rows=ROWS_T,
                          cin_p=Cin_pad, cout=Cout),
        out_shape=(
            jax.ShapeDtypeStruct((N, n_ht, ROWS_T, Cout), compute_dtype),
            jax.ShapeDtypeStruct((N, n_ht, 1, Cout), jnp.float32),
            jax.ShapeDtypeStruct((N, n_ht, 1, Cout), jnp.float32),
        ),
        grid=grid,
        in_specs=[x_spec, w_spec, m_spec],
        out_specs=(y_spec, s_spec, s_spec),
        scratch_shapes=[pltpu.VMEM((ROWS_T, K * K * Cin_pad), compute_dtype)],
        compiler_params=cparams,
    )(xb, w_fused, mask)

    # ---- tiny cross-tile reduction + scale/shift fold (host glue) ----
    # TODO(synk): one-pass E[x^2]-E[x]^2 in f32 can cancel when |mean|>>std.
    g = gamma.astype(jnp.float32)
    b = beta.astype(jnp.float32)
    s1 = ps1[:, :, 0, :]                                    # (N, n_ht, Cout)
    s2 = ps2[:, :, 0, :]
    if norm_type == 'BN':
        cnt = float(N * H * W)
        mean = jnp.sum(s1, axis=(0, 1)) / cnt               # (Cout,)
        var = jnp.maximum(jnp.sum(s2, axis=(0, 1)) / cnt - mean * mean, 0.0)
        scale = g * jax.lax.rsqrt(var + eps)
        shift = b - mean * scale
        scale = jnp.broadcast_to(scale.reshape(1, 1, Cout), (N, 1, Cout))
        shift = jnp.broadcast_to(shift.reshape(1, 1, Cout), (N, 1, Cout))
    else:  # 'IN': per-image statistics
        cnt = float(H * W)
        mean = jnp.sum(s1, axis=1) / cnt                    # (N, Cout)
        var = jnp.maximum(jnp.sum(s2, axis=1) / cnt - mean * mean, 0.0)
        scale = g.reshape(1, Cout) * jax.lax.rsqrt(var + eps)
        shift = b.reshape(1, Cout) - mean * scale
        scale = scale.reshape(N, 1, Cout)
        shift = shift.reshape(N, 1, Cout)

    # ---- phase 2: normalize + ReLU, emit final dtype ----
    out = pl.pallas_call(
        _norm_relu_kernel,
        out_shape=jax.ShapeDtypeStruct((N, n_ht, ROWS_T, Cout), x_nchw.dtype),
        grid=grid,
        in_specs=[y_spec, v_spec, v_spec],
        out_specs=pl.BlockSpec((1, 1, ROWS_T, Cout), lambda n, h: (n, h, 0, 0)),
        compiler_params=cparams,
    )(conv_rows, scale, shift)

    # ---- host glue: strip junk columns / padded rows, back to NCHW ----
    out = out.reshape(N, Hpad, Wpp, Cout)[:, :H, :W, :]
    return jnp.transpose(out, (0, 3, 1, 2))


def _reference_forward(x, w, gamma, beta, *, kernel=3, norm_type='BN',
                       eps=1e-5, compute_dtype=jnp.bfloat16):
    """Plain-JAX reference of the PyTorch forward (NCHW), same compute dtype."""
    pad = kernel // 2
    out = jax.lax.conv_general_dilated(
        x.astype(compute_dtype), w.astype(compute_dtype), (1, 1),
        ((pad, pad), (pad, pad)),
        dimension_numbers=('NCHW', 'OIHW', 'NCHW'),
        preferred_element_type=jnp.float32)
    axes = (0, 2, 3) if norm_type == 'BN' else (2, 3)
    mean = out.mean(axis=axes, keepdims=True)
    var = jnp.mean(jnp.square(out - mean), axis=axes, keepdims=True)
    y = (out - mean) / jnp.sqrt(var + eps)
    y = y * gamma.reshape(1, -1, 1, 1) + beta.reshape(1, -1, 1, 1)
    return jnp.maximum(y, 0.0)


if __name__ == "__main__":
    key = jax.random.PRNGKey(0)
    k_x, k_w = jax.random.split(key)

    N, Cin, H, W = 2, 4, 16, 16
    Cout, K = 8, 3

    x = jax.random.normal(k_x, (N, Cin, H, W), dtype=jnp.float32)
    w = 0.1 * jax.random.normal(k_w, (Cout, Cin, K, K), dtype=jnp.float32)
    # PyTorch init values (InstanceNorm2d default has no affine => gamma=1, beta=0)
    gamma = jnp.ones((Cout,), dtype=jnp.float32)
    beta = jnp.zeros((Cout,), dtype=jnp.float32)

    for norm_type in ('BN', 'IN'):
        out = conv_in_relu(x, w, gamma, beta, kernel=K, stride=1,
                           norm_type=norm_type)
        out = jax.block_until_ready(out)
        ref = _reference_forward(x, w, gamma, beta, kernel=K,
                                 norm_type=norm_type)
        assert out.shape == (N, Cout, H, W)
        err = float(jnp.max(jnp.abs(out - ref)))
        # bf16 conv intermediate => ~1e-2-level tolerance vs the f32-normalized ref
        assert err < 2e-2, (norm_type, err)

    print("KERNEL_OK")
</pallas_src>

<mosaic_0001>
module attributes {stable_mosaic.version = 11 : i64} {
  func.func @_conv_stats_kernel(%arg0: i32, %arg1: i32, %arg2: memref<1x1x440x16xbf16, #tpu.memory_space<vmem>>, %arg3: memref<144x128xbf16, #tpu.memory_space<vmem>>, %arg4: memref<1x1x384xf32, #tpu.memory_space<vmem>>, %arg5: memref<1x1x384x8xbf16, #tpu.memory_space<vmem>>, %arg6: memref<1x1x1x8xf32, #tpu.memory_space<vmem>>, %arg7: memref<1x1x1x8xf32, #tpu.memory_space<vmem>>, %arg8: memref<384x144xbf16, #tpu.memory_space<vmem>>) attributes {dimension_semantics = [#tpu.dimension_semantics<parallel>, #tpu.dimension_semantics<parallel>], iteration_bounds = array<i64: 2, 1>, scalar_prefetch = 0 : i64, scratch_operands = 1 : i64, tpu.core_type = #tpu.core_type<tc>, window_params = [{transform_indices = @transform_0, window_bounds = array<i64: 1, 1, 440, 16>}, {pipeline_mode = #tpu.pipeline_mode<synchronous>, transform_indices = @transform_1, window_bounds = array<i64: 144, 128>}, {transform_indices = @transform_2, window_bounds = array<i64: 1, 1, 384>}, {transform_indices = @transform_3, window_bounds = array<i64: 1, 1, 384, 8>}, {transform_indices = @transform_4, window_bounds = array<i64: 1, 1, 1, 8>}, {transform_indices = @transform_5, window_bounds = array<i64: 1, 1, 1, 8>}]} {
    %c0 = arith.constant 0 : index
    %c0_0 = arith.constant 0 : index
    %c0_1 = arith.constant 0 : index
    %c0_2 = arith.constant 0 : index
    %0 = vector.load %arg2[%c0, %c0_0, %c0_1, %c0_2] : memref<1x1x440x16xbf16, #tpu.memory_space<vmem>>, vector<1x1x384x16xbf16>
    %1 = vector.shape_cast %0 : vector<1x1x384x16xbf16> to vector<384x16xbf16>
    %c0_3 = arith.constant 0 : index
    %c0_4 = arith.constant 0 : index
    %2 = vector.load %arg8[%c0_3, %c0_4] : memref<384x144xbf16, #tpu.memory_space<vmem>>, vector<384x16xbf16>
    tpu.vector_store %arg8[%c0_3, %c0_4], %1 {strides = array<i32>} : memref<384x144xbf16, #tpu.memory_space<vmem>>, vector<384x16xbf16>,
    %c0_5 = arith.constant 0 : index
    %c0_6 = arith.constant 0 : index
    %c1 = arith.constant 1 : index
    %c0_7 = arith.constant 0 : index
    %3 = vector.load %arg2[%c0_5, %c0_6, %c1, %c0_7] : memref<1x1x440x16xbf16, #tpu.memory_space<vmem>>, vector<1x1x384x16xbf16>
    %4 = vector.shape_cast %3 : vector<1x1x384x16xbf16> to vector<384x16xbf16>
    %c0_8 = arith.constant 0 : index
    %c16 = arith.constant 16 : index
    %5 = vector.load %arg8[%c0_8, %c16] : memref<384x144xbf16, #tpu.memory_space<vmem>>, vector<384x16xbf16>
    tpu.vector_store %arg8[%c0_8, %c16], %4 {strides = array<i32>} : memref<384x144xbf16, #tpu.memory_space<vmem>>, vector<384x16xbf16>,
    %c0_9 = arith.constant 0 : index
    %c0_10 = arith.constant 0 : index
    %c2 = arith.constant 2 : index
    %c0_11 = arith.constant 0 : index
    %6 = vector.load %arg2[%c0_9, %c0_10, %c2, %c0_11] : memref<1x1x440x16xbf16, #tpu.memory_space<vmem>>, vector<1x1x384x16xbf16>
    %7 = vector.shape_cast %6 : vector<1x1x384x16xbf16> to vector<384x16xbf16>
    %c0_12 = arith.constant 0 : index
    %c32 = arith.constant 32 : index
    %8 = vector.load %arg8[%c0_12, %c32] : memref<384x144xbf16, #tpu.memory_space<vmem>>, vector<384x16xbf16>
    tpu.vector_store %arg8[%c0_12, %c32], %7 {strides = array<i32>} : memref<384x144xbf16, #tpu.memory_space<vmem>>, vector<384x16xbf16>,
    %c0_13 = arith.constant 0 : index
    %c0_14 = arith.constant 0 : index
    %c24 = arith.constant 24 : index
    %c0_15 = arith.constant 0 : index
    %9 = vector.load %arg2[%c0_13, %c0_14, %c24, %c0_15] : memref<1x1x440x16xbf16, #tpu.memory_space<vmem>>, vector<1x1x384x16xbf16>
    %10 = vector.shape_cast %9 : vector<1x1x384x16xbf16> to vector<384x16xbf16>
    %c0_16 = arith.constant 0 : index
    %c48 = arith.constant 48 : index
    %11 = vector.load %arg8[%c0_16, %c48] : memref<384x144xbf16, #tpu.memory_space<vmem>>, vector<384x16xbf16>
    tpu.vector_store %arg8[%c0_16, %c48], %10 {strides = array<i32>} : memref<384x144xbf16, #tpu.memory_space<vmem>>, vector<384x16xbf16>,
    %c0_17 = arith.constant 0 : index
    %c0_18 = arith.constant 0 : index
    %c25 = arith.constant 25 : index
    %c0_19 = arith.constant 0 : index
    %12 = vector.load %arg2[%c0_17, %c0_18, %c25, %c0_19] : memref<1x1x440x16xbf16, #tpu.memory_space<vmem>>, vector<1x1x384x16xbf16>
    %13 = vector.shape_cast %12 : vector<1x1x384x16xbf16> to vector<384x16xbf16>
    %c0_20 = arith.constant 0 : index
    %c64 = arith.constant 64 : index
    %14 = vector.load %arg8[%c0_20, %c64] : memref<384x144xbf16, #tpu.memory_space<vmem>>, vector<384x16xbf16>
    tpu.vector_store %arg8[%c0_20, %c64], %13 {strides = array<i32>} : memref<384x144xbf16, #tpu.memory_space<vmem>>, vector<384x16xbf16>,
    %c0_21 = arith.constant 0 : index
    %c0_22 = arith.constant 0 : index
    %c26 = arith.constant 26 : index
    %c0_23 = arith.constant 0 : index
    %15 = vector.load %arg2[%c0_21, %c0_22, %c26, %c0_23] : memref<1x1x440x16xbf16, #tpu.memory_space<vmem>>, vector<1x1x384x16xbf16>
    %16 = vector.shape_cast %15 : vector<1x1x384x16xbf16> to vector<384x16xbf16>
    %c0_24 = arith.constant 0 : index
    %c80 = arith.constant 80 : index
    %17 = vector.load %arg8[%c0_24, %c80] : memref<384x144xbf16, #tpu.memory_space<vmem>>, vector<384x16xbf16>
    tpu.vector_store %arg8[%c0_24, %c80], %16 {strides = array<i32>} : memref<384x144xbf16, #tpu.memory_space<vmem>>, vector<384x16xbf16>,
    %c0_25 = arith.constant 0 : index
    %c0_26 = arith.constant 0 : index
    %c48_27 = arith.constant 48 : index
    %c0_28 = arith.constant 0 : index
    %18 = vector.load %arg2[%c0_25, %c0_26, %c48_27, %c0_28] : memref<1x1x440x16xbf16, #tpu.memory_space<vmem>>, vector<1x1x384x16xbf16>
    %19 = vector.shape_cast %18 : vector<1x1x384x16xbf16> to vector<384x16xbf16>
    %c0_29 = arith.constant 0 : index
    %c96 = arith.constant 96 : index
    %20 = vector.load %arg8[%c0_29, %c96] : memref<384x144xbf16, #tpu.memory_space<vmem>>, vector<384x16xbf16>
    tpu.vector_store %arg8[%c0_29, %c96], %19 {strides = array<i32>} : memref<384x144xbf16, #tpu.memory_space<vmem>>, vector<384x16xbf16>,
    %c0_30 = arith.constant 0 : index
    %c0_31 = arith.constant 0 : index
    %c49 = arith.constant 49 : index
    %c0_32 = arith.constant 0 : index
    %21 = vector.load %arg2[%c0_30, %c0_31, %c49, %c0_32] : memref<1x1x440x16xbf16, #tpu.memory_space<vmem>>, vector<1x1x384x16xbf16>
    %22 = vector.shape_cast %21 : vector<1x1x384x16xbf16> to vector<384x16xbf16>
    %c0_33 = arith.constant 0 : index
    %c112 = arith.constant 112 : index
    %23 = vector.load %arg8[%c0_33, %c112] : memref<384x144xbf16, #tpu.memory_space<vmem>>, vector<384x16xbf16>
    tpu.vector_store %arg8[%c0_33, %c112], %22 {strides = array<i32>} : memref<384x144xbf16, #tpu.memory_space<vmem>>, vector<384x16xbf16>,
    %c0_34 = arith.constant 0 : index
    %c0_35 = arith.constant 0 : index
    %c50 = arith.constant 50 : index
    %c0_36 = arith.constant 0 : index
    %24 = vector.load %arg2[%c0_34, %c0_35, %c50, %c0_36] : memref<1x1x440x16xbf16, #tpu.memory_space<vmem>>, vector<1x1x384x16xbf16>
    %25 = vector.shape_cast %24 : vector<1x1x384x16xbf16> to vector<384x16xbf16>
    %c0_37 = arith.constant 0 : index
    %c128 = arith.constant 128 : index
    %26 = vector.load %arg8[%c0_37, %c128] : memref<384x144xbf16, #tpu.memory_space<vmem>>, vector<384x16xbf16>
    tpu.vector_store %arg8[%c0_37, %c128], %25 {strides = array<i32>} : memref<384x144xbf16, #tpu.memory_space<vmem>>, vector<384x16xbf16>,
    %c0_38 = arith.constant 0 : index
    %c0_39 = arith.constant 0 : index
    %27 = vector.load %arg8[%c0_38, %c0_39] : memref<384x144xbf16, #tpu.memory_space<vmem>>, vector<384x144xbf16>
    %c0_40 = arith.constant 0 : index
    %c0_41 = arith.constant 0 : index
    %28 = vector.load %arg3[%c0_40, %c0_41] : memref<144x128xbf16, #tpu.memory_space<vmem>>, vector<144x128xbf16>
    %cst = arith.constant dense<0.000000e+00> : vector<384x128xf32>
    %29 = tpu.matmul %27, %28, %cst {dimension_numbers = #tpu.dot_dimension_numbers<[1], [0], [0], [1], [0, 0, 1, 1], [], []>} : vector<384x144xbf16>, vector<144x128xbf16>, vector<384x128xf32> -> vector<384x128xf32>
    %c0_42 = arith.constant 0 : index
    %c0_43 = arith.constant 0 : index
    %c0_44 = arith.constant 0 : index
    %30 = vector.load %arg4[%c0_42, %c0_43, %c0_44] : memref<1x1x384xf32, #tpu.memory_space<vmem>>, vector<1x1x384xf32>
    %31 = vector.shape_cast %30 : vector<1x1x384xf32> to vector<1x384xf32>
    %cst_45 = arith.constant dense<0.000000e+00> : vector<1x128xf32>
    %32 = tpu.matmul %31, %29, %cst_45 {dimension_numbers = #tpu.dot_dimension_numbers<[1], [0], [0], [1], [0, 0, 1, 1], [], []>} : vector<1x384xf32>, vector<384x128xf32>, vector<1x128xf32> -> vector<1x128xf32>
    %33 = arith.mulf %29, %29 : vector<384x128xf32>
    %cst_46 = arith.constant dense<0.000000e+00> : vector<1x128xf32>
    %34 = tpu.matmul %31, %33, %cst_46 {dimension_numbers = #tpu.dot_dimension_numbers<[1], [0], [0], [1], [0, 0, 1, 1], [], []>} : vector<1x384xf32>, vector<384x128xf32>, vector<1x128xf32> -> vector<1x128xf32>
    %35 = vector.extract_strided_slice %29 {offsets = [0, 0], sizes = [384, 8], strides = [1, 1]} : vector<384x128xf32> to vector<384x8xf32>
    %36 = arith.truncf %35 : vector<384x8xf32> to vector<384x8xbf16>
    %c0_47 = arith.constant 0 : index
    %c0_48 = arith.constant 0 : index
    %c0_49 = arith.constant 0 : index
    %c0_50 = arith.constant 0 : index
    %37 = vector.load %arg5[%c0_47, %c0_48, %c0_49, %c0_50] : memref<1x1x384x8xbf16, #tpu.memory_space<vmem>>, vector<1x1x384x8xbf16>
    %38 = vector.shape_cast %37 : vector<1x1x384x8xbf16> to vector<384x8xbf16>
    %39 = vector.shape_cast %36 : vector<384x8xbf16> to vector<1x1x384x8xbf16>
    tpu.vector_store %arg5[%c0_47, %c0_48, %c0_49, %c0_50], %39 {strides = array<i32>} : memref<1x1x384x8xbf16, #tpu.memory_space<vmem>>, vector<1x1x384x8xbf16>,
    %40 = vector.extract_strided_slice %32 {offsets = [0, 0], sizes = [1, 8], strides = [1, 1]} : vector<1x128xf32> to vector<1x8xf32>
    %c0_51 = arith.constant 0 : index
    %c0_52 = arith.constant 0 : index
    %c0_53 = arith.constant 0 : index
    %c0_54 = arith.constant 0 : index
    %41 = vector.load %arg6[%c0_51, %c0_52, %c0_53, %c0_54] : memref<1x1x1x8xf32, #tpu.memory_space<vmem>>, vector<1x1x1x8xf32>
    %42 = vector.shape_cast %41 : vector<1x1x1x8xf32> to vector<1x8xf32>
    %43 = vector.shape_cast %40 : vector<1x8xf32> to vector<1x1x1x8xf32>
    tpu.vector_store %arg6[%c0_51, %c0_52, %c0_53, %c0_54], %43 {strides = array<i32>} : memref<1x1x1x8xf32, #tpu.memory_space<vmem>>, vector<1x1x1x8xf32>,
    %44 = vector.extract_strided_slice %34 {offsets = [0, 0], sizes = [1, 8], strides = [1, 1]} : vector<1x128xf32> to vector<1x8xf32>
    %c0_55 = arith.constant 0 : index
    %c0_56 = arith.constant 0 : index
    %c0_57 = arith.constant 0 : index
    %c0_58 = arith.constant 0 : index
    %45 = vector.load %arg7[%c0_55, %c0_56, %c0_57, %c0_58] : memref<1x1x1x8xf32, #tpu.memory_space<vmem>>, vector<1x1x1x8xf32>
    %46 = vector.shape_cast %45 : vector<1x1x1x8xf32> to vector<1x8xf32>
    %47 = vector.shape_cast %44 : vector<1x8xf32> to vector<1x1x1x8xf32>
    tpu.vector_store %arg7[%c0_55, %c0_56, %c0_57, %c0_58], %47 {strides = array<i32>} : memref<1x1x1x8xf32, #tpu.memory_space<vmem>>, vector<1x1x1x8xf32>,
    return
  }
  func.func @transform_0(%arg0: i32, %arg1: i32) -> (i32, i32, i32, i32) {
    %c0_i32 = arith.constant 0 : i32
    %c0_i32_0 = arith.constant 0 : i32
    %c0_i32_1 = arith.constant 0 : i32
    return %arg0, %arg1, %c0_i32, %c0_i32_0 : i32, i32, i32, i32
  }
  func.func @transform_1(%arg0: i32, %arg1: i32) -> (i32, i32) {
    %c0_i32 = arith.constant 0 : i32
    %c0_i32_0 = arith.constant 0 : i32
    %c0_i32_1 = arith.constant 0 : i32
    return %c0_i32, %c0_i32_0 : i32, i32
  }
  func.func @transform_2(%arg0: i32, %arg1: i32) -> (i32, i32, i32) {
    %c0_i32 = arith.constant 0 : i32
    %c0_i32_0 = arith.constant 0 : i32
    %c0_i32_1 = arith.constant 0 : i32
    return %arg1, %c0_i32, %c0_i32_0 : i32, i32, i32
  }
  func.func @transform_3(%arg0: i32, %arg1: i32) -> (i32, i32, i32, i32) {
    %c0_i32 = arith.constant 0 : i32
    %c0_i32_0 = arith.constant 0 : i32
    %c0_i32_1 = arith.constant 0 : i32
    return %arg0, %arg1, %c0_i32, %c0_i32_0 : i32, i32, i32, i32
  }
  func.func @transform_4(%arg0: i32, %arg1: i32) -> (i32, i32, i32, i32) {
    %c0_i32 = arith.constant 0 : i32
    %c0_i32_0 = arith.constant 0 : i32
    %c0_i32_1 = arith.constant 0 : i32
    return %arg0, %arg1, %c0_i32, %c0_i32_0 : i32, i32, i32, i32
  }
  func.func @transform_5(%arg0: i32, %arg1: i32) -> (i32, i32, i32, i32) {
    %c0_i32 = arith.constant 0 : i32
    %c0_i32_0 = arith.constant 0 : i32
    %c0_i32_1 = arith.constant 0 : i32
    return %arg0, %arg1, %c0_i32, %c0_i32_0 : i32, i32, i32, i32
  }
}

</mosaic_0001>

<bundles_post_ra>
// kernel: tpu_custom_call.1
= control target key start
LH: loop header
LB: loop body
LE: loop exit
PB: predicated region body
PF: predicated region fallthrough
CT: control target
= control target key end

     0   :  { %11 = vsyncpa [#allocation4], 0  ;;  %s9415_s0 = inlined_call_operand.vmem [shape: bf16[2,1,440,16], index: 0, kind: input, shape index: {}]   ;;  %s9416_s1 = inlined_call_operand.vmem [shape: bf16[144,128], index: 1, kind: input, shape index: {}]   ;;  %s9417_s2 = inlined_call_operand.vmem [shape: f32[1,1,384], index: 2, kind: input, shape index: {}]   ;;  %s9418_s3 = inlined_call_operand.vmem [shape: bf16[2,1,384,8], index: 3, kind: output, shape index: {0}]   ;;  %s9419_s4 = inlined_call_operand.hbm [shape: f32[2,1,1,8], index: 4, kind: output, shape index: {1}]   ;;  %s9420_s5 = inlined_call_operand.hbm [shape: f32[2,1,1,8], index: 5, kind: output, shape index: {2}]  }
   0x1   :  { %13 = vsyncpa [#allocation4 + $0x1], 0 }
   0x2   :  { %14 = vsyncpa [#allocation6], 0 }
   0x3   :  { %16 = vsyncpa [#allocation6 + $0x1], 0  ;;  %s6066_s18 = smov 0   ;;  %s6068_s19 = smov 0  }
   0x4   :  { %s6070_s20 = smov 0   ;;  %s6072_s21 = smov 0  }
   0x5   :  { %s6074_s22 = smov 0   ;;  %s6076_s23 = smov 0  }
   0x6 LB: > { %s5517_s24 = sadd.s32 4294967295, %s6027_s23   ;;  %s5518_s25 = sadd.s32 4294967294, %s6027_s23   ;;  %s6027_s23 = sphi %s6076_s23, %s22_s23   ;;  %s6023_s22 = sphi %s6074_s22, %s9465_s22   ;;  %s6019_s21 = sphi %s6072_s21, %s9464_s21   ;;  %s6015_s20 = sphi %s6070_s20, %s9463_s20   ;;  %s6011_s19 = sphi %s6068_s19, %s9462_s19   ;;  %s6007_s18 = sphi %s6066_s18, %s9461_s18  }
   0x7   : > { %s34_s26 = sadd.s32 1, %s6023_s22  ;;  %s146_s27 = sadd.s32 1, %s6015_s20 }
   0x8   : > { %p36_p0 = scmp.ge.s32.totalorder %s34_s26, 2  ;;  %p156_p1 = scmp.ne.s32.totalorder %s6015_s20, %s6011_s19 }
   0x9   : > { %p157_p2 = scmp.eq.s32.totalorder %s5517_s24, 1  ;;  %p162_p3 = scmp.ne.s32.totalorder %s6011_s19, %s6007_s18 }
   0xa   : > { %s9467_s26 = smov (%p36_p0, %s34_s26), 0  ;;  %p163_p5 = scmp.eq.s32.totalorder %s5518_s25, 1 }
   0xb   : > { %p6106_p4 = por %p157_p2, %p156_p1  ;;  %s141_s29 = ssub.s32 %s6023_s22, %s9467_s26 }
   0xc   : > { %p5522_p6 = scmp.ge.s32.totalorder %s6027_s23, 1  ;;  %p144_p7 = scmp.eq.s32.totalorder %s141_s29, 0 }
   0xd   : > { %p6113_p8 = por %p163_p5, %p162_p3  ;;  %p231_p9 = scmp.lt.s32.totalorder %s6027_s23, 3 }
   0xe   : > { %s6119_s6 = scalar_select %p144_p7, %s6015_s20, %s146_s27  }
   0xf   : > { %p232_p10 = pnand %p5522_p6, %p231_p9 }
  0x11   : > { %235 = sbr.rel (%p232_p10) target bundleno = 1398 (0x576), region = 32 }
  0x16   : > { %p279_p11 = scmp.lt.s32.totalorder %s6019_s21, 1  ;;  %vm448_vm0 = vsmask.f32 3328  ;;  %vm449_vm1 = vsmask.f32 7440  ;;  %s6029_s12 = smov 16  }
  0x17   : > { %vm6139_vm2 = vmor %vm448_vm0, %vm449_vm1  ;;  %vm350_vm3 = vcmask 125952   ;;  %vm1079_vm4 = vcmask 257152   ;;  %vm1226_vm5 = vcmask 1042432   ;;  %vm1227_vm6 = vcmask 1046532   ;;  %s6030_s13 = smov 32   ;;  %s6031_s14 = smov 48  }
  0x18   : > { %s6123_s7 = scalar_select %p279_p11, %s6019_s21, 1  ;;  %vm6441_vm7 = vmor %vm1226_vm5, %vm1227_vm6  ;;  %vm1518_vm8 = vcmask 388352   ;;  %vm1807_vm9 = vcmask 519552   ;;  %vm4708_vm10 = vcmask 130048   ;;  %vm2533_vm11 = vcmask 650752  }
  0x19   : > { %s6032_s17 = smov 64   ;;  %s6033_s24 = smov 96   ;;  %vm2969_vm12 = vcmask 781952   ;;  %vm3258_vm13 = vcmask 913152   ;;  %vm3984_vm14 = vcmask 1044352   ;;  %vm5263_vm15 = vcmask 60416  }
  0x1a   : > { %s5848_s8 = smul.u32 220, %s6123_s7  ;;  %s6034_s25 = smov 80   ;;  %vm5312_vm0 = vcmask 57344  }
  0x1b   : > { %s6035_s27 = smov 112   ;;  %s5849_s29 = smul.u32 192, %s6123_s7 }
  0x1c   : > { %s6129_s11 = scalar_lea.vmem %s9415_s0, %s5848_s8 }
  0x1d   : > { %v401_v0 = vld [vmem:[%s6129_s11 + $0x8] sm:$0xf]  ;;  %v402_v1 = vld [vmem:[%s6129_s11 + $0xc] sm:$0xf]  ;;  %v399_v2 = vld [vmem:[%s6129_s11] sm:$0xf]  ;;  %s8020_s9 = scalar_lea.vmem %s9418_s3, %s5849_s29 }
  0x1e   : > { %v471_v3 = vshll.u32 %v401_v0, 16  ;;  %v475_v4 = vshrl.u32 %v401_v0, 16  ;;  %v481_v5 = vshll.u32 %v402_v1, 16  ;;  %v485_v6 = vshrl.u32 %v402_v1, 16  ;;  %v400_v7 = vld [vmem:[%s6129_s11 + $0x4] sm:$0xf] }
  0x1f   : > { %v452_v8 = vshrl.u32 %v399_v2, 16  ;;  %v455_v9 = vshll.u32 %v399_v2, 16  ;;  %v461_v10 = vshll.u32 %v400_v7, 16  ;;  %v465_v11 = vshrl.u32 %v400_v7, 16  ;;  %v403_v12 = vld [vmem:[%s6129_s11 + $0x10] sm:$0xf] }
  0x20   : > { %v473_v13 = vrot.slane %v471_v3, 5  ;;  %v477_v14 = vrot.slane %v475_v4, 4  ;;  %v483_v15 = vrot.slane %v481_v5, 5  ;;  %v487_v16 = vrot.slane %v485_v6, 4  ;;  %v406_v17 = vld [vmem:[%s6129_s11 + $0x1c] sm:$0xf] }
  0x21   : > { %v454_v18 = vrot.slane %v452_v8, 4  ;;  %v457_v19 = vrot.slane %v455_v9, 5  ;;  %v467_v20 = vrot.slane %v465_v11, 4  ;;  %v491_v23 = vshll.u32 %v403_v12, 16  ;;  %v405_v29 = vld [vmem:[%s6129_s11 + $0x18] sm:$0xf] }
  0x22   : > { %v478_v21 = vor.u32 %v477_v14, %v473_v13  ;;  %v488_v22 = vor.u32 %v487_v16, %v483_v15  ;;  %v463_v26 = vrot.slane %v461_v10, 5  ;;  %v521_v27 = vshll.u32 %v406_v17, 16  ;;  %v407_v38 = vld [vmem:[%s6129_s11 + $0x20] sm:$0xf]  ;;  %v409_v42 = vld [vmem:[%s6129_s11 + $0x28] sm:$0xf] }
  0x23   : > { %v458_v25 = vor.u32 %v457_v19, %v454_v18  ;;  %v525_v28 = vshrl.u32 %v406_v17, 16  ;;  %v493_v35 = vrot.slane %v491_v23, 5  ;;  %v511_v36 = vshll.u32 %v405_v29, 16  ;;  %v408_v43 = vld [vmem:[%s6129_s11 + $0x24] sm:$0xf] }
  0x24   : > { %v479_v30 = vrot.slane %v478_v21, 4  ;;  %v468_v32 = vor.u32 %v467_v20, %v463_v26  ;;  %v489_v34 = vrot.slane %v488_v22, 4  ;;  %v523_v39 = vrot.slane %v521_v27, 5  ;;  %v404_v47 = vld [vmem:[%s6129_s11 + $0x14] sm:$0xf] }
  0x25   : > { %v459_v31 = vrot.slane %v458_v25, 4  ;;  %v527_v40 = vrot.slane %v525_v28, 4  ;;  %v515_v41 = vshrl.u32 %v405_v29, 16  ;;  %v6153_v45 = vrot.slane %v511_v36, 5  ;;  %v412_v6 = vld [vmem:[%s6129_s11 + $0x34] sm:$0xf] }
  0x26   : > { %v484_v33 = vsel %vm6139_vm2, %v479_v30, %v483_v15  ;;  %v469_v44 = vrot.slane %v468_v32, 4  ;;  %v494_v48 = vsel %vm6139_vm2, %v489_v34, %v493_v35  ;;  %v531_v49 = vshll.u32 %v407_v38, 16  ;;  %v410_v8 = vld [vmem:[%s6129_s11 + $0x2c] sm:$0xf]  ;;  %v411_v10 = vld [vmem:[%s6129_s11 + $0x30] sm:$0xf] }
  0x27   : > { %939 = vrot.lane.b32.xlu1 %v484_v33, %s6029_s12  ;;  %v464_v37 = vsel %vm6139_vm2, %v459_v31, %v463_v26  ;;  %v517_v46 = vrot.slane %v515_v41, 4  ;;  %v528_v50 = vor.u32 %v527_v40, %v523_v39  ;;  %v551_v51 = vshll.u32 %v409_v42, 16  ;;  %v413_v25 = vld [vmem:[%s6129_s11 + $0x38] sm:$0xf]  ;;  %v415_v33 = vld [vmem:[%s6129_s11 + $0x40] sm:$0xf] }
  0x28   : > { %935 = vrot.lane.b32.xlu0 %v464_v37, %s6029_s12  ;;  %v555_v52 = vshrl.u32 %v409_v42, 16  ;;  %v495_v53 = vshrl.u32 %v403_v12, 16  ;;  %v541_v54 = vshll.u32 %v408_v43, 16  ;;  %v545_v55 = vshrl.u32 %v408_v43, 16  ;;  %v414_v37 = vld [vmem:[%s6129_s11 + $0x3c] sm:$0xf] }
  0x29   : > { %v501_v56 = vshll.u32 %v404_v47, 16  ;;  %v505_v57 = vshrl.u32 %v404_v47, 16  ;;  %v474_v58 = vsel %vm6139_vm2, %v469_v44, %v473_v13  ;;  %v518_v59 = vor.u32 %v517_v46, %v6153_v45 }
  0x2a   : > { %v497_v60 = vrot.slane %v495_v53, 4  ;;  %v529_v62 = vrot.slane %v528_v50, 4  ;;  %v533_v63 = vrot.slane %v531_v49, 5  ;;  %v553_v2 = vrot.slane %v551_v51, 5 }
  0x2b   : > { %v507_v61 = vrot.slane %v505_v57, 4  ;;  %v503_v1 = vrot.slane %v501_v56, 5  ;;  %v557_v3 = vrot.slane %v555_v52, 4  ;;  %v6163_v4 = vrot.slane %v541_v54, 5  ;;  %v416_v54 = vld [vmem:[%s6129_s11 + $0x44] sm:$0xf] }
  0x2c   : > { %v498_v0 = vor.u32 %v497_v60, %v493_v35  ;;  %v547_v5 = vrot.slane %v545_v55, 4  ;;  %v519_v7 = vrot.slane %v518_v59, 4  ;;  %v535_v12 = vshrl.u32 %v407_v38, 16  ;;  %v418_v57 = vld [vmem:[%s6129_s11 + $0x4c] sm:$0xf] }
  0x2d   : > { %v508_v11 = vor.u32 %v507_v61, %v503_v1  ;;  %v581_v14 = vshll.u32 %v412_v6, 16  ;;  %v585_v15 = vshrl.u32 %v412_v6, 16  ;;  %v534_v16 = vsel %vm6139_vm2, %v529_v62, %v533_v63  ;;  %v417_v61 = vld [vmem:[%s6129_s11 + $0x48] sm:$0xf] }
  0x2e   : > { %v499_v9 = vrot.slane %v498_v0, 4  ;;  %v558_v17 = vor.u32 %v557_v3, %v553_v2  ;;  %v561_v18 = vshll.u32 %v410_v8, 16  ;;  %v548_v19 = vor.u32 %v547_v5, %v6163_v4 }
  0x2f   : > { %941 = vrot.lane.b32.xlu1 %v494_v48, %s6029_s12  ;;  %v524_v20 = vsel %vm6139_vm2, %v519_v7, %v523_v39  ;;  %v571_v21 = vshll.u32 %v411_v10, 16  ;;  %v575_v22 = vshrl.u32 %v411_v10, 16  ;;  %v509_v23 = vrot.slane %v508_v11, 4 }
  0x30   : > { %937 = vrot.lane.b32.xlu0 %v474_v58, %s6029_s12  ;;  %v504_v13 = vsel %vm6139_vm2, %v499_v9, %v503_v1  ;;  %v583_v26 = vrot.slane %v581_v14, 5  ;;  %v587_v27 = vrot.slane %v585_v15, 4  ;;  %v537_v28 = vrot.slane %v535_v12, 4  ;;  %v419_v12 = vld [vmem:[%s6129_s11 + $0x50] sm:$0xf] }
  0x31   : > { %943 = vrot.lane.b32.xlu2 %v504_v13, %s6029_s12  ;;  %v559_v29 = vrot.slane %v558_v17, 4  ;;  %v563_v30 = vrot.slane %v561_v18, 5  ;;  %v565_v31 = vshrl.u32 %v410_v8, 16  ;;  %v549_v32 = vrot.slane %v548_v19, 4  ;;  %v421_v18 = vld [vmem:[%s6129_s11 + $0x58] sm:$0xf] }
  0x32   : > { %v6180_v34 = vrot.slane %v571_v21, 5  ;;  %v577_v35 = vrot.slane %v575_v22, 4  ;;  %v514_v36 = vsel %vm6139_vm2, %v509_v23, %v6153_v45  ;;  %v538_v38 = vor.u32 %v537_v28, %v533_v63  ;;  %v420_v22 = vld [vmem:[%s6129_s11 + $0x54] sm:$0xf] }
  0x33   : > { %v588_v39 = vor.u32 %v587_v27, %v583_v26  ;;  %v591_v40 = vshll.u32 %v413_v25, 16  ;;  %v611_v41 = vshll.u32 %v415_v33, 16  ;;  %v615_v42 = vshrl.u32 %v415_v33, 16 }
  0x34   : > { %v564_v43 = vsel %vm6139_vm2, %v559_v29, %v563_v30  ;;  %v601_v44 = vshll.u32 %v414_v37, 16  ;;  %v605_v46 = vshrl.u32 %v414_v37, 16  ;;  %v554_v47 = vsel %vm6139_vm2, %v549_v32, %v553_v2 }
  0x35   : > { %v578_v45 = vor.u32 %v577_v35, %v6180_v34  ;;  %v539_v48 = vrot.slane %v538_v38, 4  ;;  %v567_v49 = vrot.slane %v565_v31, 4  ;;  %v589_v50 = vrot.slane %v588_v39, 4  ;;  %v422_v35 = vld [vmem:[%s6129_s11 + $0x5c] sm:$0xf] }
  0x36   : > { %v593_v51 = vrot.slane %v591_v40, 5  ;;  %v613_v52 = vrot.slane %v611_v41, 5  ;;  %v617_v53 = vrot.slane %v615_v42, 4  ;;  %v6195_v55 = vrot.slane %v601_v44, 5  ;;  %v424_v42 = vld [vmem:[%s6129_s11 + $0x64] sm:$0xf] }
  0x37   : > { %949 = vrot.lane.b32.xlu1 %v534_v16, %s6029_s12  ;;  %v607_v56 = vrot.slane %v605_v46, 4  ;;  %v595_v58 = vshrl.u32 %v413_v25, 16  ;;  %v579_v59 = vrot.slane %v578_v45, 4  ;;  %v544_v60 = vsel %vm6139_vm2, %v539_v48, %v6163_v4 }
  0x38   : > { %947 = vrot.lane.b32.xlu0 %v524_v20, %s6029_s12  ;;  %v568_v62 = vor.u32 %v567_v49, %v563_v30  ;;  %v594_v63 = vsel %vm6139_vm2, %v589_v50, %v593_v51  ;;  %v618_v0 = vor.u32 %v617_v53, %v613_v52  ;;  %v621_v1 = vshll.u32 %v416_v54, 16 }
  0x39   : > { %945 = vrot.lane.b32.xlu2 %v514_v36, %s6029_s12  ;;  %v641_v2 = vshll.u32 %v418_v57, 16  ;;  %v608_v3 = vor.u32 %v607_v56, %v6195_v55  ;;  %v645_v5 = vshrl.u32 %v418_v57, 16  ;;  %v631_v6 = vshll.u32 %v417_v61, 16 }
  0x3a   : > { %v635_v7 = vshrl.u32 %v417_v61, 16  ;;  %v584_v4 = vsel %vm6139_vm2, %v579_v59, %v583_v26  ;;  %v569_v8 = vrot.slane %v568_v62, 4  ;;  %v597_v9 = vrot.slane %v595_v58, 4 }
  0x3b   : > { %v619_v10 = vrot.slane %v618_v0, 4  ;;  %v623_v11 = vrot.slane %v621_v1, 5  ;;  %v643_v13 = vrot.slane %v641_v2, 5  ;;  %v609_v14 = vrot.slane %v608_v3, 4  ;;  %v427_v2 = vld [vmem:[%s6129_s11 + $0x70] sm:$0xf] }
  0x3c   : > { %v647_v15 = vrot.slane %v645_v5, 4  ;;  %v6211_v16 = vrot.slane %v631_v6, 5  ;;  %v637_v17 = vrot.slane %v635_v7, 4  ;;  %v625_v19 = vshrl.u32 %v416_v54, 16  ;;  %v426_v7 = vld [vmem:[%s6129_s11 + $0x6c] sm:$0xf] }
  0x3d   : > { %v574_v20 = vsel %vm6139_vm2, %v569_v8, %v6180_v34  ;;  %v598_v21 = vor.u32 %v597_v9, %v593_v51  ;;  %v651_v23 = vshll.u32 %v419_v12, 16  ;;  %v671_v25 = vshll.u32 %v421_v18, 16 }
  0x3e   : > { %v675_v26 = vshrl.u32 %v421_v18, 16  ;;  %v624_v27 = vsel %vm6139_vm2, %v619_v10, %v623_v11  ;;  %v614_v28 = vsel %vm6139_vm2, %v609_v14, %v613_v52  ;;  %v648_v29 = vor.u32 %v647_v15, %v643_v13 }
  0x3f   : > { %955 = vrot.lane.b32.xlu1 %v564_v43, %s6029_s12  ;;  %v638_v30 = vor.u32 %v637_v17, %v6211_v16  ;;  %v661_v31 = vshll.u32 %v420_v22, 16  ;;  %v665_v32 = vshrl.u32 %v420_v22, 16  ;;  %v599_v33 = vrot.slane %v598_v21, 4  ;;  %v428_v21 = vld [vmem:[%s6129_s11 + $0x74] sm:$0xf] }
  0x40   : > { %953 = vrot.lane.b32.xlu0 %v554_v47, %s6029_s12  ;;  %v627_v34 = vrot.slane %v625_v19, 4  ;;  %v673_v36 = vrot.slane %v671_v25, 5  ;;  %v677_v37 = vrot.slane %v675_v26, 4  ;;  %v649_v38 = vrot.slane %v648_v29, 4  ;;  %v423_v47 = vld [vmem:[%s6129_s11 + $0x60] sm:$0xf] }
  0x41   : > { %951 = vrot.lane.b32.xlu2 %v544_v60, %s6029_s12  ;;  %v653_v39 = vrot.slane %v651_v23, 5  ;;  %v655_v40 = vshrl.u32 %v419_v12, 16  ;;  %v639_v41 = vrot.slane %v638_v30, 4  ;;  %v6228_v43 = vrot.slane %v661_v31, 5 }
  0x42   : > { %v667_v44 = vrot.slane %v665_v32, 4  ;;  %v604_v46 = vsel %vm6139_vm2, %v599_v33, %v6195_v55  ;;  %v628_v45 = vor.u32 %v627_v34, %v623_v11  ;;  %v678_v48 = vor.u32 %v677_v37, %v673_v36  ;;  %v429_v32 = vld [vmem:[%s6129_s11 + $0x78] sm:$0xf] }
  0x43   : > { %v681_v49 = vshll.u32 %v422_v35, 16  ;;  %v701_v50 = vshll.u32 %v424_v42, 16  ;;  %v705_v51 = vshrl.u32 %v424_v42, 16  ;;  %v654_v52 = vsel %vm6139_vm2, %v649_v38, %v653_v39 }
  0x44   : > { %v691_v53 = vshll.u32 %v423_v47, 16  ;;  %v695_v54 = vshrl.u32 %v423_v47, 16  ;;  %v644_v56 = vsel %vm6139_vm2, %v639_v41, %v643_v13  ;;  %v668_v55 = vor.u32 %v667_v44, %v6228_v43 }
  0x45   : > { %v629_v57 = vrot.slane %v628_v45, 4  ;;  %v657_v58 = vrot.slane %v655_v40, 4  ;;  %v679_v59 = vrot.slane %v678_v48, 4  ;;  %v683_v60 = vrot.slane %v681_v49, 5 }
  0x46   : > { %v703_v61 = vrot.slane %v701_v50, 5  ;;  %v707_v62 = vrot.slane %v705_v51, 4  ;;  %v6243_v0 = vrot.slane %v691_v53, 5  ;;  %v697_v1 = vrot.slane %v695_v54, 4  ;;  %v431_v50 = vld [vmem:[%s6129_s11 + $0x80] sm:$0xf] }
  0x47   : > { %961 = vrot.lane.b32.xlu1 %v594_v63, %s6029_s12  ;;  %v425_v63 = vld [vmem:[%s6129_s11 + $0x68] sm:$0xf]  ;;  %v685_v3 = vshrl.u32 %v422_v35, 16  ;;  %v669_v5 = vrot.slane %v668_v55, 4  ;;  %v634_v6 = vsel %vm6139_vm2, %v629_v57, %v6211_v16  ;;  %v684_v8 = vsel %vm6139_vm2, %v679_v59, %v683_v60 }
  0x48   : > { %959 = vrot.lane.b32.xlu0 %v584_v4, %s6029_s12  ;;  %v658_v4 = vor.u32 %v657_v58, %v653_v39  ;;  %v708_v9 = vor.u32 %v707_v62, %v703_v61  ;;  %v711_v10 = vshll.u32 %v425_v63, 16  ;;  %v731_v11 = vshll.u32 %v427_v2, 16  ;;  %v433_v51 = vld [vmem:[%s6129_s11 + $0x88] sm:$0xf] }
  0x49   : > { %957 = vrot.lane.b32.xlu2 %v574_v20, %s6029_s12  ;;  %v698_v12 = vor.u32 %v697_v1, %v6243_v0  ;;  %v735_v13 = vshrl.u32 %v427_v2, 16  ;;  %v721_v14 = vshll.u32 %v426_v7, 16  ;;  %v725_v15 = vshrl.u32 %v426_v7, 16 }
  0x4a   : > { %v674_v16 = vsel %vm6139_vm2, %v669_v5, %v673_v36  ;;  %v659_v17 = vrot.slane %v658_v4, 4  ;;  %v687_v18 = vrot.slane %v685_v3, 4  ;;  %v709_v19 = vrot.slane %v708_v9, 4 }
  0x4b   : > { %v713_v20 = vrot.slane %v711_v10, 5  ;;  %v733_v22 = vrot.slane %v731_v11, 5  ;;  %v699_v23 = vrot.slane %v698_v12, 4  ;;  %v737_v25 = vrot.slane %v735_v13, 4  ;;  %v436_v11 = vld [vmem:[%s6129_s11 + $0x94] sm:$0xf] }
  0x4c   : > { %v6259_v26 = vrot.slane %v721_v14, 5  ;;  %v715_v29 = vshrl.u32 %v425_v63, 16  ;;  %v664_v30 = vsel %vm6139_vm2, %v659_v17, %v6228_v43  ;;  %v688_v31 = vor.u32 %v687_v18, %v683_v60 }
  0x4d   : > { %v741_v33 = vshll.u32 %v428_v21, 16  ;;  %v714_v36 = vsel %vm6139_vm2, %v709_v19, %v713_v20  ;;  %v704_v37 = vsel %vm6139_vm2, %v699_v23, %v703_v61  ;;  %v738_v38 = vor.u32 %v737_v25, %v733_v22 }
  0x4e   : > { %v751_v40 = vshll.u32 %v429_v32, 16  ;;  %v755_v41 = vshrl.u32 %v429_v32, 16  ;;  %v689_v42 = vrot.slane %v688_v31, 4  ;;  %v717_v43 = vrot.slane %v715_v29, 4 }
  0x4f   : > { %967 = vrot.lane.b32.xlu1 %v624_v27, %s6029_s12  ;;  %v727_v27 = vrot.slane %v725_v15, 4  ;;  %v743_v44 = vrot.slane %v741_v33, 5  ;;  %v739_v48 = vrot.slane %v738_v38, 4  ;;  %v771_v58 = vshll.u32 %v431_v50, 16  ;;  %v435_v15 = vld [vmem:[%s6129_s11 + $0x90] sm:$0xf] }
  0x50   : > { %965 = vrot.lane.b32.xlu0 %v614_v28, %s6029_s12  ;;  %v430_v28 = vld [vmem:[%s6129_s11 + $0x7c] sm:$0xf]  ;;  %v757_v53 = vrot.slane %v755_v41, 4  ;;  %v694_v54 = vsel %vm6139_vm2, %v689_v42, %v6243_v0  ;;  %v718_v55 = vor.u32 %v717_v43, %v713_v20  ;;  %v791_v59 = vshll.u32 %v433_v51, 16  ;;  %v304_v42 = vld [vmem:[%s6129_s11 + $0x8] sm:$0xf] }
  0x51   : > { %963 = vrot.lane.b32.xlu2 %v604_v46, %s6029_s12  ;;  %v761_v34 = vshll.u32 %v430_v28, 16  ;;  %v765_v35 = vshrl.u32 %v430_v28, 16  ;;  %v728_v39 = vor.u32 %v727_v27, %v6259_v26  ;;  %v745_v46 = vshrl.u32 %v428_v21, 16  ;;  %v302_v43 = vld [vmem:[%s6129_s11] sm:$0xf] }
  0x52   : > { %v795_v60 = vshrl.u32 %v433_v51, 16  ;;  %v744_v61 = vsel %vm6139_vm2, %v739_v48, %v743_v44  ;;  %v719_v2 = vrot.slane %v718_v55, 4  ;;  %v6289_v7 = vrot.slane %v791_v59, 5  ;;  %353 = vst.msk [vmem:[#allocation2 + $0x10] sm:$0xf] %vm350_vm3, %v304_v42 }
  0x53   : > { %v763_v47 = vrot.slane %v761_v34, 5  ;;  %v767_v45 = vrot.slane %v765_v35, 4  ;;  %v729_v49 = vrot.slane %v728_v39, 4  ;;  %v747_v3 = vrot.slane %v745_v46, 4  ;;  %v439_v34 = vld [vmem:[%s6129_s11 + $0xa0] sm:$0xf] }
  0x54   : > { %v797_v4 = vrot.slane %v795_v60, 4  ;;  %v775_v12 = vshrl.u32 %v431_v50, 16  ;;  %v724_v14 = vsel %vm6139_vm2, %v719_v2, %v6259_v26  ;;  %v821_v19 = vshll.u32 %v436_v11, 16  ;;  %351 = vst.msk [vmem:[#allocation2] sm:$0xf] %vm350_vm3, %v302_v43 }
  0x55   : > { %v768_v57 = vor.u32 %v767_v45, %v763_v47  ;;  %v734_v1 = vsel %vm6139_vm2, %v729_v49, %v733_v22  ;;  %v825_v20 = vshrl.u32 %v436_v11, 16  ;;  %v811_v23 = vshll.u32 %v435_v15, 16  ;;  %v440_v60 = vld [vmem:[%s6129_s11 + $0xa4] sm:$0xf] }
  0x56   : > { %v798_v17 = vor.u32 %v797_v4, %v6289_v7  ;;  %v815_v25 = vshrl.u32 %v435_v15, 16  ;;  %v777_v28 = vrot.slane %v775_v12, 4  ;;  %v6310_v32 = vrot.slane %v821_v19, 5 }
  0x57   : > { %973 = vrot.lane.b32.xlu1 %v654_v52, %s6029_s12  ;;  %v6276_v52 = vrot.slane %v751_v40, 5  ;;  %v769_v5 = vrot.slane %v768_v57, 4  ;;  %v827_v33 = vrot.slane %v825_v20, 4  ;;  %v438_v40 = vld [vmem:[%s6129_s11 + $0x9c] sm:$0xf]  ;;  %v855_v46 = vshrl.u32 %v439_v34, 16 }
  0x58   : > { %971 = vrot.lane.b32.xlu0 %v644_v56, %s6029_s12  ;;  %v432_v56 = vld [vmem:[%s6129_s11 + $0x84] sm:$0xf]  ;;  %v817_v38 = vrot.slane %v815_v25, 4  ;;  %v841_v50 = vshll.u32 %v438_v40, 16  ;;  %v845_v51 = vshrl.u32 %v438_v40, 16 }
  0x59   : > { %969 = vrot.lane.b32.xlu2 %v634_v6, %s6029_s12  ;;  %v781_v62 = vshll.u32 %v432_v56, 16  ;;  %v785_v63 = vshrl.u32 %v432_v56, 16  ;;  %v758_v0 = vor.u32 %v757_v53, %v6276_v52  ;;  %v773_v6 = vrot.slane %v771_v58, 5 }
  0x5a   : > { %v828_v45 = vor.u32 %v827_v33, %v6310_v32  ;;  %v857_v57 = vrot.slane %v855_v46, 4  ;;  %v309_v33 = vld [vmem:[%s6129_s11 + $0x1c] sm:$0xf] }
  0x5b   : > { %v6293_v9 = vrot.slane %v781_v62, 5  ;;  %v787_v10 = vrot.slane %v785_v63, 4  ;;  %v759_v13 = vrot.slane %v758_v0, 4  ;;  %v774_v21 = vsel %vm6139_vm2, %v769_v5, %v773_v6  ;;  %v442_v63 = vld [vmem:[%s6129_s11 + $0xac] sm:$0xf] }
  0x5c   : > { %v778_v41 = vor.u32 %v777_v28, %v773_v6  ;;  %v829_v58 = vrot.slane %v828_v45, 4  ;;  %v847_v62 = vrot.slane %v845_v51, 4  ;;  %v305_v6 = vld [vmem:[%s6129_s11 + $0xc] sm:$0xf]  ;;  %v881_v11 = vshll.u32 %v442_v63, 16 }
  0x5d   : > { %v788_v22 = vor.u32 %v787_v10, %v6293_v9  ;;  %v764_v26 = vsel %vm6139_vm2, %v759_v13, %v763_v47  ;;  %v306_v47 = vld [vmem:[%s6129_s11 + $0x10] sm:$0xf]  ;;  %354 = vst.msk [vmem:[#allocation2 + $0x18] sm:$0xf] %vm350_vm3, %v305_v6  ;;  %v307_v10 = vld [vmem:[%s6129_s11 + $0x14] sm:$0xf] }
  0x5e   : > { %355 = vst.msk [vmem:[#allocation2 + $0x20] sm:$0xf] %vm350_vm3, %v306_v47  ;;  %v885_v12 = vshrl.u32 %v442_v63, 16  ;;  %v443_v28 = vld [vmem:[%s6129_s11 + $0xb0] sm:$0xf] }
  0x5f   : > { %979 = vrot.lane.b32.xlu1 %v684_v8, %s6029_s12  ;;  %v434_v8 = vld [vmem:[%s6129_s11 + $0x8c] sm:$0xf]  ;;  %v789_v35 = vrot.slane %v788_v22, 4  ;;  %356 = vst.msk [vmem:[#allocation2 + $0x28] sm:$0xf] %vm350_vm3, %v307_v10 }
  0x60   : > { %977 = vrot.lane.b32.xlu0 %v674_v16, %s6029_s12  ;;  %v748_v16 = vor.u32 %v747_v3, %v743_v44  ;;  %v801_v18 = vshll.u32 %v434_v8, 16  ;;  %v805_v29 = vshrl.u32 %v434_v8, 16  ;;  %v851_v44 = vshll.u32 %v439_v34, 16  ;;  %v308_v34 = vld [vmem:[%s6129_s11 + $0x18] sm:$0xf] }
  0x61   : > { %975 = vrot.lane.b32.xlu2 %v664_v30, %s6029_s12  ;;  %v799_v30 = vrot.slane %v798_v17, 4  ;;  %v861_v8 = vshll.u32 %v440_v60, 16  ;;  %v887_v22 = vrot.slane %v885_v12, 4  ;;  %358 = vst.msk [vmem:[#allocation2 + $0x38] sm:$0xf] %vm350_vm3, %v309_v33 }
  0x62   : > { %v749_v27 = vrot.slane %v748_v16, 4  ;;  %v6308_v31 = vrot.slane %v801_v18, 5  ;;  %v807_v56 = vrot.slane %v805_v29, 4  ;;  %v6336_v55 = vrot.slane %v851_v44, 5  ;;  %v445_v29 = vld [vmem:[%s6129_s11 + $0xb8] sm:$0xf] }
  0x63   : > { %v863_v20 = vrot.slane %v861_v8, 5  ;;  %357 = vst.msk [vmem:[#allocation2 + $0x30] sm:$0xf] %vm350_vm3, %v308_v34  ;;  %v1129_v12 = vld [vmem:[%s6129_s11 + $0x4] sm:$0xf] }
  0x64   : > { %v754_v39 = vsel %vm6139_vm2, %v749_v27, %v6276_v52  ;;  %v804_v49 = vsel %vm6139_vm2, %v799_v30, %v6308_v31  ;;  %v794_v52 = vsel %vm6139_vm2, %v789_v35, %v6289_v7  ;;  %v808_v5 = vor.u32 %v807_v56, %v6308_v31  ;;  %v303_v7 = vld [vmem:[%s6129_s11 + $0x4] sm:$0xf]  ;;  %v444_v31 = vld [vmem:[%s6129_s11 + $0xb4] sm:$0xf]  ;;  %v1132_v33 = vld [vmem:[%s6129_s11 + $0x10] sm:$0xf] }
  0x65   : > { %v858_v4 = vor.u32 %v857_v57, %v6336_v55  ;;  %352 = vst.msk [vmem:[#allocation2 + $0x8] sm:$0xf] %vm350_vm3, %v303_v7  ;;  %v901_v42 = vshll.u32 %v444_v31, 16  ;;  %v905_v43 = vshrl.u32 %v444_v31, 16 }
  0x66   : > { %v809_v17 = vrot.slane %v808_v5, 4 }
  0x67   : > { %985 = vrot.lane.b32.xlu1 %v714_v36, %s6029_s12  ;;  %v437_v36 = vld [vmem:[%s6129_s11 + $0x98] sm:$0xf]  ;;  %v859_v19 = vrot.slane %v858_v4, 4  ;;  %v907_v56 = vrot.slane %v905_v43, 4  ;;  %v1133_v43 = vld [vmem:[%s6129_s11 + $0x14] sm:$0xf] }
  0x68   : > { %983 = vrot.lane.b32.xlu0 %v704_v37, %s6029_s12  ;;  %v6315_v37 = vrot.slane %v811_v23, 5  ;;  %v831_v48 = vshll.u32 %v437_v36, 16  ;;  %v835_v0 = vshrl.u32 %v437_v36, 16  ;;  %v310_v36 = vld [vmem:[%s6129_s11 + $0x20] sm:$0xf] }
  0x69   : > { %981 = vrot.lane.b32.xlu2 %v694_v54, %s6029_s12  ;;  %v779_v54 = vrot.slane %v778_v41, 4  ;;  %v864_v35 = vsel %vm6139_vm2, %v859_v19, %v863_v20  ;;  %v911_v41 = vshll.u32 %v445_v29, 16  ;;  %359 = vst.msk [vmem:[#allocation2 + $0x40] sm:$0xf] %vm350_vm3, %v310_v36 }
  0x6a   : > { %v818_v53 = vor.u32 %v817_v38, %v6315_v37  ;;  %v833_v59 = vrot.slane %v831_v48, 5  ;;  %v837_v18 = vrot.slane %v835_v0, 4  ;;  %v814_v30 = vsel %vm6139_vm2, %v809_v17, %v6315_v37  ;;  %v316_v17 = vld [vmem:[%s6129_s11 + $0x38] sm:$0xf] }
  0x6b   : > { %v784_v3 = vsel %vm6139_vm2, %v779_v54, %v6293_v9  ;;  %v915_v37 = vshrl.u32 %v445_v29, 16  ;;  %v6392_v54 = vrot.slane %v901_v42, 5  ;;  %365 = vst.msk [vmem:[#allocation2 + $0x70] sm:$0xf] %vm350_vm3, %v316_v17 }
  0x6c   : > { %v819_v2 = vrot.slane %v818_v53, 4  ;;  %v834_v15 = vsel %vm6139_vm2, %v829_v58, %v833_v59 }
  0x6d   : > { %v917_v53 = vrot.slane %v915_v37, 4  ;;  %v319_v37 = vld [vmem:[%s6129_s11 + $0x44] sm:$0xf] }
  0x6e   : > { %v824_v16 = vsel %vm6139_vm2, %v819_v2, %v6310_v32  ;;  %v838_v32 = vor.u32 %v837_v18, %v833_v59  ;;  %v312_v59 = vld [vmem:[%s6129_s11 + $0x28] sm:$0xf]  ;;  %v908_v2 = vor.u32 %v907_v56, %v6392_v54  ;;  %368 = vst.msk [vmem:[#allocation2 + $0x88] sm:$0xf] %vm350_vm3, %v319_v37 }
  0x6f   : > { %991 = vrot.lane.b32.xlu1 %v744_v61, %s6029_s12  ;;  %v6341_v61 = vrot.slane %v841_v50, 5  ;;  %v895_v50 = vshrl.u32 %v443_v28, 16  ;;  %361 = vst.msk [vmem:[#allocation2 + $0x50] sm:$0xf] %vm350_vm3, %v312_v59  ;;  %v320_v59 = vld [vmem:[%s6129_s11 + $0x48] sm:$0xf] }
  0x70   : > { %989 = vrot.lane.b32.xlu0 %v734_v1, %s6029_s12  ;;  %v441_v1 = vld [vmem:[%s6129_s11 + $0xa8] sm:$0xf]  ;;  %v839_v46 = vrot.slane %v838_v32, 4  ;;  %v909_v8 = vrot.slane %v908_v2, 4  ;;  %369 = vst.msk [vmem:[#allocation2 + $0x90] sm:$0xf] %vm350_vm3, %v320_v59 }
  0x71   : > { %987 = vrot.lane.b32.xlu2 %v724_v14, %s6029_s12  ;;  %v871_v13 = vshll.u32 %v441_v1, 16  ;;  %v875_v14 = vshrl.u32 %v441_v1, 16  ;;  %v848_v9 = vor.u32 %v847_v62, %v6341_v61  ;;  %v313_v62 = vld [vmem:[%s6129_s11 + $0x2c] sm:$0xf]  ;;  %v897_v5 = vrot.slane %v895_v50, 4 }
  0x72   : > { %v844_v57 = vsel %vm6139_vm2, %v839_v46, %v6341_v61  ;;  %362 = vst.msk [vmem:[#allocation2 + $0x58] sm:$0xf] %vm350_vm3, %v313_v62 }
  0x73   : > { %v6366_v23 = vrot.slane %v871_v13, 5  ;;  %v877_v25 = vrot.slane %v875_v14, 4  ;;  %v849_v27 = vrot.slane %v848_v9, 4 }
  0x75   : > { %v878_v40 = vor.u32 %v877_v25, %v6366_v23  ;;  %v854_v44 = vsel %vm6139_vm2, %v849_v27, %v6336_v55  ;;  %v446_v55 = vld [vmem:[%s6129_s11 + $0xbc] sm:$0xf]  ;;  %v1128_v25 = vld [vmem:[%s6129_s11] sm:$0xe]  ;;  %v447_v27 = vld [vmem:[%s6129_s11 + $0xc0] sm:$0x1] }
  0x76   : > { %v921_v0 = vshll.u32 %v446_v55, 16  ;;  %v5525_v32 = vrot.slane %v1128_v25, 9  ;;  %v931_v36 = vshll.u32 %v447_v27, 16  ;;  %v1141_v27 = vld [vmem:[%s6129_s11 + $0x34] sm:$0xf] }
  0x77   : > { %997 = vrot.lane.b32.xlu1 %v774_v21, %s6029_s12  ;;  %v6364_v21 = vrot.slane %v881_v11, 5  ;;  %v879_v51 = vrot.slane %v878_v40, 4  ;;  %v925_v11 = vshrl.u32 %v446_v55, 16  ;;  %v1131_v40 = vld [vmem:[%s6129_s11 + $0xc] sm:$0xf] }
  0x78   : > { %995 = vrot.lane.b32.xlu0 %v764_v26, %s6029_s12  ;;  %v865_v26 = vshrl.u32 %v440_v60, 16  ;;  %v311_v60 = vld [vmem:[%s6129_s11 + $0x24] sm:$0xf]  ;;  %v923_v4 = vrot.slane %v921_v0, 5  ;;  %v321_v55 = vld [vmem:[%s6129_s11 + $0x4c] sm:$0xf] }
  0x79   : > { %993 = vrot.lane.b32.xlu2 %v754_v39, %s6029_s12  ;;  %v888_v38 = vor.u32 %v887_v22, %v6364_v21  ;;  %v891_v39 = vshll.u32 %v443_v28, 16  ;;  %360 = vst.msk [vmem:[#allocation2 + $0x48] sm:$0xf] %vm350_vm3, %v311_v60  ;;  %v884_v61 = vsel %vm6139_vm2, %v879_v51, %v6364_v21  ;;  %v1231_v21 = vrot.slane %v1129_v12, 5  ;;  %v322_v60 = vld [vmem:[%s6129_s11 + $0x50] sm:$0xf] }
  0x7a   : > { %v867_v47 = vrot.slane %v865_v26, 4  ;;  %v1243_v51 = vrot.slane %v1133_v43, 5  ;;  %370 = vst.msk [vmem:[#allocation2 + $0x98] sm:$0xf] %vm350_vm3, %v321_v55  ;;  %v1136_v0 = vld [vmem:[%s6129_s11 + $0x20] sm:$0xf] }
  0x7b   : > { %v889_v48 = vrot.slane %v888_v38, 4  ;;  %v1233_v28 = vrot.slane %v1231_v21, 4  ;;  %v318_v38 = vld [vmem:[%s6129_s11 + $0x40] sm:$0xf]  ;;  %v1232_v46 = vsel %vm6441_vm7, %v5525_v32, %v1231_v21  ;;  %371 = vst.msk [vmem:[#allocation2 + $0xa0] sm:$0xf] %vm350_vm3, %v322_v60 }
  0x7c   : > { %v868_v58 = vor.u32 %v867_v47, %v863_v20  ;;  %v6428_v20 = vld [vmem:[%s6129_s11 + $0x8] sm:$0xf]  ;;  %367 = vst.msk [vmem:[#allocation2 + $0x80] sm:$0xf] %vm350_vm3, %v318_v38  ;;  %v1237_v47 = vrot.slane %v1131_v40, 5 }
  0x7d   : > { %v1234_v29 = vrot.slane %v6428_v20, 5  ;;  %v1245_v20 = vrot.slane %v1243_v51, 4  ;;  %v1140_v32 = vld [vmem:[%s6129_s11 + $0x30] sm:$0xf]  ;;  %v1145_v55 = vld [vmem:[%s6129_s11 + $0x44] sm:$0xf] }
  0x7e   : > { %v1264_v40 = vrot.slane %v1140_v32, 5 }
  0x7f   : > { %1003 = vrot.lane.b32.xlu1 %v804_v49, %s6029_s12  ;;  %v893_v49 = vrot.slane %v891_v39, 5  ;;  %v1235_v42 = vsel %vm6441_vm7, %v1233_v28, %v1234_v29 }
  0x80   : > { %1001 = vrot.lane.b32.xlu0 %v794_v52, %s6029_s12  ;;  %v913_v52 = vrot.slane %v911_v41, 5  ;;  %v317_v41 = vld [vmem:[%s6129_s11 + $0x3c] sm:$0xf] }
  0x81   : > { %999 = vrot.lane.b32.xlu2 %v784_v3, %s6029_s12  ;;  %v894_v63 = vsel %vm6139_vm2, %v889_v48, %v893_v49  ;;  %v869_v3 = vrot.slane %v868_v58, 4  ;;  %v898_v14 = vor.u32 %v897_v5, %v893_v49  ;;  %v933_v48 = vrot.slane %v931_v36, 5  ;;  %366 = vst.msk [vmem:[#allocation2 + $0x78] sm:$0xf] %vm350_vm3, %v317_v41  ;;  %v1134_v58 = vld [vmem:[%s6129_s11 + $0x18] sm:$0xf] }
  0x82   : > { %v918_v1 = vor.u32 %v917_v53, %v913_v52  ;;  %v914_v19 = vsel %vm6139_vm2, %v909_v8, %v913_v52  ;;  %v1239_v53 = vrot.slane %v1237_v47, 4  ;;  %v1246_v2 = vrot.slane %v1134_v58, 5  ;;  %v1138_v8 = vld [vmem:[%s6129_s11 + $0x28] sm:$0xf] }
  0x83   : > { %v874_v13 = vsel %vm6139_vm2, %v869_v3, %v6366_v23  ;;  %v899_v22 = vrot.slane %v898_v14, 4  ;;  %v927_v23 = vrot.slane %v925_v11, 4  ;;  %v324_v11 = vld [vmem:[%s6129_s11 + $0x58] sm:$0xf]  ;;  %v323_v14 = vld [vmem:[%s6129_s11 + $0x54] sm:$0xf] }
  0x84   : > { %v919_v7 = vrot.slane %v918_v1, 4  ;;  %373 = vst.msk [vmem:[#allocation2 + $0xb0] sm:$0xf] %vm350_vm3, %v324_v11  ;;  %v1247_v28 = vsel %vm6441_vm7, %v1245_v20, %v1246_v2  ;;  %v1267_v36 = vrot.slane %v1141_v27, 5  ;;  %v1148_v11 = vld [vmem:[%s6129_s11 + $0x50] sm:$0xf] }
  0x85   : > { %v904_v34 = vsel %vm6139_vm2, %v899_v22, %v6392_v54  ;;  %v1135_v54 = vld [vmem:[%s6129_s11 + $0x1c] sm:$0xf]  ;;  %372 = vst.msk [vmem:[#allocation2 + $0xa8] sm:$0xf] %vm350_vm3, %v323_v14  ;;  %v336_v20 = vld [vmem:[%s6129_s11 + $0x88] sm:$0xf] }
  0x86   : > { %v924_v18 = vsel %vm6139_vm2, %v919_v7, %v923_v4  ;;  %385 = vst.msk [vmem:[#allocation2 + $0x110] sm:$0xf] %vm350_vm3, %v336_v20  ;;  %v1160_v20 = vld [vmem:[%s6129_s11 + $0x80] sm:$0xf] }
  0x87   : > { %1009 = vrot.lane.b32.xlu1 %v834_v15, %s6029_s12  ;;  %v315_v15 = vld [vmem:[%s6129_s11 + $0x34] sm:$0xf] }
  0x88   : > { %1007 = vrot.lane.b32.xlu0 %v824_v16, %s6029_s12  ;;  %v314_v16 = vld [vmem:[%s6129_s11 + $0x30] sm:$0xf]  ;;  %364 = vst.msk [vmem:[#allocation2 + $0x68] sm:$0xf] %vm350_vm3, %v315_v15  ;;  %v325_v15 = vld [vmem:[%s6129_s11 + $0x5c] sm:$0xf] }
  0x89   : > { %1005 = vrot.lane.b32.xlu2 %v814_v30, %s6029_s12  ;;  %363 = vst.msk [vmem:[#allocation2 + $0x60] sm:$0xf] %vm350_vm3, %v314_v16  ;;  %v1258_v16 = vrot.slane %v1138_v8, 5 }
  0x8a   : > { %374 = vst.msk [vmem:[#allocation2 + $0xb8] sm:$0xf] %vm350_vm3, %v325_v15 }
  0x8b   : > { %v944_v45 = vpop.permute.xlu2 %943  ;;  %v1260_v22 = vrot.slane %v1258_v16, 4 }
  0x8c   : > { %1084 = vst.msk [vmem:[#allocation2 + $0x20] sm:$0xf] %vm1079_vm4, %v944_v45 }
  0x8f   : > { %1015 = vrot.lane.b32.xlu1 %v864_v35, %s6029_s12  ;;  %v928_v35 = vor.u32 %v927_v23, %v923_v4  ;;  %v1248_v4 = vrot.slane %v1246_v2, 4 }
  0x90   : > { %1013 = vrot.lane.b32.xlu0 %v854_v44, %s6029_s12  ;;  %v1240_v44 = vrot.slane %v1132_v33, 5  ;;  %v326_v33 = vld [vmem:[%s6129_s11 + $0x60] sm:$0xf] }
  0x91   : > { %1011 = vrot.lane.b32.xlu2 %v844_v57, %s6029_s12  ;;  %v929_v45 = vrot.slane %v928_v35, 4  ;;  %375 = vst.msk [vmem:[#allocation2 + $0xc0] sm:$0xf] %vm350_vm3, %v326_v33 }
  0x92   : > { %v1242_v50 = vrot.slane %v1240_v44, 4  ;;  %v1241_v1 = vsel %vm6441_vm7, %v1239_v53, %v1240_v44 }
  0x93   : > { %v946_v6 = vpop.permute.xlu2 %945  ;;  %v934_v56 = vsel %vm6139_vm2, %v929_v45, %v933_v48  ;;  %v330_v48 = vld [vmem:[%s6129_s11 + $0x70] sm:$0xf] }
  0x94   : > { %1085 = vst.msk [vmem:[#allocation2 + $0x28] sm:$0xf] %vm1079_vm4, %v946_v6  ;;  %v1244_v62 = vsel %vm6441_vm7, %v1242_v50, %v1243_v51  ;;  %v1252_v6 = vrot.slane %v1136_v0, 5  ;;  %v1143_v50 = vld [vmem:[%s6129_s11 + $0x3c] sm:$0xf] }
  0x95   : > { %v329_v51 = vld [vmem:[%s6129_s11 + $0x6c] sm:$0xf]  ;;  %379 = vst.msk [vmem:[#allocation2 + $0xe0] sm:$0xf] %vm350_vm3, %v330_v48  ;;  %v1154_v48 = vld [vmem:[%s6129_s11 + $0x68] sm:$0xf] }
  0x96   : > { %v1254_v41 = vrot.slane %v1252_v6, 4  ;;  %378 = vst.msk [vmem:[#allocation2 + $0xd8] sm:$0xf] %vm350_vm3, %v329_v51  ;;  %v1147_v0 = vld [vmem:[%s6129_s11 + $0x4c] sm:$0xf] }
  0x97   : > { %1021 = vrot.lane.b32.xlu1 %v894_v63, %s6029_s12  ;;  %v1249_v63 = vrot.slane %v1135_v54, 5  ;;  %v1285_v8 = vrot.slane %v1147_v0, 5 }
  0x98   : > { %1019 = vrot.lane.b32.xlu0 %v884_v61, %s6029_s12  ;;  %v1236_v61 = vrot.slane %v1234_v29, 4  ;;  %v327_v29 = vld [vmem:[%s6129_s11 + $0x64] sm:$0xf] }
  0x99   : > { %v940_v10 = vpop.permute.xlu1 %939  ;;  %1017 = vrot.lane.b32.xlu2 %v874_v13, %s6029_s12  ;;  %v1251_v5 = vrot.slane %v1249_v63, 4  ;;  %v1137_v13 = vld [vmem:[%s6129_s11 + $0x24] sm:$0xf]  ;;  %v1250_v17 = vsel %vm6441_vm7, %v1248_v4, %v1249_v63  ;;  %376 = vst.msk [vmem:[#allocation2 + $0xc8] sm:$0xf] %vm350_vm3, %v327_v29  ;;  %v1287_v15 = vrot.slane %v1285_v8, 4 }
  0x9a   : > { %1082 = vst.msk [vmem:[#allocation2 + $0x10] sm:$0xf] %vm1079_vm4, %v940_v10  ;;  %v936_v9 = vpop.permute.xlu0 %935  ;;  %v1238_v10 = vsel %vm6441_vm7, %v1236_v61, %v1237_v47  ;;  %v1144_v47 = vld [vmem:[%s6129_s11 + $0x40] sm:$0xf]  ;;  %v333_v61 = vld [vmem:[%s6129_s11 + $0x7c] sm:$0xf] }
  0x9b   : > { %1080 = vst.msk [vmem:[#allocation2] sm:$0xf] %vm1079_vm4, %v936_v9  ;;  %v952_v26 = vpop.permute.xlu2 %951  ;;  %v1253_v9 = vsel %vm6441_vm7, %v1251_v5, %v1252_v6  ;;  %v1276_v54 = vrot.slane %v1144_v47, 5  ;;  %v1146_v5 = vld [vmem:[%s6129_s11 + $0x48] sm:$0xf] }
  0x9c   : > { %1088 = vst.msk [vmem:[#allocation2 + $0x40] sm:$0xf] %vm1079_vm4, %v952_v26  ;;  %v332_v6 = vld [vmem:[%s6129_s11 + $0x78] sm:$0xf]  ;;  %v1151_v29 = vld [vmem:[%s6129_s11 + $0x5c] sm:$0xf] }
  0x9d   : > { %v1278_v60 = vrot.slane %v1276_v54, 4  ;;  %382 = vst.msk [vmem:[#allocation2 + $0xf8] sm:$0xf] %vm350_vm3, %v333_v61  ;;  %v1157_v61 = vld [vmem:[%s6129_s11 + $0x74] sm:$0xf] }
  0x9e   : > { %381 = vst.msk [vmem:[#allocation2 + $0xf0] sm:$0xf] %vm350_vm3, %v332_v6 }
  0x9f   : > { %1027 = vrot.lane.b32.xlu1 %v924_v18, %s6029_s12  ;;  %v1139_v18 = vld [vmem:[%s6129_s11 + $0x2c] sm:$0xf] }
  0xa0   : > { %1025 = vrot.lane.b32.xlu0 %v914_v19, %s6029_s12  ;;  %v1255_v19 = vrot.slane %v1137_v13, 5  ;;  %v1261_v23 = vrot.slane %v1139_v18, 5  ;;  %v1150_v18 = vld [vmem:[%s6129_s11 + $0x58] sm:$0xf] }
  0xa1   : > { %v942_v30 = vpop.permute.xlu1 %941  ;;  %1023 = vrot.lane.b32.xlu2 %v904_v34, %s6029_s12  ;;  %v328_v34 = vld [vmem:[%s6129_s11 + $0x68] sm:$0xf]  ;;  %v1294_v27 = vrot.slane %v1150_v18, 5 }
  0xa2   : > { %1083 = vst.msk [vmem:[#allocation2 + $0x18] sm:$0xf] %vm1079_vm4, %v942_v30  ;;  %v938_v39 = vpop.permute.xlu0 %937  ;;  %v1257_v26 = vrot.slane %v1255_v19, 4  ;;  %v1262_v35 = vsel %vm6441_vm7, %v1260_v22, %v1261_v23  ;;  %v1256_v45 = vsel %vm6441_vm7, %v1254_v41, %v1255_v19  ;;  %v1263_v58 = vrot.slane %v1261_v23, 4  ;;  %v1149_v22 = vld [vmem:[%s6129_s11 + $0x54] sm:$0xf] }
  0xa3   : > { %1081 = vst.msk [vmem:[#allocation2 + $0x8] sm:$0xf] %vm1079_vm4, %v938_v39  ;;  %v958_v49 = vpop.permute.xlu2 %957  ;;  %v1142_v39 = vld [vmem:[%s6129_s11 + $0x38] sm:$0xf]  ;;  %v335_v23 = vld [vmem:[%s6129_s11 + $0x84] sm:$0xf] }
  0xa4   : > { %1091 = vst.msk [vmem:[#allocation2 + $0x58] sm:$0xf] %vm1079_vm4, %v958_v49  ;;  %v1259_v38 = vsel %vm6441_vm7, %v1257_v26, %v1258_v16  ;;  %v1270_v43 = vrot.slane %v1142_v39, 5  ;;  %v1265_v2 = vsel %vm6441_vm7, %v1263_v58, %v1264_v40  ;;  %v1153_v39 = vld [vmem:[%s6129_s11 + $0x64] sm:$0xf] }
  0xa5   : > { %377 = vst.msk [vmem:[#allocation2 + $0xd0] sm:$0xf] %vm350_vm3, %v328_v34  ;;  %v1296_v34 = vrot.slane %v1294_v27, 4  ;;  %v339_v41 = vld [vmem:[%s6129_s11 + $0x94] sm:$0xf]  ;;  %v1303_v47 = vrot.slane %v1153_v39, 5 }
  0xa6   : > { %v1272_v13 = vrot.slane %v1270_v43, 4  ;;  %384 = vst.msk [vmem:[#allocation2 + $0x108] sm:$0xf] %vm350_vm3, %v335_v23  ;;  %v342_v58 = vld [vmem:[%s6129_s11 + $0xa0] sm:$0xf] }
  0xa7   : > { %1376 = vrot.lane.b32.xlu1 %v1235_v42, %s6030_s13  ;;  %v1269_v42 = vrot.slane %v1267_v36, 4  ;;  %388 = vst.msk [vmem:[#allocation2 + $0x128] sm:$0xf] %vm350_vm3, %v339_v41  ;;  %v1163_v41 = vld [vmem:[%s6129_s11 + $0x8c] sm:$0xf] }
  0xa8   : > { %1374 = vrot.lane.b32.xlu0 %v1232_v46, %s6030_s13  ;;  %v1266_v46 = vrot.slane %v1264_v40, 4  ;;  %391 = vst.msk [vmem:[#allocation2 + $0x140] sm:$0xf] %vm350_vm3, %v342_v58 }
  0xa9   : > { %v950_v52 = vpop.permute.xlu1 %949  ;;  %1029 = vrot.lane.b32.xlu2 %v934_v56, %s6029_s12  ;;  %v1271_v53 = vsel %vm6441_vm7, %v1269_v42, %v1270_v43  ;;  %v1152_v42 = vld [vmem:[%s6129_s11 + $0x60] sm:$0xf]  ;;  %v338_v43 = vld [vmem:[%s6129_s11 + $0x90] sm:$0xf] }
  0xaa   : > { %1087 = vst.msk [vmem:[#allocation2 + $0x38] sm:$0xf] %vm1079_vm4, %v950_v52  ;;  %v948_v57 = vpop.permute.xlu0 %947  ;;  %v331_v52 = vld [vmem:[%s6129_s11 + $0x74] sm:$0xf]  ;;  %v1268_v56 = vsel %vm6441_vm7, %v1266_v46, %v1267_v36 }
  0xab   : > { %1086 = vst.msk [vmem:[#allocation2 + $0x30] sm:$0xf] %vm1079_vm4, %v948_v57  ;;  %v964_v3 = vpop.permute.xlu2 %963  ;;  %v1273_v57 = vrot.slane %v1143_v50, 5 }
  0xac   : > { %1094 = vst.msk [vmem:[#allocation2 + $0x70] sm:$0xf] %vm1079_vm4, %v964_v3 }
  0xad   : > { %380 = vst.msk [vmem:[#allocation2 + $0xe8] sm:$0xf] %vm350_vm3, %v331_v52  ;;  %v1274_v19 = vsel %vm6441_vm7, %v1272_v13, %v1273_v57  ;;  %v1305_v52 = vrot.slane %v1303_v47, 4  ;;  %v345_v13 = vld [vmem:[%s6129_s11 + $0xac] sm:$0xf] }
  0xae   : > { %387 = vst.msk [vmem:[#allocation2 + $0x120] sm:$0xf] %vm350_vm3, %v338_v43 }
  0xaf   : > { %1382 = vrot.lane.b32.xlu1 %v1244_v62, %s6030_s13  ;;  %v1279_v62 = vrot.slane %v1145_v55, 5  ;;  %v1156_v55 = vld [vmem:[%s6129_s11 + $0x70] sm:$0xf]  ;;  %394 = vst.msk [vmem:[#allocation2 + $0x158] sm:$0xf] %vm350_vm3, %v345_v13 }
  0xb0   : > { %1380 = vrot.lane.b32.xlu0 %v1241_v1, %s6030_s13  ;;  %v1275_v1 = vrot.slane %v1273_v57, 4  ;;  %v1312_v0 = vrot.slane %v1156_v55, 5 }
  0xb1   : > { %v956_v7 = vpop.permute.xlu1 %955  ;;  %1378 = vrot.lane.b32.xlu2 %v1238_v10, %s6030_s13  ;;  %v1280_v4 = vsel %vm6441_vm7, %v1278_v60, %v1279_v62  ;;  %v1281_v32 = vrot.slane %v1279_v62, 4  ;;  %v1155_v60 = vld [vmem:[%s6129_s11 + $0x6c] sm:$0xf]  ;;  %v341_v62 = vld [vmem:[%s6129_s11 + $0x9c] sm:$0xf] }
  0xb2   : > { %1090 = vst.msk [vmem:[#allocation2 + $0x50] sm:$0xf] %vm1079_vm4, %v956_v7  ;;  %v954_v12 = vpop.permute.xlu0 %953  ;;  %v334_v7 = vld [vmem:[%s6129_s11 + $0x80] sm:$0xf]  ;;  %v1277_v10 = vsel %vm6441_vm7, %v1275_v1, %v1276_v54 }
  0xb3   : > { %1089 = vst.msk [vmem:[#allocation2 + $0x48] sm:$0xf] %vm1079_vm4, %v954_v12  ;;  %v970_v21 = vpop.permute.xlu2 %969  ;;  %v1282_v12 = vrot.slane %v1146_v5, 5 }
  0xb4   : > { %1097 = vst.msk [vmem:[#allocation2 + $0x88] sm:$0xf] %vm1079_vm4, %v970_v21 }
  0xb5   : > { %383 = vst.msk [vmem:[#allocation2 + $0x100] sm:$0xf] %vm350_vm3, %v334_v7  ;;  %v1283_v40 = vsel %vm6441_vm7, %v1281_v32, %v1282_v12  ;;  %v1314_v7 = vrot.slane %v1312_v0, 4  ;;  %v348_v32 = vld [vmem:[%s6129_s11 + $0xb8] sm:$0xf] }
  0xb6   : > { %390 = vst.msk [vmem:[#allocation2 + $0x138] sm:$0xf] %vm350_vm3, %v341_v62 }
  0xb7   : > { %1388 = vrot.lane.b32.xlu1 %v1253_v9, %s6030_s13  ;;  %v1288_v9 = vrot.slane %v1148_v11, 5  ;;  %v1159_v11 = vld [vmem:[%s6129_s11 + $0x7c] sm:$0xf]  ;;  %397 = vst.msk [vmem:[#allocation2 + $0x170] sm:$0xf] %vm350_vm3, %v348_v32 }
  0xb8   : > { %1386 = vrot.lane.b32.xlu0 %v1250_v17, %s6030_s13  ;;  %v1284_v17 = vrot.slane %v1282_v12, 4  ;;  %v1321_v18 = vrot.slane %v1159_v11, 5 }
  0xb9   : > { %v962_v25 = vpop.permute.xlu1 %961  ;;  %1384 = vrot.lane.b32.xlu2 %v1247_v28, %s6030_s13  ;;  %v1289_v26 = vsel %vm6441_vm7, %v1287_v15, %v1288_v9  ;;  %v1290_v50 = vrot.slane %v1288_v9, 4  ;;  %v1158_v15 = vld [vmem:[%s6129_s11 + $0x78] sm:$0xf]  ;;  %v344_v9 = vld [vmem:[%s6129_s11 + $0xa8] sm:$0xf] }
  0xba   : > { %1093 = vst.msk [vmem:[#allocation2 + $0x68] sm:$0xf] %vm1079_vm4, %v962_v25  ;;  %v960_v30 = vpop.permute.xlu0 %959  ;;  %v337_v25 = vld [vmem:[%s6129_s11 + $0x8c] sm:$0xf]  ;;  %v1286_v28 = vsel %vm6441_vm7, %v1284_v17, %v1285_v8 }
  0xbb   : > { %1092 = vst.msk [vmem:[#allocation2 + $0x60] sm:$0xf] %vm1079_vm4, %v960_v30  ;;  %v976_v37 = vpop.permute.xlu2 %975  ;;  %v1291_v30 = vrot.slane %v1149_v22, 5 }
  0xbc   : > { %1100 = vst.msk [vmem:[#allocation2 + $0xa0] sm:$0xf] %vm1079_vm4, %v976_v37 }
  0xbd   : > { %386 = vst.msk [vmem:[#allocation2 + $0x118] sm:$0xf] %vm350_vm3, %v337_v25  ;;  %v1292_v57 = vsel %vm6441_vm7, %v1290_v50, %v1291_v30  ;;  %v1323_v25 = vrot.slane %v1321_v18, 4 }
  0xbe   : > { %393 = vst.msk [vmem:[#allocation2 + $0x150] sm:$0xf] %vm350_vm3, %v344_v9 }
  0xbf   : > { %1394 = vrot.lane.b32.xlu1 %v1262_v35, %s6030_s13  ;;  %v1297_v35 = vrot.slane %v1151_v29, 5  ;;  %v1162_v29 = vld [vmem:[%s6129_s11 + $0x88] sm:$0xf] }
  0xc0   : > { %1392 = vrot.lane.b32.xlu0 %v1259_v38, %s6030_s13  ;;  %v1293_v38 = vrot.slane %v1291_v30, 4  ;;  %v1330_v39 = vrot.slane %v1162_v29, 5 }
  0xc1   : > { %v968_v44 = vpop.permute.xlu1 %967  ;;  %1390 = vrot.lane.b32.xlu2 %v1256_v45, %s6030_s13  ;;  %v1298_v46 = vsel %vm6441_vm7, %v1296_v34, %v1297_v35  ;;  %v1299_v5 = vrot.slane %v1297_v35, 4  ;;  %v1161_v34 = vld [vmem:[%s6129_s11 + $0x84] sm:$0xf]  ;;  %v347_v35 = vld [vmem:[%s6129_s11 + $0xb4] sm:$0xf] }
  0xc2   : > { %1096 = vst.msk [vmem:[#allocation2 + $0x80] sm:$0xf] %vm1079_vm4, %v968_v44  ;;  %v966_v49 = vpop.permute.xlu0 %965  ;;  %v340_v44 = vld [vmem:[%s6129_s11 + $0x98] sm:$0xf]  ;;  %v1295_v45 = vsel %vm6441_vm7, %v1293_v38, %v1294_v27 }
  0xc3   : > { %1095 = vst.msk [vmem:[#allocation2 + $0x78] sm:$0xf] %vm1079_vm4, %v966_v49  ;;  %v982_v59 = vpop.permute.xlu2 %981  ;;  %v1300_v49 = vrot.slane %v1152_v42, 5 }
  0xc4   : > { %1103 = vst.msk [vmem:[#allocation2 + $0xb8] sm:$0xf] %vm1079_vm4, %v982_v59 }
  0xc5   : > { %389 = vst.msk [vmem:[#allocation2 + $0x130] sm:$0xf] %vm350_vm3, %v340_v44  ;;  %v1301_v12 = vsel %vm6441_vm7, %v1299_v5, %v1300_v49  ;;  %v1332_v44 = vrot.slane %v1330_v39, 4 }
  0xc6   : > { %396 = vst.msk [vmem:[#allocation2 + $0x168] sm:$0xf] %vm350_vm3, %v347_v35 }
  0xc7   : > { %1400 = vrot.lane.b32.xlu1 %v1271_v53, %s6030_s13  ;;  %v1306_v53 = vrot.slane %v1154_v48, 5  ;;  %v1165_v48 = vld [vmem:[%s6129_s11 + $0x94] sm:$0xf] }
  0xc8   : > { %1398 = vrot.lane.b32.xlu0 %v1268_v56, %s6030_s13  ;;  %v1302_v56 = vrot.slane %v1300_v49, 4 }
  0xc9   : > { %v974_v63 = vpop.permute.xlu1 %973  ;;  %1396 = vrot.lane.b32.xlu2 %v1265_v2, %s6030_s13  ;;  %v1307_v1 = vsel %vm6441_vm7, %v1305_v52, %v1306_v53  ;;  %v1308_v22 = vrot.slane %v1306_v53, 4  ;;  %v1339_v53 = vrot.slane %v1165_v48, 5 }
  0xca   : > { %1099 = vst.msk [vmem:[#allocation2 + $0x98] sm:$0xf] %vm1079_vm4, %v974_v63  ;;  %v972_v3 = vpop.permute.xlu0 %971  ;;  %v343_v63 = vld [vmem:[%s6129_s11 + $0xa4] sm:$0xf]  ;;  %v1304_v2 = vsel %vm6441_vm7, %v1302_v56, %v1303_v47  ;;  %v1166_v56 = vld [vmem:[%s6129_s11 + $0x98] sm:$0xf] }
  0xcb   : > { %1098 = vst.msk [vmem:[#allocation2 + $0x90] sm:$0xf] %vm1079_vm4, %v972_v3  ;;  %v988_v14 = vpop.permute.xlu2 %987  ;;  %v1309_v3 = vrot.slane %v1155_v60, 5  ;;  %v1342_v60 = vrot.slane %v1166_v56, 5  ;;  %v1176_v56 = vld [vmem:[%s6129_s11 + $0xc0] sm:$0x1] }
  0xcc   : > { %1106 = vst.msk [vmem:[#allocation2 + $0xd0] sm:$0xf] %vm1079_vm4, %v988_v14 }
  0xcd   : > { %392 = vst.msk [vmem:[#allocation2 + $0x148] sm:$0xf] %vm350_vm3, %v343_v63  ;;  %v1310_v30 = vsel %vm6441_vm7, %v1308_v22, %v1309_v3 }
  0xcf   : > { %1406 = vrot.lane.b32.xlu1 %v1280_v4, %s6030_s13  ;;  %v1315_v4 = vrot.slane %v1157_v61, 5  ;;  %v1167_v61 = vld [vmem:[%s6129_s11 + $0x9c] sm:$0xf] }
  0xd0   : > { %1404 = vrot.lane.b32.xlu0 %v1277_v10, %s6030_s13  ;;  %v1311_v10 = vrot.slane %v1309_v3, 4 }
  0xd1   : > { %v980_v16 = vpop.permute.xlu1 %979  ;;  %1402 = vrot.lane.b32.xlu2 %v1274_v19, %s6030_s13  ;;  %v1316_v17 = vsel %vm6441_vm7, %v1314_v7, %v1315_v4  ;;  %v1317_v42 = vrot.slane %v1315_v4, 4  ;;  %v1169_v7 = vld [vmem:[%s6129_s11 + $0xa4] sm:$0xf]  ;;  %v1345_v4 = vrot.slane %v1167_v61, 5 }
  0xd2   : > { %1102 = vst.msk [vmem:[#allocation2 + $0xb0] sm:$0xf] %vm1079_vm4, %v980_v16  ;;  %v978_v21 = vpop.permute.xlu0 %977  ;;  %v346_v16 = vld [vmem:[%s6129_s11 + $0xb0] sm:$0xf]  ;;  %v1313_v19 = vsel %vm6441_vm7, %v1311_v10, %v1312_v0 }
  0xd3   : > { %1101 = vst.msk [vmem:[#allocation2 + $0xa8] sm:$0xf] %vm1079_vm4, %v978_v21  ;;  %v994_v33 = vpop.permute.xlu2 %993  ;;  %v1318_v21 = vrot.slane %v1158_v15, 5  ;;  %v1171_v15 = vld [vmem:[%s6129_s11 + $0xac] sm:$0xf] }
  0xd4   : > { %1109 = vst.msk [vmem:[#allocation2 + $0xe8] sm:$0xf] %vm1079_vm4, %v994_v33 }
  0xd5   : > { %395 = vst.msk [vmem:[#allocation2 + $0x160] sm:$0xf] %vm350_vm3, %v346_v16  ;;  %v1319_v49 = vsel %vm6441_vm7, %v1317_v42, %v1318_v21 }
  0xd7   : > { %1412 = vrot.lane.b32.xlu1 %v1289_v26, %s6030_s13  ;;  %v1324_v26 = vrot.slane %v1160_v20, 5 }
  0xd8   : > { %1410 = vrot.lane.b32.xlu0 %v1286_v28, %s6030_s13  ;;  %v1320_v28 = vrot.slane %v1318_v21, 4  ;;  %v1172_v21 = vld [vmem:[%s6129_s11 + $0xb0] sm:$0xf] }
  0xd9   : > { %v986_v36 = vpop.permute.xlu1 %985  ;;  %1408 = vrot.lane.b32.xlu2 %v1283_v40, %s6030_s13  ;;  %v1325_v38 = vsel %vm6441_vm7, %v1323_v25, %v1324_v26 }
  0xda   : > { %1105 = vst.msk [vmem:[#allocation2 + $0xc8] sm:$0xf] %vm1079_vm4, %v986_v36  ;;  %v984_v37 = vpop.permute.xlu0 %983  ;;  %v349_v36 = vld [vmem:[%s6129_s11 + $0xbc] sm:$0xf]  ;;  %v1322_v40 = vsel %vm6441_vm7, %v1320_v28, %v1321_v18 }
  0xdb   : > { %1104 = vst.msk [vmem:[#allocation2 + $0xc0] sm:$0xf] %vm1079_vm4, %v984_v37  ;;  %v1000_v51 = vpop.permute.xlu2 %999  ;;  %v1327_v37 = vrot.slane %v1161_v34, 5  ;;  %v1173_v34 = vld [vmem:[%s6129_s11 + $0xb4] sm:$0xf] }
  0xdc   : > { %1112 = vst.msk [vmem:[#allocation2 + $0x100] sm:$0xf] %vm1079_vm4, %v1000_v51  ;;  %v1164_v51 = vld [vmem:[%s6129_s11 + $0x90] sm:$0xf] }
  0xdd   : > { %398 = vst.msk [vmem:[#allocation2 + $0x178] sm:$0xf] %vm350_vm3, %v349_v36  ;;  %v1336_v55 = vrot.slane %v1164_v51, 5 }
  0xdf   : > { %1418 = vrot.lane.b32.xlu1 %v1298_v46, %s6030_s13  ;;  %v1333_v46 = vrot.slane %v1163_v41, 5  ;;  %v1338_v63 = vrot.slane %v1336_v55, 4 }
  0xe0   : > { %1416 = vrot.lane.b32.xlu0 %v1295_v45, %s6030_s13  ;;  %v1329_v45 = vrot.slane %v1327_v37, 4 }
  0xe1   : > { %v992_v54 = vpop.permute.xlu1 %991  ;;  %1414 = vrot.lane.b32.xlu2 %v1292_v57, %s6030_s13  ;;  %v1334_v52 = vsel %vm6441_vm7, %v1332_v44, %v1333_v46  ;;  %v1326_v57 = vrot.slane %v1324_v26, 4 }
  0xe2   : > { %1108 = vst.msk [vmem:[#allocation2 + $0xe0] sm:$0xf] %vm1079_vm4, %v992_v54  ;;  %v990_v59 = vpop.permute.xlu0 %989  ;;  %v1331_v54 = vsel %vm6441_vm7, %v1329_v45, %v1330_v39  ;;  %v1175_v39 = vld [vmem:[%s6129_s11 + $0xbc] sm:$0xf] }
  0xe3   : > { %1107 = vst.msk [vmem:[#allocation2 + $0xd8] sm:$0xf] %vm1079_vm4, %v990_v59  ;;  %v1006_v6 = vpop.permute.xlu2 %1005  ;;  %v1341_v59 = vrot.slane %v1339_v53, 4  ;;  %v1328_v0 = vsel %vm6441_vm7, %v1326_v57, %v1327_v37  ;;  %v1567_v57 = vld [vmem:[%s6129_s11 + $0xc] sm:$0xf] }
  0xe4   : > { %1115 = vst.msk [vmem:[#allocation2 + $0x118] sm:$0xf] %vm1079_vm4, %v1006_v6  ;;  %v1340_v6 = vsel %vm6441_vm7, %v1338_v63, %v1339_v53 }
  0xe5   : > { %v1343_v3 = vsel %vm6441_vm7, %v1341_v59, %v1342_v60  ;;  %v1372_v59 = vrot.slane %v1176_v56, 5 }
  0xe7   : > { %1424 = vrot.lane.b32.xlu1 %v1307_v1, %s6030_s13  ;;  %v1168_v1 = vld [vmem:[%s6129_s11 + $0xa0] sm:$0xf] }
  0xe8   : > { %1422 = vrot.lane.b32.xlu0 %v1304_v2, %s6030_s13  ;;  %v1348_v5 = vrot.slane %v1168_v1, 5 }
  0xe9   : > { %v998_v8 = vpop.permute.xlu1 %997  ;;  %1420 = vrot.lane.b32.xlu2 %v1301_v12, %s6030_s13  ;;  %v1351_v12 = vrot.slane %v1169_v7, 5  ;;  %v1574_v7 = vld [vmem:[%s6129_s11 + $0x28] sm:$0xf] }
  0xea   : > { %1111 = vst.msk [vmem:[#allocation2 + $0xf8] sm:$0xf] %vm1079_vm4, %v998_v8  ;;  %v996_v14 = vpop.permute.xlu0 %995  ;;  %v1335_v8 = vrot.slane %v1333_v46, 4  ;;  %v1350_v11 = vrot.slane %v1348_v5, 4 }
  0xeb   : > { %1110 = vst.msk [vmem:[#allocation2 + $0xf0] sm:$0xf] %vm1079_vm4, %v996_v14  ;;  %v1012_v23 = vpop.permute.xlu2 %1011  ;;  %v1347_v14 = vrot.slane %v1345_v4, 4  ;;  %v1353_v41 = vrot.slane %v1351_v12, 4 }
  0xec   : > { %1118 = vst.msk [vmem:[#allocation2 + $0x130] sm:$0xf] %vm1079_vm4, %v1012_v23  ;;  %v1337_v9 = vsel %vm6441_vm7, %v1335_v8, %v1336_v55  ;;  %v1352_v18 = vsel %vm6441_vm7, %v1350_v11, %v1351_v12  ;;  %v1344_v23 = vrot.slane %v1342_v60, 4  ;;  %v1568_v55 = vld [vmem:[%s6129_s11 + $0x10] sm:$0xf] }
  0xed   : > { %v1349_v20 = vsel %vm6441_vm7, %v1347_v14, %v1348_v5  ;;  %v1569_v5 = vld [vmem:[%s6129_s11 + $0x14] sm:$0xf]  ;;  %v1572_v11 = vld [vmem:[%s6129_s11 + $0x20] sm:$0xf]  ;;  %v1576_v14 = vld [vmem:[%s6129_s11 + $0x30] sm:$0xf] }
  0xee   : > { %v1346_v32 = vsel %vm6441_vm7, %v1344_v23, %v1345_v4  ;;  %v1573_v4 = vld [vmem:[%s6129_s11 + $0x24] sm:$0xf] }
  0xef   : > { %1430 = vrot.lane.b32.xlu1 %v1316_v17, %s6030_s13  ;;  %v1170_v17 = vld [vmem:[%s6129_s11 + $0xa8] sm:$0xf] }
  0xf0   : > { %1428 = vrot.lane.b32.xlu0 %v1313_v19, %s6030_s13  ;;  %v1357_v19 = vrot.slane %v1171_v15, 5  ;;  %v1354_v22 = vrot.slane %v1170_v17, 5 }
  0xf1   : > { %v1004_v27 = vpop.permute.xlu1 %1003  ;;  %1426 = vrot.lane.b32.xlu2 %v1310_v30, %s6030_s13  ;;  %v1174_v30 = vld [vmem:[%s6129_s11 + $0xb8] sm:$0xf] }
  0xf2   : > { %1114 = vst.msk [vmem:[#allocation2 + $0x110] sm:$0xf] %vm1079_vm4, %v1004_v27  ;;  %v1002_v33 = vpop.permute.xlu0 %1001  ;;  %v1359_v26 = vrot.slane %v1357_v19, 4  ;;  %v1360_v27 = vrot.slane %v1172_v21, 5  ;;  %v1356_v29 = vrot.slane %v1354_v22, 4  ;;  %v1366_v36 = vrot.slane %v1174_v30, 5 }
  0xf3   : > { %1113 = vst.msk [vmem:[#allocation2 + $0x108] sm:$0xf] %vm1079_vm4, %v1002_v33  ;;  %v1018_v43 = vpop.permute.xlu2 %1017 }
  0xf4   : > { %1121 = vst.msk [vmem:[#allocation2 + $0x148] sm:$0xf] %vm1079_vm4, %v1018_v43  ;;  %v1361_v35 = vsel %vm6441_vm7, %v1359_v26, %v1360_v27  ;;  %v1368_v42 = vrot.slane %v1366_v36, 4  ;;  %v1369_v43 = vrot.slane %v1175_v39, 5  ;;  %v1582_v26 = vld [vmem:[%s6129_s11 + $0x48] sm:$0xf] }
  0xf5   : > { %v1589_v39 = vld [vmem:[%s6129_s11 + $0x64] sm:$0xf] }
  0xf6   : > { %v1370_v48 = vsel %vm6441_vm7, %v1368_v42, %v1369_v43  ;;  %v1587_v42 = vld [vmem:[%s6129_s11 + $0x5c] sm:$0xf] }
  0xf7   : > { %1436 = vrot.lane.b32.xlu1 %v1325_v38, %s6030_s13  ;;  %v1358_v38 = vsel %vm6441_vm7, %v1356_v29, %v1357_v19  ;;  %v1579_v19 = vld [vmem:[%s6129_s11 + $0x3c] sm:$0xf]  ;;  %v1581_v29 = vld [vmem:[%s6129_s11 + $0x44] sm:$0xf] }
  0xf8   : > { %1434 = vrot.lane.b32.xlu0 %v1322_v40, %s6030_s13  ;;  %v1363_v40 = vrot.slane %v1173_v34, 5 }
  0xf9   : > { %v1010_v47 = vpop.permute.xlu1 %1009  ;;  %1432 = vrot.lane.b32.xlu2 %v1319_v49, %s6030_s13 }
  0xfa   : > { %1117 = vst.msk [vmem:[#allocation2 + $0x128] sm:$0xf] %vm1079_vm4, %v1010_v47  ;;  %v1008_v50 = vpop.permute.xlu0 %1007  ;;  %v1365_v46 = vrot.slane %v1363_v40, 4  ;;  %v1355_v47 = vsel %vm6441_vm7, %v1353_v41, %v1354_v22  ;;  %v1578_v22 = vld [vmem:[%s6129_s11 + $0x38] sm:$0xf] }
  0xfb   : > { %1116 = vst.msk [vmem:[#allocation2 + $0x120] sm:$0xf] %vm1079_vm4, %v1008_v50  ;;  %v1024_v58 = vpop.permute.xlu2 %1023  ;;  %v1362_v50 = vrot.slane %v1360_v27, 4 }
  0xfc   : > { %1124 = vst.msk [vmem:[#allocation2 + $0x160] sm:$0xf] %vm1079_vm4, %v1024_v58  ;;  %v1367_v49 = vsel %vm6441_vm7, %v1365_v46, %v1366_v36  ;;  %v1371_v58 = vrot.slane %v1369_v43, 4  ;;  %v1584_v36 = vld [vmem:[%s6129_s11 + $0x50] sm:$0xf] }
  0xfd   : > { %v1364_v53 = vsel %vm6441_vm7, %v1362_v50, %v1363_v40  ;;  %v1588_v40 = vld [vmem:[%s6129_s11 + $0x60] sm:$0xf]  ;;  %v1591_v46 = vld [vmem:[%s6129_s11 + $0x6c] sm:$0xf]  ;;  %v1595_v50 = vld [vmem:[%s6129_s11 + $0x7c] sm:$0xf] }
  0xfe   : > { %v1373_v63 = vsel %vm6441_vm7, %v1371_v58, %v1372_v59 }
  0xff   : > { %1442 = vrot.lane.b32.xlu1 %v1334_v52, %s6030_s13 }
 0x100   : > { %1440 = vrot.lane.b32.xlu0 %v1331_v54, %s6030_s13 }
 0x101   : > { %v1016_v62 = vpop.permute.xlu1 %1015  ;;  %1438 = vrot.lane.b32.xlu2 %v1328_v0, %s6030_s13  ;;  %v1571_v0 = vld [vmem:[%s6129_s11 + $0x1c] sm:$0xf] }
 0x102   : > { %1120 = vst.msk [vmem:[#allocation2 + $0x140] sm:$0xf] %vm1079_vm4, %v1016_v62  ;;  %v1014_v2 = vpop.permute.xlu0 %1013 }
 0x103   : > { %1119 = vst.msk [vmem:[#allocation2 + $0x138] sm:$0xf] %vm1079_vm4, %v1014_v2  ;;  %v1030_v10 = vpop.permute.xlu2 %1029  ;;  %v1570_v2 = vld [vmem:[%s6129_s11 + $0x18] sm:$0xf] }
 0x104   : > { %1127 = vst.msk [vmem:[#allocation2 + $0x178] sm:$0xf] %vm1079_vm4, %v1030_v10 }
 0x107   : > { %1448 = vrot.lane.b32.xlu1 %v1343_v3, %s6030_s13 }
 0x108   : > { %1446 = vrot.lane.b32.xlu0 %v1340_v6, %s6030_s13 }
 0x109   : > { %v1022_v13 = vpop.permute.xlu1 %1021  ;;  %1444 = vrot.lane.b32.xlu2 %v1337_v9, %s6030_s13 }
 0x10a   : > { %1123 = vst.msk [vmem:[#allocation2 + $0x158] sm:$0xf] %vm1079_vm4, %v1022_v13  ;;  %v1020_v16 = vpop.permute.xlu0 %1019  ;;  %v1577_v13 = vld [vmem:[%s6129_s11 + $0x34] sm:$0xf] }
 0x10b   : > { %1122 = vst.msk [vmem:[#allocation2 + $0x150] sm:$0xf] %vm1079_vm4, %v1020_v16  ;;  %v1379_v25 = vpop.permute.xlu2 %1378  ;;  %v1575_v16 = vld [vmem:[%s6129_s11 + $0x2c] sm:$0xf] }
 0x10c   : > { %1521 = vst.msk [vmem:[#allocation2 + $0x10] sm:$0xf] %vm1518_vm8, %v1379_v25  ;;  %v1583_v25 = vld [vmem:[%s6129_s11 + $0x4c] sm:$0xf] }
 0x10f   : > { %1454 = vrot.lane.b32.xlu1 %v1352_v18, %s6030_s13  ;;  %v1580_v18 = vld [vmem:[%s6129_s11 + $0x40] sm:$0xf] }
 0x110   : > { %1452 = vrot.lane.b32.xlu0 %v1349_v20, %s6030_s13 }
 0x111   : > { %v1028_v28 = vpop.permute.xlu1 %1027  ;;  %1450 = vrot.lane.b32.xlu2 %v1346_v32, %s6030_s13  ;;  %v1586_v32 = vld [vmem:[%s6129_s11 + $0x58] sm:$0xf] }
 0x112   : > { %1126 = vst.msk [vmem:[#allocation2 + $0x170] sm:$0xf] %vm1079_vm4, %v1028_v28  ;;  %v1026_v33 = vpop.permute.xlu0 %1025 }
 0x113   : > { %1125 = vst.msk [vmem:[#allocation2 + $0x168] sm:$0xf] %vm1079_vm4, %v1026_v33  ;;  %v1385_v37 = vpop.permute.xlu2 %1384  ;;  %v1585_v33 = vld [vmem:[%s6129_s11 + $0x54] sm:$0xf] }
 0x114   : > { %1524 = vst.msk [vmem:[#allocation2 + $0x28] sm:$0xf] %vm1518_vm8, %v1385_v37 }
 0x117   : > { %1460 = vrot.lane.b32.xlu1 %v1361_v35, %s6030_s13 }
 0x118   : > { %1458 = vrot.lane.b32.xlu0 %v1358_v38, %s6030_s13 }
 0x119   : > { %v1377_v44 = vpop.permute.xlu1 %1376  ;;  %1456 = vrot.lane.b32.xlu2 %v1355_v47, %s6030_s13 }
 0x11a   : > { %1520 = vst.msk [vmem:[#allocation2 + $0x8] sm:$0xf] %vm1518_vm8, %v1377_v44  ;;  %v1375_v45 = vpop.permute.xlu0 %1374  ;;  %v1592_v44 = vld [vmem:[%s6129_s11 + $0x70] sm:$0xf] }
 0x11b   : > { %1519 = vst.msk [vmem:[#allocation2] sm:$0xf] %vm1518_vm8, %v1375_v45  ;;  %v1391_v51 = vpop.permute.xlu2 %1390 }
 0x11c   : > { %1527 = vst.msk [vmem:[#allocation2 + $0x40] sm:$0xf] %vm1518_vm8, %v1391_v51  ;;  %v1594_v51 = vld [vmem:[%s6129_s11 + $0x78] sm:$0xf] }
 0x11f   : > { %1466 = vrot.lane.b32.xlu1 %v1370_v48, %s6030_s13  ;;  %v1590_v48 = vld [vmem:[%s6129_s11 + $0x68] sm:$0xf] }
 0x120   : > { %1464 = vrot.lane.b32.xlu0 %v1367_v49, %s6030_s13 }
 0x121   : > { %v1383_v52 = vpop.permute.xlu1 %1382  ;;  %1462 = vrot.lane.b32.xlu2 %v1364_v53, %s6030_s13 }
 0x122   : > { %1523 = vst.msk [vmem:[#allocation2 + $0x20] sm:$0xf] %vm1518_vm8, %v1383_v52  ;;  %v1381_v54 = vpop.permute.xlu0 %1380 }
 0x123   : > { %1522 = vst.msk [vmem:[#allocation2 + $0x18] sm:$0xf] %vm1518_vm8, %v1381_v54  ;;  %v1397_v60 = vpop.permute.xlu2 %1396  ;;  %v1593_v54 = vld [vmem:[%s6129_s11 + $0x74] sm:$0xf] }
 0x124   : > { %1530 = vst.msk [vmem:[#allocation2 + $0x58] sm:$0xf] %vm1518_vm8, %v1397_v60  ;;  %v1596_v60 = vld [vmem:[%s6129_s11 + $0x80] sm:$0xf] }
 0x127   : > { %1665 = vrot.lane.b32.xlu1 %v1568_v55, %s6031_s14  ;;  %v1598_v55 = vld [vmem:[%s6129_s11 + $0x88] sm:$0xf] }
 0x128   : > { %1663 = vrot.lane.b32.xlu0 %v1567_v57, %s6031_s14  ;;  %v1597_v57 = vld [vmem:[%s6129_s11 + $0x84] sm:$0xf] }
 0x129   : > { %v1389_v62 = vpop.permute.xlu1 %1388  ;;  %1468 = vrot.lane.b32.xlu2 %v1373_v63, %s6030_s13  ;;  %v1601_v63 = vld [vmem:[%s6129_s11 + $0x94] sm:$0xf] }
 0x12a   : > { %1526 = vst.msk [vmem:[#allocation2 + $0x38] sm:$0xf] %vm1518_vm8, %v1389_v62  ;;  %v1387_v1 = vpop.permute.xlu0 %1386 }
 0x12b   : > { %1525 = vst.msk [vmem:[#allocation2 + $0x30] sm:$0xf] %vm1518_vm8, %v1387_v1  ;;  %v1403_v61 = vpop.permute.xlu2 %1402  ;;  %v1600_v1 = vld [vmem:[%s6129_s11 + $0x90] sm:$0xf] }
 0x12c   : > { %1533 = vst.msk [vmem:[#allocation2 + $0x70] sm:$0xf] %vm1518_vm8, %v1403_v61  ;;  %v1599_v61 = vld [vmem:[%s6129_s11 + $0x8c] sm:$0xf] }
 0x12f   : > { %1671 = vrot.lane.b32.xlu1 %v1571_v0, %s6031_s14 }
 0x130   : > { %1669 = vrot.lane.b32.xlu0 %v1570_v2, %s6031_s14 }
 0x131   : > { %v1395_v3 = vpop.permute.xlu1 %1394  ;;  %1667 = vrot.lane.b32.xlu2 %v1569_v5, %s6031_s14  ;;  %v1604_v5 = vld [vmem:[%s6129_s11 + $0xa0] sm:$0xf] }
 0x132   : > { %1529 = vst.msk [vmem:[#allocation2 + $0x50] sm:$0xf] %vm1518_vm8, %v1395_v3  ;;  %v1393_v6 = vpop.permute.xlu0 %1392 }
 0x133   : > { %1528 = vst.msk [vmem:[#allocation2 + $0x48] sm:$0xf] %vm1518_vm8, %v1393_v6  ;;  %v1409_v8 = vpop.permute.xlu2 %1408  ;;  %v1603_v6 = vld [vmem:[%s6129_s11 + $0x9c] sm:$0xf] }
 0x134   : > { %1536 = vst.msk [vmem:[#allocation2 + $0x88] sm:$0xf] %vm1518_vm8, %v1409_v8  ;;  %v1856_v8 = vld [vmem:[%s6129_s11 + $0xc] sm:$0xf] }
 0x137   : > { %1677 = vrot.lane.b32.xlu1 %v1574_v7, %s6031_s14 }
 0x138   : > { %1675 = vrot.lane.b32.xlu0 %v1573_v4, %s6031_s14  ;;  %v1857_v4 = vld [vmem:[%s6129_s11 + $0x10] sm:$0xf] }
 0x139   : > { %v1401_v10 = vpop.permute.xlu1 %1400  ;;  %1673 = vrot.lane.b32.xlu2 %v1572_v11, %s6031_s14  ;;  %v1602_v11 = vld [vmem:[%s6129_s11 + $0x98] sm:$0xf] }
 0x13a   : > { %1532 = vst.msk [vmem:[#allocation2 + $0x68] sm:$0xf] %vm1518_vm8, %v1401_v10  ;;  %v1399_v12 = vpop.permute.xlu0 %1398 }
 0x13b   : > { %1531 = vst.msk [vmem:[#allocation2 + $0x60] sm:$0xf] %vm1518_vm8, %v1399_v12  ;;  %v1415_v15 = vpop.permute.xlu2 %1414 }
 0x13c   : > { %1539 = vst.msk [vmem:[#allocation2 + $0xa0] sm:$0xf] %vm1518_vm8, %v1415_v15  ;;  %v1906_v15 = vshrl.u32 %v1856_v8, 16 }
 0x13f   : > { %1683 = vrot.lane.b32.xlu1 %v1577_v13, %s6031_s14  ;;  %v1915_v13 = vshll.u32 %v1857_v4, 16 }
 0x140   : > { %1681 = vrot.lane.b32.xlu0 %v1576_v14, %s6031_s14  ;;  %v1919_v14 = vshrl.u32 %v1857_v4, 16 }
 0x141   : > { %v1407_v9 = vpop.permute.xlu1 %1406  ;;  %1679 = vrot.lane.b32.xlu2 %v1575_v16, %s6031_s14  ;;  %v1909_v16 = vshll.u32 %v1856_v8, 16 }
 0x142   : > { %1535 = vst.msk [vmem:[#allocation2 + $0x80] sm:$0xf] %vm1518_vm8, %v1407_v9  ;;  %v1405_v17 = vpop.permute.xlu0 %1404  ;;  %v1607_v9 = vld [vmem:[%s6129_s11 + $0xac] sm:$0xf] }
 0x143   : > { %1534 = vst.msk [vmem:[#allocation2 + $0x78] sm:$0xf] %vm1518_vm8, %v1405_v17  ;;  %v1421_v20 = vpop.permute.xlu2 %1420  ;;  %v4034_v17 = vld [vmem:[%s6129_s11 + $0x1c] sm:$0xf] }
 0x144   : > { %1542 = vst.msk [vmem:[#allocation2 + $0xb8] sm:$0xf] %vm1518_vm8, %v1421_v20 }
 0x147   : > { %1689 = vrot.lane.b32.xlu1 %v1580_v18, %s6031_s14  ;;  %v1606_v18 = vld [vmem:[%s6129_s11 + $0xa8] sm:$0xf] }
 0x148   : > { %1687 = vrot.lane.b32.xlu0 %v1579_v19, %s6031_s14  ;;  %v4133_v19 = vrot.slane %v4034_v17, 5 }
 0x149   : > { %v1413_v21 = vpop.permute.xlu1 %1412  ;;  %1685 = vrot.lane.b32.xlu2 %v1578_v22, %s6031_s14  ;;  %v4033_v22 = vld [vmem:[%s6129_s11 + $0x18] sm:$0xe] }
 0x14a   : > { %1538 = vst.msk [vmem:[#allocation2 + $0x98] sm:$0xf] %vm1518_vm8, %v1413_v21  ;;  %v1411_v23 = vpop.permute.xlu0 %1410  ;;  %v6878_v21 = vrot.slane %v1915_v13, 5 }
 0x14b   : > { %1537 = vst.msk [vmem:[#allocation2 + $0x90] sm:$0xf] %vm1518_vm8, %v1411_v23  ;;  %v1427_v27 = vpop.permute.xlu2 %1426  ;;  %v1921_v23 = vrot.slane %v1919_v14, 4  ;;  %v6947_v14 = vld [vmem:[%s6129_s11 + $0x20] sm:$0xf] }
 0x14c   : > { %1545 = vst.msk [vmem:[#allocation2 + $0xd0] sm:$0xf] %vm1518_vm8, %v1427_v27  ;;  %v1911_v27 = vrot.slane %v1909_v16, 5  ;;  %v1611_v16 = vld [vmem:[%s6129_s11 + $0xbc] sm:$0xf] }
 0x14f   : > { %1695 = vrot.lane.b32.xlu1 %v1583_v25, %s6031_s14  ;;  %v1908_v25 = vrot.slane %v1906_v15, 4 }
 0x150   : > { %1693 = vrot.lane.b32.xlu0 %v1582_v26, %s6031_s14  ;;  %v6884_v26 = vld [vmem:[%s6129_s11 + $0x20] sm:$0xf] }
 0x151   : > { %v1419_v28 = vpop.permute.xlu1 %1418  ;;  %1691 = vrot.lane.b32.xlu2 %v1581_v29, %s6031_s14  ;;  %v4135_v29 = vrot.slane %v4133_v19, 4 }
 0x152   : > { %1541 = vst.msk [vmem:[#allocation2 + $0xb0] sm:$0xf] %vm1518_vm8, %v1419_v28  ;;  %v1417_v30 = vpop.permute.xlu0 %1416  ;;  %v5527_v28 = vrot.slane %v4033_v22, 9  ;;  %v3018_v22 = vld [vmem:[%s6129_s11 + $0x18] sm:$0xf] }
 0x153   : > { %1540 = vst.msk [vmem:[#allocation2 + $0xa8] sm:$0xf] %vm1518_vm8, %v1417_v30  ;;  %v1433_v34 = vpop.permute.xlu2 %1432  ;;  %v4136_v30 = vrot.slane %v6884_v26, 5  ;;  %v3376_v26 = vshll.u32 %v6947_v14, 16 }
 0x154   : > { %1548 = vst.msk [vmem:[#allocation2 + $0xe8] sm:$0xf] %vm1518_vm8, %v1433_v34  ;;  %v1605_v34 = vld [vmem:[%s6129_s11 + $0xa4] sm:$0xf] }
 0x157   : > { %1701 = vrot.lane.b32.xlu1 %v1586_v32, %s6031_s14 }
 0x158   : > { %1699 = vrot.lane.b32.xlu0 %v1585_v33, %s6031_s14  ;;  %v6889_v33 = vld [vmem:[%s6129_s11 + $0x14] sm:$0xf] }
 0x159   : > { %v1425_v35 = vpop.permute.xlu1 %1424  ;;  %1697 = vrot.lane.b32.xlu2 %v1584_v36, %s6031_s14  ;;  %v4134_v36 = vsel %vm6441_vm7, %v5527_v28, %v4133_v19  ;;  %v2582_v19 = vld [vmem:[%s6129_s11 + $0xc] sm:$0xe] }
 0x15a   : > { %1544 = vst.msk [vmem:[#allocation2 + $0xc8] sm:$0xf] %vm1518_vm8, %v1425_v35  ;;  %v1423_v38 = vpop.permute.xlu0 %1422 }
 0x15b   : > { %1543 = vst.msk [vmem:[#allocation2 + $0xc0] sm:$0xf] %vm1518_vm8, %v1423_v38  ;;  %v1439_v41 = vpop.permute.xlu2 %1438  ;;  %v4137_v38 = vsel %vm6441_vm7, %v4135_v29, %v4136_v30 }
 0x15c   : > { %1551 = vst.msk [vmem:[#allocation2 + $0x100] sm:$0xf] %vm1518_vm8, %v1439_v41  ;;  %v1925_v41 = vshll.u32 %v6889_v33, 16 }
 0x15d   : > { %4324 = vst.msk [vmem:[#allocation2 + $0x4] sm:$0xf] %vm350_vm3, %v4134_v36  ;;  %v6972_v36 = vrot.slane %v3376_v26, 5 }
 0x15e   : > { %4325 = vst.msk [vmem:[#allocation2 + $0xc] sm:$0xf] %vm350_vm3, %v4137_v38 }
 0x15f   : > { %1707 = vrot.lane.b32.xlu1 %v1589_v39, %s6031_s14  ;;  %v1922_v39 = vor.u32 %v1921_v23, %v6878_v21 }
 0x160   : > { %1705 = vrot.lane.b32.xlu0 %v1588_v40, %s6031_s14  ;;  %v1610_v40 = vld [vmem:[%s6129_s11 + $0xb8] sm:$0xf] }
 0x161   : > { %v1431_v37 = vpop.permute.xlu1 %1430  ;;  %1703 = vrot.lane.b32.xlu2 %v1587_v42, %s6031_s14  ;;  %v1609_v42 = vld [vmem:[%s6129_s11 + $0xb4] sm:$0xf] }
 0x162   : > { %1547 = vst.msk [vmem:[#allocation2 + $0xe0] sm:$0xf] %vm1518_vm8, %v1431_v37  ;;  %v1429_v43 = vpop.permute.xlu0 %1428  ;;  %v1912_v37 = vor.u32 %v1911_v27, %v1908_v25 }
 0x163   : > { %1546 = vst.msk [vmem:[#allocation2 + $0xd8] sm:$0xf] %vm1518_vm8, %v1429_v43  ;;  %v1445_v47 = vpop.permute.xlu2 %1444 }
 0x164   : > { %1554 = vst.msk [vmem:[#allocation2 + $0x118] sm:$0xf] %vm1518_vm8, %v1445_v47  ;;  %v6911_v47 = vrot.slane %v1925_v41, 5 }
 0x167   : > { %1713 = vrot.lane.b32.xlu1 %v1592_v44, %s6031_s14  ;;  %v1923_v44 = vrot.slane %v1922_v39, 4 }
 0x168   : > { %1711 = vrot.lane.b32.xlu0 %v1591_v46, %s6031_s14  ;;  %v5838_v46 = vld [vmem:[%s9416_s1 + $0x40] sm:$0xff] }
 0x169   : > { %v1437_v45 = vpop.permute.xlu1 %1436  ;;  %1709 = vrot.lane.b32.xlu2 %v1590_v48, %s6031_s14  ;;  %v6914_v48 = vld [vmem:[%s6129_s11 + $0x10] sm:$0xf]  ;;  %4917 = vmatpush.bf16.msra.mxu1 %v5838_v46 }
 0x16a   : > { %1550 = vst.msk [vmem:[#allocation2 + $0xf8] sm:$0xf] %vm1518_vm8, %v1437_v45  ;;  %v1435_v49 = vpop.permute.xlu0 %1434  ;;  %v1913_v45 = vrot.slane %v1912_v37, 4  ;;  %5847 = vmatpush.bf16.msra.mxu3 %v5838_v46 }
 0x16b   : > { %1549 = vst.msk [vmem:[#allocation2 + $0xf0] sm:$0xf] %vm1518_vm8, %v1435_v49  ;;  %v1451_v52 = vpop.permute.xlu2 %1450  ;;  %v3308_v49 = vld [vmem:[%s6129_s11 + $0x1c] sm:$0xf] }
 0x16c   : > { %1557 = vst.msk [vmem:[#allocation2 + $0x130] sm:$0xf] %vm1518_vm8, %v1451_v52 }
 0x16f   : > { %1719 = vrot.lane.b32.xlu1 %v1595_v50, %s6031_s14 }
 0x170   : > { %1717 = vrot.lane.b32.xlu0 %v1594_v51, %s6031_s14  ;;  %v1608_v51 = vld [vmem:[%s6129_s11 + $0xb0] sm:$0xf] }
 0x171   : > { %v1443_v53 = vpop.permute.xlu1 %1442  ;;  %1715 = vrot.lane.b32.xlu2 %v1593_v54, %s6031_s14  ;;  %v3307_v54 = vld [vmem:[%s6129_s11 + $0x18] sm:$0xf] }
 0x172   : > { %1553 = vst.msk [vmem:[#allocation2 + $0x110] sm:$0xf] %vm1518_vm8, %v1443_v53  ;;  %v1441_v56 = vpop.permute.xlu0 %1440  ;;  %v6920_v53 = vld [vmem:[%s6129_s11 + $0x14] sm:$0xf] }
 0x173   : > { %1552 = vst.msk [vmem:[#allocation2 + $0x108] sm:$0xf] %vm1518_vm8, %v1441_v56  ;;  %v1457_v58 = vpop.permute.xlu2 %1456  ;;  %v2682_v56 = vrot.slane %v6914_v48, 5 }
 0x174   : > { %1560 = vst.msk [vmem:[#allocation2 + $0x148] sm:$0xf] %vm1518_vm8, %v1457_v58  ;;  %v1928_v58 = vsel %vm6139_vm2, %v1923_v44, %v6911_v47 }
 0x177   : > { %1725 = vrot.lane.b32.xlu1 %v1598_v55, %s6031_s14  ;;  %v3366_v55 = vshll.u32 %v3308_v49, 16 }
 0x178   : > { %1723 = vrot.lane.b32.xlu0 %v1597_v57, %s6031_s14  ;;  %v5782_v57 = vld [vmem:[#allocation2 + $0x4] sm:$0xf] }
 0x179   : > { %v1449_v59 = vpop.permute.xlu1 %1448  ;;  %1721 = vrot.lane.b32.xlu2 %v1596_v60, %s6031_s14  ;;  %v3370_v60 = vshrl.u32 %v3308_v49, 16  ;;  %v6941_v4 = vrot.slane %v3366_v55, 5  ;;  %v6991_v49 = vld [vmem:[%s6129_s11 + $0x18] sm:$0xf]  ;;  %v6996_v55 = vld [vmem:[%s6129_s11 + $0x30] sm:$0xf] }
 0x17a   : > { %1556 = vst.msk [vmem:[#allocation2 + $0x128] sm:$0xf] %vm1518_vm8, %v1449_v59  ;;  %v1447_v62 = vpop.permute.xlu0 %1446  ;;  %v1918_v59 = vsel %vm6139_vm2, %v1913_v45, %v6878_v21 }
 0x17b   : > { %1555 = vst.msk [vmem:[#allocation2 + $0x120] sm:$0xf] %vm1518_vm8, %v1447_v62  ;;  %v1463_v0 = vpop.permute.xlu2 %1462  ;;  %v5532_v62 = vld [vmem:[#allocation2 + $0x8] sm:$0xf0]  ;;  %v3372_v8 = vrot.slane %v3370_v60, 4 }
 0x17c   : > { %1563 = vst.msk [vmem:[#allocation2 + $0x160] sm:$0xf] %vm1518_vm8, %v1463_v0  ;;  %v3360_v0 = vshll.u32 %v3307_v54, 16 }
 0x17d   : > { %v3373_v25 = vor.u32 %v3372_v8, %v6941_v4 }
 0x17f   : > { %1731 = vrot.lane.b32.xlu1 %v1601_v63, %s6031_s14  ;;  %v4036_v63 = vld [vmem:[%s6129_s11 + $0x24] sm:$0xf] }
 0x180   : > { %1729 = vrot.lane.b32.xlu0 %v1600_v1, %s6031_s14  ;;  %v3357_v1 = vshrl.u32 %v3307_v54, 16  ;;  %v4038_v54 = vld [vmem:[%s6129_s11 + $0x2c] sm:$0xf] }
 0x181   : > { %v1455_v2 = vpop.permute.xlu1 %1454  ;;  %1727 = vrot.lane.b32.xlu2 %v1599_v61, %s6031_s14  ;;  %v4139_v61 = vrot.slane %v4036_v63, 5 }
 0x182   : > { %1559 = vst.msk [vmem:[#allocation2 + $0x140] sm:$0xf] %vm1518_vm8, %v1455_v2  ;;  %v1453_v3 = vpop.permute.xlu0 %1452  ;;  %v5535_v2 = vor.u32 %v5782_v57, %v5532_v62  ;;  %v3359_v15 = vrot.slane %v3357_v1, 4  ;;  %v4145_v57 = vrot.slane %v4038_v54, 5  ;;  %v2688_v62 = vrot.slane %v6991_v49, 5 }
 0x183   : > { %1558 = vst.msk [vmem:[#allocation2 + $0x138] sm:$0xf] %vm1518_vm8, %v1453_v3  ;;  %v1469_v7 = vpop.permute.xlu2 %1468 }
 0x184   : > { %1566 = vst.msk [vmem:[#allocation2 + $0x178] sm:$0xf] %vm1518_vm8, %v1469_v7  ;;  %v2685_v7 = vrot.slane %v6920_v53, 5  ;;  %5756 = vmatmul.msk.bf16.vlgmr.msra.gmra.mxu1 %vm4708_vm10, %v5535_v2  ;;  %v4147_v63 = vrot.slane %v4145_v57, 4 }
 0x186   : > { %v2687_v60 = vrot.slane %v2685_v7, 4 }
 0x187   : > { %1737 = vrot.lane.b32.xlu1 %v1604_v5, %s6031_s14  ;;  %v6934_v5 = vld [vmem:[%s6129_s11 + $0x28] sm:$0xf] }
 0x188   : > { %1735 = vrot.lane.b32.xlu0 %v1603_v6, %s6031_s14  ;;  %v2684_v6 = vrot.slane %v2682_v56, 4 }
 0x189   : > { %v1461_v10 = vpop.permute.xlu1 %1460  ;;  %1733 = vrot.lane.b32.xlu2 %v1602_v11, %s6031_s14  ;;  %v4141_v11 = vrot.slane %v4139_v61, 4 }
 0x18a   : > { %1562 = vst.msk [vmem:[#allocation2 + $0x158] sm:$0xf] %vm1518_vm8, %v1461_v10  ;;  %v1459_v12 = vpop.permute.xlu0 %1458  ;;  %v4138_v10 = vrot.slane %v4136_v30, 4  ;;  %v2686_v23 = vsel %vm6441_vm7, %v2684_v6, %v2685_v7  ;;  %v5526_v30 = vrot.slane %v2582_v19, 9  ;;  %v3380_v19 = vshrl.u32 %v6947_v14, 16 }
 0x18b   : > { %1561 = vst.msk [vmem:[#allocation2 + $0x150] sm:$0xf] %vm1518_vm8, %v1459_v12  ;;  %v1668_v20 = vpop.permute.xlu2 %1667  ;;  %v4142_v12 = vrot.slane %v6934_v5, 5  ;;  %v3310_v5 = vld [vmem:[%s6129_s11 + $0x24] sm:$0xf] }
 0x18c   : > { %1810 = vst.msk [vmem:[#allocation2 + $0x10] sm:$0xf] %vm1807_vm9, %v1668_v20  ;;  %v4140_v20 = vsel %vm6441_vm7, %v4138_v10, %v4139_v61  ;;  %v2683_v37 = vsel %vm6441_vm7, %v5526_v30, %v2682_v56  ;;  %v3386_v8 = vshll.u32 %v3310_v5, 16  ;;  %v3390_v10 = vshrl.u32 %v3310_v5, 16  ;;  %v2586_v14 = vld [vmem:[%s6129_s11 + $0x1c] sm:$0xf] }
 0x18d   : > { %v4143_v21 = vsel %vm6441_vm7, %v4141_v11, %v4142_v12  ;;  %4326 = vst.msk [vmem:[#allocation2 + $0x14] sm:$0xf] %vm350_vm3, %v4140_v20 }
 0x18e   : > { %4327 = vst.msk [vmem:[#allocation2 + $0x1c] sm:$0xf] %vm350_vm3, %v4143_v21 }
 0x18f   : > { %1743 = vrot.lane.b32.xlu1 %v1607_v9, %s6031_s14  ;;  %v3362_v9 = vrot.slane %v3360_v0, 5 }
 0x190   : > { %1741 = vrot.lane.b32.xlu0 %v1606_v18, %s6031_s14  ;;  %v1859_v18 = vld [vmem:[%s6129_s11 + $0x18] sm:$0xf] }
 0x191   : > { %v1467_v32 = vpop.permute.xlu1 %1466  ;;  %1739 = vrot.lane.b32.xlu2 %v1605_v34, %s6031_s14  ;;  %v3363_v27 = vor.u32 %v3362_v9, %v3359_v15  ;;  %v1935_v28 = vshll.u32 %v1859_v18, 16  ;;  %v1939_v29 = vshrl.u32 %v1859_v18, 16  ;;  %v1929_v34 = vshrl.u32 %v6889_v33, 16  ;;  %v1861_v9 = vld [vmem:[%s6129_s11 + $0x20] sm:$0xf] }
 0x192   : > { %1565 = vst.msk [vmem:[#allocation2 + $0x170] sm:$0xf] %vm1518_vm8, %v1467_v32  ;;  %v1465_v35 = vpop.permute.xlu0 %1464  ;;  %v3392_v18 = vrot.slane %v3390_v10, 4 }
 0x193   : > { %1564 = vst.msk [vmem:[#allocation2 + $0x168] sm:$0xf] %vm1518_vm8, %v1465_v35  ;;  %v1674_v43 = vpop.permute.xlu2 %1673  ;;  %v3374_v35 = vrot.slane %v3373_v25, 4  ;;  %v3364_v39 = vrot.slane %v3363_v27, 4  ;;  %v1941_v41 = vrot.slane %v1939_v29, 4  ;;  %v1931_v44 = vrot.slane %v1929_v34, 4 }
 0x194   : > { %1813 = vst.msk [vmem:[#allocation2 + $0x28] sm:$0xf] %vm1807_vm9, %v1674_v43  ;;  %v5784_v43 = vld [vmem:[#allocation2 + $0x14] sm:$0xf]  ;;  %v1955_v25 = vshll.u32 %v1861_v9, 16 }
 0x195   : > { %v3379_v46 = vsel %vm6139_vm2, %v3374_v35, %v6972_v36  ;;  %v5540_v45 = vld [vmem:[#allocation2 + $0x18] sm:$0xf0]  ;;  %v3369_v48 = vsel %vm6139_vm2, %v3364_v39, %v6941_v4  ;;  %v1932_v1 = vor.u32 %v1931_v44, %v6911_v47  ;;  %v2689_v47 = vsel %vm6441_vm7, %v2687_v60, %v2688_v62  ;;  %v3020_v34 = vld [vmem:[%s6129_s11 + $0x20] sm:$0xf] }
 0x196   : > { %v2690_v35 = vrot.slane %v2688_v62, 4 }
 0x197   : > { %1749 = vrot.lane.b32.xlu1 %v1610_v40, %s6031_s14  ;;  %v6974_v40 = vrot.slane %v1935_v28, 5 }
 0x198   : > { %1747 = vrot.lane.b32.xlu0 %v1609_v42, %s6031_s14  ;;  %v1860_v42 = vld [vmem:[%s6129_s11 + $0x1c] sm:$0xf] }
 0x199   : > { %v1666_v50 = vpop.permute.xlu1 %1665  ;;  %1745 = vrot.lane.b32.xlu2 %v1608_v51, %s6031_s14  ;;  %v1945_v51 = vshll.u32 %v1860_v42, 16  ;;  %v1949_v7 = vshrl.u32 %v1860_v42, 16 }
 0x19a   : > { %1809 = vst.msk [vmem:[#allocation2 + $0x8] sm:$0xf] %vm1807_vm9, %v1666_v50  ;;  %v1664_v52 = vpop.permute.xlu0 %1663  ;;  %v1942_v50 = vor.u32 %v1941_v41, %v6974_v40 }
 0x19b   : > { %1808 = vst.msk [vmem:[#allocation2] sm:$0xf] %vm1807_vm9, %v1664_v52  ;;  %v1680_v3 = vpop.permute.xlu2 %1679  ;;  %v5543_v52 = vor.u32 %v5784_v43, %v5540_v45  ;;  %v1947_v61 = vrot.slane %v1945_v51, 5  ;;  %v1951_v15 = vrot.slane %v1949_v7, 4  ;;  %v1957_v45 = vrot.slane %v1955_v25, 5 }
 0x19c   : > { %1816 = vst.msk [vmem:[#allocation2 + $0x40] sm:$0xf] %vm1807_vm9, %v1680_v3  ;;  %v1943_v2 = vrot.slane %v1942_v50, 4  ;;  %v3019_v3 = vld [vmem:[%s6129_s11 + $0x1c] sm:$0xf] }
 0x19d   : > { %5757 = vmatmul.msk.bf16.gmra.mxu1 %vm4708_vm10, %v5543_v52  ;;  %v1952_v28 = vor.u32 %v1951_v15, %v1947_v61  ;;  %v2587_v52 = vld [vmem:[%s6129_s11 + $0x20] sm:$0xf] }
 0x19e   : > { %v1948_v11 = vsel %vm6139_vm2, %v1943_v2, %v1947_v61  ;;  %v2694_v62 = vrot.slane %v2587_v52, 5 }
 0x19f   : > { %2391 = vrot.lane.b32.xlu1 %v1928_v58, %s6032_s17  ;;  %v4144_v58 = vrot.slane %v4142_v12, 4  ;;  %v1933_v12 = vrot.slane %v1932_v1, 4 }
 0x1a0   : > { %2389 = vrot.lane.b32.xlu0 %v1918_v59, %s6032_s17  ;;  %v4148_v59 = vrot.slane %v6996_v55, 5  ;;  %v2696_v5 = vrot.slane %v2694_v62, 4 }
 0x1a1   : > { %v1672_v13 = vpop.permute.xlu1 %1671  ;;  %1751 = vrot.lane.b32.xlu2 %v1611_v16, %s6031_s14  ;;  %v4146_v6 = vsel %vm6441_vm7, %v4144_v58, %v4145_v57  ;;  %v3311_v16 = vld [vmem:[%s6129_s11 + $0x28] sm:$0xf]  ;;  %v1938_v21 = vsel %vm6139_vm2, %v1933_v12, %v6974_v40 }
 0x1a2   : > { %1812 = vst.msk [vmem:[#allocation2 + $0x20] sm:$0xf] %vm1807_vm9, %v1672_v13  ;;  %v1670_v17 = vpop.permute.xlu0 %1669  ;;  %v4149_v53 = vsel %vm6441_vm7, %v4147_v63, %v4148_v59  ;;  %v3396_v26 = vshll.u32 %v3311_v16, 16  ;;  %v4150_v42 = vrot.slane %v4148_v59, 4  ;;  %v3400_v58 = vshrl.u32 %v3311_v16, 16 }
 0x1a3   : > { %1811 = vst.msk [vmem:[#allocation2 + $0x18] sm:$0xf] %vm1807_vm9, %v1670_v17  ;;  %v1686_v32 = vpop.permute.xlu2 %1685  ;;  %v7027_v17 = vrot.slane %v3386_v8, 5  ;;  %v7068_v63 = vld [vmem:[%s6129_s11 + $0x24] sm:$0xf] }
 0x1a4   : > { %1819 = vst.msk [vmem:[#allocation2 + $0x58] sm:$0xf] %vm1807_vm9, %v1686_v32  ;;  %v4040_v32 = vld [vmem:[%s6129_s11 + $0x34] sm:$0xf]  ;;  %v3398_v51 = vrot.slane %v3396_v26, 5  ;;  %v3402_v61 = vrot.slane %v3400_v58, 4 }
 0x1a5   : > { %4328 = vst.msk [vmem:[#allocation2 + $0x24] sm:$0xf] %vm350_vm3, %v4146_v6  ;;  %v3393_v29 = vor.u32 %v3392_v18, %v7027_v17  ;;  %v4151_v40 = vrot.slane %v4040_v32, 5  ;;  %v2697_v6 = vrot.slane %v7068_v63, 5 }
 0x1a6   : > { %4329 = vst.msk [vmem:[#allocation2 + $0x2c] sm:$0xf] %vm350_vm3, %v4149_v53  ;;  %v1862_v53 = vld [vmem:[%s6129_s11 + $0x24] sm:$0xf]  ;;  %v3403_v12 = vor.u32 %v3402_v61, %v3398_v51 }
 0x1a7   : > { %3114 = vrot.lane.b32.xlu1 %v3018_v22, %s6033_s24  ;;  %v4153_v43 = vrot.slane %v4151_v40, 4  ;;  %v3394_v49 = vrot.slane %v3393_v29, 4  ;;  %v4152_v55 = vsel %vm6441_vm7, %v4150_v42, %v4151_v40  ;;  %v2698_v18 = vsel %vm6441_vm7, %v2696_v5, %v2697_v6  ;;  %v7092_v29 = vld [vmem:[%s6129_s11 + $0x40] sm:$0xf]  ;;  %v7104_v42 = vld [vmem:[%s6129_s11 + $0x2c] sm:$0xf] }
 0x1a8   : > { %2827 = vrot.lane.b32.xlu0 %v2686_v23, %s6034_s25  ;;  %v3021_v23 = vld [vmem:[%s6129_s11 + $0x24] sm:$0xf]  ;;  %4330 = vst.msk [vmem:[#allocation2 + $0x34] sm:$0xf] %vm350_vm3, %v4152_v55  ;;  %v4160_v40 = vrot.slane %v7092_v29, 5 }
 0x1a9   : > { %v1678_v38 = vpop.permute.xlu1 %1677  ;;  %2825 = vrot.lane.b32.xlu2 %v2683_v37, %s6034_s25  ;;  %v7042_v37 = vld [vmem:[%s6129_s11 + $0x38] sm:$0xf]  ;;  %v1865_v29 = vld [vmem:[%s6129_s11 + $0x30] sm:$0xf] }
 0x1aa   : > { %1815 = vst.msk [vmem:[#allocation2 + $0x38] sm:$0xf] %vm1807_vm9, %v1678_v38  ;;  %v1676_v33 = vpop.permute.xlu0 %1675  ;;  %v3382_v38 = vrot.slane %v3380_v19, 4  ;;  %v4154_v44 = vrot.slane %v7042_v37, 5  ;;  %v1969_v19 = vshrl.u32 %v1862_v53, 16 }
 0x1ab   : > { %1814 = vst.msk [vmem:[#allocation2 + $0x30] sm:$0xf] %vm1807_vm9, %v1676_v33  ;;  %v1692_v56 = vpop.permute.xlu2 %1691  ;;  %v2691_v33 = vrot.slane %v2586_v14, 5 }
 0x1ac   : > { %1822 = vst.msk [vmem:[#allocation2 + $0x70] sm:$0xf] %vm1807_vm9, %v1692_v56  ;;  %v5786_v27 = vld [vmem:[#allocation2 + $0x24] sm:$0xf]  ;;  %v3383_v56 = vor.u32 %v3382_v38, %v6972_v36  ;;  %v4155_v59 = vsel %vm6441_vm7, %v4153_v43, %v4154_v44  ;;  %v3399_v36 = vsel %vm6139_vm2, %v3394_v49, %v3398_v51  ;;  %v1971_v38 = vrot.slane %v1969_v19, 4 }
 0x1ad   : > { %v5548_v30 = vld [vmem:[#allocation2 + $0x28] sm:$0xf0]  ;;  %v2692_v54 = vsel %vm6441_vm7, %v2690_v35, %v2691_v33  ;;  %4331 = vst.msk [vmem:[#allocation2 + $0x3c] sm:$0xf] %vm350_vm3, %v4155_v59  ;;  %v1985_v49 = vshll.u32 %v7104_v42, 16 }
 0x1ae   : > { %v5551_v39 = vor.u32 %v5786_v27, %v5548_v30  ;;  %v3384_v1 = vrot.slane %v3383_v56, 4  ;;  %v3404_v27 = vrot.slane %v3403_v12, 4  ;;  %v3023_v51 = vld [vmem:[%s6129_s11 + $0x2c] sm:$0xf]  ;;  %v3314_v56 = vld [vmem:[%s6129_s11 + $0x34] sm:$0xf] }
 0x1af   : > { %3842 = vrot.lane.b32.xlu1 %v3379_v46, %s6035_s27  ;;  %v1953_v46 = vrot.slane %v1952_v28, 4  ;;  %v5788_v16 = vld [vmem:[#allocation2 + $0x34] sm:$0xf]  ;;  %v3313_v59 = vld [vmem:[%s6129_s11 + $0x30] sm:$0xf]  ;;  %v3430_v61 = vshrl.u32 %v3314_v56, 16 }
 0x1b0   : > { %3840 = vrot.lane.b32.xlu0 %v3369_v48, %s6035_s27  ;;  %5758 = vmatmul.msk.bf16.gmra.mxu1 %vm4708_vm10, %v5551_v39  ;;  %v1959_v48 = vshrl.u32 %v1861_v9, 16  ;;  %v3389_v8 = vsel %vm6139_vm2, %v3384_v1, %v7027_v17  ;;  %v1965_v9 = vshll.u32 %v1862_v53, 16 }
 0x1b1   : > { %v1684_v0 = vpop.permute.xlu1 %1683  ;;  %3116 = vrot.lane.b32.xlu2 %v3019_v3, %s6033_s24  ;;  %v1958_v60 = vsel %vm6139_vm2, %v1953_v46, %v1957_v45  ;;  %v3312_v3 = vld [vmem:[%s6129_s11 + $0x2c] sm:$0xf] }
 0x1b2   : > { %1818 = vst.msk [vmem:[#allocation2 + $0x50] sm:$0xf] %vm1807_vm9, %v1684_v0  ;;  %v1682_v4 = vpop.permute.xlu0 %1681  ;;  %v1961_v0 = vrot.slane %v1959_v48, 4  ;;  %v1967_v32 = vrot.slane %v1965_v9, 5 }
 0x1b3   : > { %1817 = vst.msk [vmem:[#allocation2 + $0x48] sm:$0xf] %vm1807_vm9, %v1682_v4  ;;  %v1698_v13 = vpop.permute.xlu2 %1697  ;;  %v1863_v4 = vld [vmem:[%s6129_s11 + $0x28] sm:$0xf] }
 0x1b4   : > { %1825 = vst.msk [vmem:[#allocation2 + $0x88] sm:$0xf] %vm1807_vm9, %v1698_v13  ;;  %v1962_v10 = vor.u32 %v1961_v0, %v1957_v45  ;;  %v3406_v13 = vshll.u32 %v3312_v3, 16  ;;  %v1975_v15 = vshll.u32 %v1863_v4, 16  ;;  %v1979_v17 = vshrl.u32 %v1863_v4, 16 }
 0x1b6   : > { %v3408_v14 = vrot.slane %v3406_v13, 5  ;;  %v7096_v30 = vrot.slane %v1975_v15, 5  ;;  %v1981_v35 = vrot.slane %v1979_v17, 4  ;;  %v3432_v17 = vrot.slane %v3430_v61, 4 }
 0x1b7   : > { %2829 = vrot.lane.b32.xlu1 %v2689_v47, %s6034_s25  ;;  %v2693_v47 = vrot.slane %v2691_v33, 4  ;;  %v3410_v33 = vshrl.u32 %v3312_v3, 16  ;;  %v3416_v3 = vshll.u32 %v3313_v59, 16 }
 0x1b8   : > { %2395 = vrot.lane.b32.xlu0 %v1948_v11, %s6032_s17  ;;  %v3409_v45 = vsel %vm6139_vm2, %v3404_v27, %v3408_v14  ;;  %v1982_v48 = vor.u32 %v1981_v35, %v7096_v30 }
 0x1b9   : > { %v1690_v20 = vpop.permute.xlu1 %1689  ;;  %2393 = vrot.lane.b32.xlu2 %v1938_v21, %s6032_s17  ;;  %v4042_v21 = vld [vmem:[%s6129_s11 + $0x3c] sm:$0xf]  ;;  %v3412_v52 = vrot.slane %v3410_v33, 4  ;;  %v3418_v19 = vrot.slane %v3416_v3, 5 }
 0x1ba   : > { %1821 = vst.msk [vmem:[#allocation2 + $0x68] sm:$0xf] %vm1807_vm9, %v1690_v20  ;;  %v1688_v22 = vpop.permute.xlu0 %1687  ;;  %v5556_v20 = vld [vmem:[#allocation2 + $0x38] sm:$0xf0]  ;;  %v4157_v26 = vrot.slane %v4042_v21, 5  ;;  %v1983_v55 = vrot.slane %v1982_v48, 4 }
 0x1bb   : > { %1820 = vst.msk [vmem:[#allocation2 + $0x60] sm:$0xf] %vm1807_vm9, %v1688_v22  ;;  %v1704_v41 = vpop.permute.xlu2 %1703  ;;  %v2695_v22 = vsel %vm6441_vm7, %v2693_v47, %v2694_v62  ;;  %v5559_v25 = vor.u32 %v5788_v16, %v5556_v20  ;;  %v7130_v62 = vld [vmem:[%s6129_s11 + $0x28] sm:$0xf]  ;;  %v3413_v1 = vor.u32 %v3412_v52, %v3408_v14 }
 0x1bc   : > { %1828 = vst.msk [vmem:[#allocation2 + $0xa0] sm:$0xf] %vm1807_vm9, %v1704_v41  ;;  %v4159_v39 = vrot.slane %v4157_v26, 4  ;;  %v7148_v16 = vld [vmem:[%s6129_s11 + $0x48] sm:$0xf] }
 0x1bd   : > { %v3414_v12 = vrot.slane %v3413_v1, 4  ;;  %v4166_v14 = vrot.slane %v7148_v16, 5 }
 0x1bf   : > { %3120 = vrot.lane.b32.xlu1 %v3021_v23, %s6033_s24  ;;  %v1963_v23 = vrot.slane %v1962_v10, 4  ;;  %v7145_v10 = vld [vmem:[%s6129_s11 + $0x2c] sm:$0xf] }
 0x1c0   : > { %3118 = vrot.lane.b32.xlu0 %v3020_v34, %s6033_s24  ;;  %5759 = vmatmul.msk.bf16.gmra.mxu1 %vm4708_vm10, %v5559_v25  ;;  %v4156_v34 = vrot.slane %v4154_v44, 4  ;;  %v4161_v44 = vsel %vm6441_vm7, %v4159_v39, %v4160_v40  ;;  %v2703_v21 = vrot.slane %v7145_v10, 5  ;;  %v1995_v39 = vshll.u32 %v1865_v29, 16  ;;  %v5836_v10 = vld [vmem:[%s9416_s1 + $0x30] sm:$0xff] }
 0x1c1   : > { %v1696_v50 = vpop.permute.xlu1 %1695  ;;  %2831 = vrot.lane.b32.xlu2 %v2692_v54, %s6034_s25  ;;  %v1968_v43 = vsel %vm6139_vm2, %v1963_v23, %v1967_v32  ;;  %4333 = vst.msk [vmem:[#allocation2 + $0x4c] sm:$0xf] %vm350_vm3, %v4161_v44 }
 0x1c2   : > { %1824 = vst.msk [vmem:[#allocation2 + $0x80] sm:$0xf] %vm1807_vm9, %v1696_v50  ;;  %v1694_v57 = vpop.permute.xlu0 %1693  ;;  %v4158_v46 = vsel %vm6441_vm7, %v4156_v34, %v4157_v26  ;;  %v1972_v50 = vor.u32 %v1971_v38, %v1967_v32  ;;  %v7158_v26 = vld [vmem:[%s6129_s11 + $0x38] sm:$0xf]  ;;  %v3024_v34 = vld [vmem:[%s6129_s11 + $0x30] sm:$0xf] }
 0x1c3   : > { %1823 = vst.msk [vmem:[#allocation2 + $0x78] sm:$0xf] %vm1807_vm9, %v1694_v57  ;;  %v1710_v2 = vpop.permute.xlu2 %1709  ;;  %v7126_v57 = vrot.slane %v1985_v49, 5  ;;  %v3436_v38 = vshll.u32 %v7158_v26, 16  ;;  %v7185_v48 = vrot.slane %v1995_v39, 5  ;;  %v3440_v39 = vshrl.u32 %v7158_v26, 16 }
 0x1c4   : > { %1831 = vst.msk [vmem:[#allocation2 + $0xb8] sm:$0xf] %vm1807_vm9, %v1710_v2  ;;  %v1973_v58 = vrot.slane %v1972_v50, 4  ;;  %v3426_v2 = vshll.u32 %v3314_v56, 16  ;;  %v1989_v50 = vshrl.u32 %v7104_v42, 16 }
 0x1c5   : > { %4332 = vst.msk [vmem:[#allocation2 + $0x44] sm:$0xf] %vm350_vm3, %v4158_v46  ;;  %v1988_v4 = vsel %vm6139_vm2, %v1983_v55, %v7126_v57  ;;  %v2699_v46 = vrot.slane %v2697_v6, 4  ;;  %v5837_v55 = vld [vmem:[%s9416_s1 + $0x38] sm:$0xff] }
 0x1c6   : > { %v1978_v53 = vsel %vm6139_vm2, %v1973_v58, %v7096_v30  ;;  %v7202_v58 = vld [vmem:[%s6129_s11 + $0x30] sm:$0xf]  ;;  %v1991_v1 = vrot.slane %v1989_v50, 4  ;;  %4781 = vmatpush.bf16.msra.mxu0 %v5837_v55  ;;  %5839 = vmatpush.bf16.msra.mxu2 %v5837_v55  ;;  %v3026_v26 = vld [vmem:[%s6129_s11 + $0x38] sm:$0xf] }
 0x1c7   : > { %2397 = vrot.lane.b32.xlu1 %v1958_v60, %s6032_s17 }
 0x1c8   : > { %3846 = vrot.lane.b32.xlu0 %v3399_v36, %s6035_s27  ;;  %v3022_v36 = vld [vmem:[%s6129_s11 + $0x28] sm:$0xf]  ;;  %v5564_v47 = vld [vmem:[#allocation2 + $0x48] sm:$0xf0] }
 0x1c9   : > { %v1702_v7 = vpop.permute.xlu1 %1701  ;;  %3844 = vrot.lane.b32.xlu2 %v3389_v8, %s6035_s27  ;;  %v4044_v8 = vld [vmem:[%s6129_s11 + $0x44] sm:$0xf] }
 0x1ca   : > { %1827 = vst.msk [vmem:[#allocation2 + $0x98] sm:$0xf] %vm1807_vm9, %v1702_v7  ;;  %v1700_v11 = vpop.permute.xlu0 %1699  ;;  %v2700_v7 = vrot.slane %v7130_v62, 5  ;;  %v4163_v15 = vrot.slane %v4044_v8, 5  ;;  %v1884_v8 = vld [vmem:[%s6129_s11 + $0x7c] sm:$0xf]  ;;  %4782 = vmatpush.bf16.msra.mxu0 %v5836_v10  ;;  %5840 = vmatpush.bf16.msra.mxu2 %v5836_v10 }
 0x1cb   : > { %1826 = vst.msk [vmem:[#allocation2 + $0x90] sm:$0xf] %vm1807_vm9, %v1700_v11  ;;  %v1716_v28 = vpop.permute.xlu2 %1715  ;;  %v3420_v11 = vshrl.u32 %v3313_v59, 16 }
 0x1cc   : > { %1834 = vst.msk [vmem:[#allocation2 + $0xd0] sm:$0xf] %vm1807_vm9, %v1716_v28  ;;  %v5790_v5 = vld [vmem:[#allocation2 + $0x44] sm:$0xf]  ;;  %v2702_v20 = vrot.slane %v2700_v7, 4  ;;  %v4165_v23 = vrot.slane %v4163_v15, 4  ;;  %v3419_v28 = vsel %vm6139_vm2, %v3414_v12, %v3418_v19  ;;  %v2701_v52 = vsel %vm6441_vm7, %v2699_v46, %v2700_v7 }
 0x1cd   : > { %v5567_v13 = vor.u32 %v5790_v5, %v5564_v47  ;;  %v3422_v27 = vrot.slane %v3420_v11, 4  ;;  %v2705_v5 = vrot.slane %v2703_v21, 4  ;;  %v4168_v11 = vrot.slane %v4166_v14, 4 }
 0x1ce   : > { %v2704_v33 = vsel %vm6441_vm7, %v2702_v20, %v2703_v21  ;;  %v2185_v20 = vshll.u32 %v1884_v8, 16  ;;  %v2189_v21 = vshrl.u32 %v1884_v8, 16 }
 0x1cf   : > { %2835 = vrot.lane.b32.xlu1 %v2698_v18, %s6034_s25  ;;  %v7152_v18 = vrot.slane %v3426_v2, 5  ;;  %v4046_v2 = vld [vmem:[%s6129_s11 + $0x4c] sm:$0xf] }
 0x1d0   : > { %2833 = vrot.lane.b32.xlu0 %v2695_v22, %s6034_s25  ;;  %5760 = vmatmul.msk.bf16.gmra.mxu1 %vm4708_vm10, %v5567_v13  ;;  %v4162_v22 = vrot.slane %v4160_v40, 4  ;;  %v1999_v40 = vshrl.u32 %v1865_v29, 16  ;;  %v4169_v3 = vrot.slane %v4046_v2, 5  ;;  %v3025_v13 = vld [vmem:[%s6129_s11 + $0x34] sm:$0xf] }
 0x1d1   : > { %v1708_v41 = vpop.permute.xlu1 %1707  ;;  %2399 = vrot.lane.b32.xlu2 %v1968_v43, %s6032_s17  ;;  %v3433_v35 = vor.u32 %v3432_v17, %v7152_v18  ;;  %v3423_v43 = vor.u32 %v3422_v27, %v3418_v19  ;;  %v5835_v27 = vld [vmem:[%s9416_s1 + $0x28] sm:$0xff] }
 0x1d2   : > { %1830 = vst.msk [vmem:[#allocation2 + $0xb0] sm:$0xf] %vm1807_vm9, %v1708_v41  ;;  %v1706_v37 = vpop.permute.xlu0 %1705  ;;  %v4164_v32 = vsel %vm6441_vm7, %v4162_v22, %v4163_v15  ;;  %v4167_v41 = vsel %vm6441_vm7, %v4165_v23, %v4166_v14  ;;  %v2001_v49 = vrot.slane %v1999_v40, 4  ;;  %v3316_v15 = vld [vmem:[%s6129_s11 + $0x3c] sm:$0xf]  ;;  %v4171_v16 = vrot.slane %v4169_v3, 4  ;;  %4783 = vmatpush.bf16.msra.mxu0 %v5835_v27  ;;  %5841 = vmatpush.bf16.msra.mxu2 %v5835_v27 }
 0x1d3   : > { %1829 = vst.msk [vmem:[#allocation2 + $0xa8] sm:$0xf] %vm1807_vm9, %v1706_v37  ;;  %v1722_v54 = vpop.permute.xlu2 %1721  ;;  %v3434_v44 = vrot.slane %v3433_v35, 4  ;;  %v3424_v6 = vrot.slane %v3423_v43, 4  ;;  %v4170_v19 = vsel %vm6441_vm7, %v4168_v11, %v4169_v3  ;;  %v3446_v23 = vshll.u32 %v3316_v15, 16 }
 0x1d4   : > { %1837 = vst.msk [vmem:[#allocation2 + $0xe8] sm:$0xf] %vm1807_vm9, %v1722_v54  ;;  %v2002_v59 = vor.u32 %v2001_v49, %v7185_v48 }
 0x1d5   : > { %4334 = vst.msk [vmem:[#allocation2 + $0x54] sm:$0xf] %vm350_vm3, %v4164_v32  ;;  %v2191_v32 = vrot.slane %v2189_v21, 4  ;;  %v7332_v21 = vld [vmem:[%s6129_s11 + $0x84] sm:$0xf] }
 0x1d6   : > { %4335 = vst.msk [vmem:[#allocation2 + $0x5c] sm:$0xf] %vm350_vm3, %v4167_v41  ;;  %v2003_v7 = vrot.slane %v2002_v59, 4  ;;  %v7262_v41 = vld [vmem:[%s6129_s11 + $0x80] sm:$0xf] }
 0x1d7   : > { %3848 = vrot.lane.b32.xlu1 %v3409_v45, %s6035_s27  ;;  %v7183_v45 = vrot.slane %v3436_v38, 5  ;;  %4336 = vst.msk [vmem:[#allocation2 + $0x64] sm:$0xf] %vm350_vm3, %v4170_v19  ;;  %v5834_v38 = vld [vmem:[%s9416_s1 + $0x20] sm:$0xff]  ;;  %v2199_v2 = vshrl.u32 %v7262_v41, 16  ;;  %v5831_v19 = vld [vmem:[%s9416_s1 + $0x8] sm:$0xff] }
 0x1d8   : > { %3124 = vrot.lane.b32.xlu0 %v3023_v51, %s6033_s24  ;;  %v7189_v51 = vld [vmem:[%s6129_s11 + $0x34] sm:$0xf]  ;;  %4784 = vmatpush.bf16.msra.mxu0 %v5834_v38 }
 0x1d9   : > { %v1714_v60 = vpop.permute.xlu1 %1713  ;;  %3122 = vrot.lane.b32.xlu2 %v3022_v36, %s6033_s24  ;;  %v3439_v42 = vsel %vm6139_vm2, %v3434_v44, %v7183_v45  ;;  %v3429_v36 = vsel %vm6139_vm2, %v3424_v6, %v7152_v18  ;;  %v7273_v44 = vld [vmem:[%s6129_s11 + $0x34] sm:$0xf]  ;;  %5842 = vmatpush.bf16.msra.mxu2 %v5834_v38  ;;  %v2201_v27 = vrot.slane %v2199_v2, 4  ;;  %v2769_v38 = vrot.slane %v7332_v21, 5 }
 0x1da   : > { %1833 = vst.msk [vmem:[#allocation2 + $0xc8] sm:$0xf] %vm1807_vm9, %v1714_v60  ;;  %v1712_v0 = vpop.permute.xlu0 %1711  ;;  %v2005_v60 = vshll.u32 %v7189_v51, 16  ;;  %v2709_v55 = vrot.slane %v7273_v44, 5 }
 0x1db   : > { %1832 = vst.msk [vmem:[#allocation2 + $0xc0] sm:$0xf] %vm1807_vm9, %v1712_v0  ;;  %v1728_v9 = vpop.permute.xlu2 %1727 }
 0x1dc   : > { %1840 = vst.msk [vmem:[#allocation2 + $0x100] sm:$0xf] %vm1807_vm9, %v1728_v9  ;;  %v5792_v56 = vld [vmem:[#allocation2 + $0x54] sm:$0xf]  ;;  %v7219_v47 = vrot.slane %v2005_v60, 5  ;;  %v1992_v9 = vor.u32 %v1991_v1, %v7126_v57 }
 0x1dd   : > { %v5572_v62 = vld [vmem:[#allocation2 + $0x58] sm:$0xf0]  ;;  %v4048_v60 = vld [vmem:[%s6129_s11 + $0x54] sm:$0xf] }
 0x1de   : > { %v5575_v0 = vor.u32 %v5792_v56, %v5572_v62  ;;  %v1993_v29 = vrot.slane %v1992_v9, 4  ;;  %v5794_v50 = vld [vmem:[#allocation2 + $0x64] sm:$0xf]  ;;  %v4175_v1 = vrot.slane %v4048_v60, 5 }
 0x1df   : > { %2403 = vrot.lane.b32.xlu1 %v1988_v4, %s6032_s17  ;;  %v2706_v4 = vrot.slane %v7202_v58, 5 }
 0x1e0   : > { %2401 = vrot.lane.b32.xlu0 %v1978_v53, %s6032_s17  ;;  %5761 = vmatmul.msk.bf16.gmra.mxu1 %vm4708_vm10, %v5575_v0  ;;  %v7216_v53 = vld [vmem:[%s6129_s11 + $0x50] sm:$0xf]  ;;  %v1998_v43 = vsel %vm6139_vm2, %v1993_v29, %v7185_v48  ;;  %v4177_v8 = vrot.slane %v4175_v1, 4  ;;  %v7344_v29 = vld [vmem:[%s6129_s11 + $0x84] sm:$0xf] }
 0x1e1   : > { %v1720_v25 = vpop.permute.xlu1 %1719  ;;  %3850 = vrot.lane.b32.xlu2 %v3419_v28, %s6035_s27  ;;  %v4172_v18 = vrot.slane %v7216_v53, 5  ;;  %v2707_v22 = vsel %vm6441_vm7, %v2705_v5, %v2706_v4  ;;  %v2008_v28 = vsel %vm6139_vm2, %v2003_v7, %v7219_v47  ;;  %v2708_v56 = vrot.slane %v2706_v4, 4  ;;  %v3335_v4 = vld [vmem:[%s6129_s11 + $0x88] sm:$0xf]  ;;  %v5832_v7 = vld [vmem:[%s9416_s1 + $0x10] sm:$0xff] }
 0x1e2   : > { %1836 = vst.msk [vmem:[#allocation2 + $0xe0] sm:$0xf] %vm1807_vm9, %v1720_v25  ;;  %v1718_v30 = vpop.permute.xlu0 %1717  ;;  %v3450_v25 = vshrl.u32 %v3316_v15, 16  ;;  %v2611_v53 = vld [vmem:[%s6129_s11 + $0x80] sm:$0xf] }
 0x1e3   : > { %1835 = vst.msk [vmem:[#allocation2 + $0xd8] sm:$0xf] %vm1807_vm9, %v1718_v30  ;;  %v1734_v37 = vpop.permute.xlu2 %1733  ;;  %v4173_v57 = vsel %vm6441_vm7, %v4171_v16, %v4172_v18  ;;  %v7252_v30 = vrot.slane %v2185_v20, 5  ;;  %v4174_v58 = vrot.slane %v4172_v18, 4  ;;  %v7318_v16 = vld [vmem:[%s6129_s11 + $0x7c] sm:$0xf] }
 0x1e4   : > { %1843 = vst.msk [vmem:[#allocation2 + $0x118] sm:$0xf] %vm1807_vm9, %v1734_v37  ;;  %v3452_v35 = vrot.slane %v3450_v25, 4  ;;  %v3027_v37 = vld [vmem:[%s6129_s11 + $0x3c] sm:$0xf] }
 0x1e5   : > { %4337 = vst.msk [vmem:[#allocation2 + $0x6c] sm:$0xf] %vm350_vm3, %v4173_v57  ;;  %v2192_v49 = vor.u32 %v2191_v32, %v7252_v30  ;;  %v4176_v15 = vsel %vm6441_vm7, %v4174_v58, %v4175_v1  ;;  %v2766_v57 = vrot.slane %v2611_v53, 5 }
 0x1e6   : > { %4338 = vst.msk [vmem:[#allocation2 + $0x74] sm:$0xf] %vm350_vm3, %v4176_v15 }
 0x1e7   : > { %3126 = vrot.lane.b32.xlu1 %v3024_v34, %s6033_s24  ;;  %v7255_v34 = vrot.slane %v3446_v23, 5  ;;  %v2193_v0 = vrot.slane %v2192_v49, 4  ;;  %v9421_v23 = vrot.slane %v7318_v16, 5  ;;  %v2205_v49 = vshll.u32 %v7344_v29, 16 }
 0x1e8   : > { %2839 = vrot.lane.b32.xlu0 %v2704_v33, %s6034_s25  ;;  %v7265_v33 = vld [vmem:[%s6129_s11 + $0x40] sm:$0xf] }
 0x1e9   : > { %v1726_v63 = vpop.permute.xlu1 %1725  ;;  %2837 = vrot.lane.b32.xlu2 %v2701_v52, %s6034_s25  ;;  %v3453_v48 = vor.u32 %v3452_v35, %v7255_v34  ;;  %v3456_v6 = vshll.u32 %v7265_v33, 16  ;;  %v2768_v35 = vrot.slane %v2766_v57, 4 }
 0x1ea   : > { %1839 = vst.msk [vmem:[#allocation2 + $0xf8] sm:$0xf] %vm1807_vm9, %v1726_v63  ;;  %v1724_v54 = vpop.permute.xlu0 %1723  ;;  %v2195_v63 = vshll.u32 %v7262_v41, 16 }
 0x1eb   : > { %1838 = vst.msk [vmem:[#allocation2 + $0xf0] sm:$0xf] %vm1807_vm9, %v1724_v54  ;;  %v1740_v61 = vpop.permute.xlu2 %1739  ;;  %v5833_v54 = vld [vmem:[%s9416_s1 + $0x18] sm:$0xff]  ;;  %v7302_v5 = vrot.slane %v3456_v6, 5  ;;  %v3454_v11 = vrot.slane %v3453_v48, 4 }
 0x1ec   : > { %1846 = vst.msk [vmem:[#allocation2 + $0x130] sm:$0xf] %vm1807_vm9, %v1740_v61  ;;  %v5580_v52 = vld [vmem:[#allocation2 + $0x68] sm:$0xf0]  ;;  %4785 = vmatpush.bf16.msra.mxu0 %v5833_v54  ;;  %5843 = vmatpush.bf16.msra.mxu2 %v5833_v54  ;;  %v7300_v3 = vrot.slane %v2195_v63, 5  ;;  %v2009_v63 = vshrl.u32 %v7189_v51, 16 }
 0x1ed   : > { %v5583_v59 = vor.u32 %v5794_v50, %v5580_v52  ;;  %v5796_v52 = vld [vmem:[#allocation2 + $0x74] sm:$0xf] }
 0x1ee   : > { %v2198_v20 = vsel %vm6139_vm2, %v2193_v0, %v7300_v3  ;;  %v2011_v15 = vrot.slane %v2009_v63, 4 }
 0x1ef   : > { %3854 = vrot.lane.b32.xlu1 %v3439_v42, %s6035_s27  ;;  %v3442_v42 = vrot.slane %v3440_v39, 4  ;;  %v3336_v39 = vld [vmem:[%s6129_s11 + $0x8c] sm:$0xf] }
 0x1f0   : > { %3852 = vrot.lane.b32.xlu0 %v3429_v36, %s6035_s27  ;;  %v7290_v36 = vld [vmem:[%s6129_s11 + $0x58] sm:$0xf]  ;;  %5762 = vmatmul.msk.bf16.gmra.mxu1 %vm4708_vm10, %v5583_v59  ;;  %v3646_v6 = vshll.u32 %v3336_v39, 16  ;;  %v4050_v59 = vld [vmem:[%s6129_s11 + $0x5c] sm:$0xf] }
 0x1f1   : > { %v1732_v12 = vpop.permute.xlu1 %1731  ;;  %3128 = vrot.lane.b32.xlu2 %v3025_v13, %s6033_s24  ;;  %v4178_v61 = vrot.slane %v7290_v36, 5  ;;  %v3443_v13 = vor.u32 %v3442_v42, %v7183_v45  ;;  %4786 = vmatpush.bf16.msra.mxu0 %v5832_v7  ;;  %v3640_v45 = vshrl.u32 %v3335_v4, 16  ;;  %v4181_v2 = vrot.slane %v4050_v59, 5 }
 0x1f2   : > { %1842 = vst.msk [vmem:[#allocation2 + $0x110] sm:$0xf] %vm1807_vm9, %v1732_v12  ;;  %v1730_v17 = vpop.permute.xlu0 %1729  ;;  %v2710_v12 = vsel %vm6441_vm7, %v2708_v56, %v2709_v55  ;;  %5844 = vmatpush.bf16.msra.mxu2 %v5832_v7  ;;  %v3648_v7 = vrot.slane %v3646_v6, 5 }
 0x1f3   : > { %1841 = vst.msk [vmem:[#allocation2 + $0x108] sm:$0xf] %vm1807_vm9, %v1730_v17  ;;  %v1746_v14 = vpop.permute.xlu2 %1745  ;;  %v4179_v18 = vsel %vm6441_vm7, %v4177_v8, %v4178_v61  ;;  %v3636_v17 = vshll.u32 %v3335_v4, 16  ;;  %v3444_v25 = vrot.slane %v3443_v13, 4  ;;  %v3642_v32 = vrot.slane %v3640_v45, 4 }
 0x1f4   : > { %1849 = vst.msk [vmem:[#allocation2 + $0x148] sm:$0xf] %vm1807_vm9, %v1746_v14  ;;  %v4180_v4 = vrot.slane %v4178_v61, 4  ;;  %v7388_v13 = vld [vmem:[%s6129_s11 + $0x3c] sm:$0xf] }
 0x1f5   : > { %4339 = vst.msk [vmem:[#allocation2 + $0x7c] sm:$0xf] %vm350_vm3, %v4179_v18  ;;  %4787 = vmatpush.bf16.msra.mxu0 %v5831_v19  ;;  %v7347_v14 = vrot.slane %v3636_v17, 5 }
 0x1f6   : > { %5845 = vmatpush.bf16.msra.mxu2 %v5831_v19  ;;  %v4182_v18 = vsel %vm6441_vm7, %v4180_v4, %v4181_v2 }
 0x1f7   : > { %2841 = vrot.lane.b32.xlu1 %v2707_v22, %s6034_s25  ;;  %v3459_v22 = vsel %vm6139_vm2, %v3454_v11, %v7302_v5  ;;  %v3643_v48 = vor.u32 %v3642_v32, %v7347_v14  ;;  %v4183_v11 = vrot.slane %v4181_v2, 4  ;;  %4340 = vst.msk [vmem:[#allocation2 + $0x84] sm:$0xf] %vm350_vm3, %v4182_v18  ;;  %v7446_v2 = vld [vmem:[%s6129_s11 + $0x68] sm:$0xf] }
 0x1f8   : > { %2407 = vrot.lane.b32.xlu0 %v2008_v28, %s6032_s17 }
 0x1f9   : > { %v1738_v40 = vpop.permute.xlu1 %1737  ;;  %2405 = vrot.lane.b32.xlu2 %v1998_v43, %s6032_s17  ;;  %v2765_v43 = vrot.slane %v9421_v23, 4  ;;  %v3644_v58 = vrot.slane %v3643_v48, 4 }
 0x1fa   : > { %1845 = vst.msk [vmem:[#allocation2 + $0x128] sm:$0xf] %vm1807_vm9, %v1738_v40  ;;  %v1736_v46 = vpop.permute.xlu0 %1735  ;;  %v5830_v40 = vld [vmem:[%s9416_s1] sm:$0xff] }
 0x1fb   : > { %1844 = vst.msk [vmem:[#allocation2 + $0x120] sm:$0xf] %vm1807_vm9, %v1736_v46  ;;  %v1752_v62 = vpop.permute.xlu2 %1751  ;;  %v3449_v46 = vsel %vm6139_vm2, %v3444_v25, %v7255_v34  ;;  %4788 = vmatpush.bf16.msra.mxu0 %v5830_v40  ;;  %5846 = vmatpush.bf16.msra.mxu2 %v5830_v40  ;;  %v2770_v34 = vsel %vm6441_vm7, %v2768_v35, %v2769_v38 }
 0x1fc   : > { %1852 = vst.msk [vmem:[#allocation2 + $0x160] sm:$0xf] %vm1807_vm9, %v1752_v62  ;;  %v5588_v42 = vld [vmem:[#allocation2 + $0x78] sm:$0xf0]  ;;  %v2767_v51 = vsel %vm6441_vm7, %v2765_v43, %v2766_v57  ;;  %v7375_v62 = vrot.slane %v2205_v49, 5  ;;  %v3649_v45 = vsel %vm6139_vm2, %v3644_v58, %v3648_v7  ;;  %v3460_v49 = vshrl.u32 %v7265_v33, 16 }
 0x1fd   : > { %v5591_v1 = vor.u32 %v5796_v52, %v5588_v42  ;;  %v3047_v57 = vld [vmem:[%s6129_s11 + $0x8c] sm:$0xf]  ;;  %v3046_v43 = vld [vmem:[%s6129_s11 + $0x88] sm:$0xf]  ;;  %v4052_v33 = vld [vmem:[%s6129_s11 + $0x64] sm:$0xf] }
 0x1ff   : > { %3132 = vrot.lane.b32.xlu1 %v3027_v37, %s6033_s24  ;;  %v1867_v37 = vld [vmem:[%s6129_s11 + $0x38] sm:$0xf] }
 0x200   : > { %3130 = vrot.lane.b32.xlu0 %v3026_v26, %s6033_s24  ;;  %v2202_v26 = vor.u32 %v2201_v27, %v7300_v3  ;;  %v2015_v54 = vshll.u32 %v1867_v37, 16  ;;  %v2019_v56 = vshrl.u32 %v1867_v37, 16  ;;  %5763 = vmatmul.msk.bf16.gmra.mxu1 %vm4708_vm10, %v5591_v1  ;;  %v7380_v3 = vld [vmem:[%s6129_s11 + $0x60] sm:$0xf] }
 0x201   : > { %v1744_v10 = vpop.permute.xlu1 %1743  ;;  %2843 = vrot.lane.b32.xlu2 %v2710_v12, %s6034_s25  ;;  %v3650_v12 = vshrl.u32 %v3336_v39, 16  ;;  %v4184_v36 = vrot.slane %v7380_v3, 5  ;;  %v3318_v39 = vld [vmem:[%s6129_s11 + $0x44] sm:$0xf]  ;;  %v7434_v52 = vpop.f32.mrf.mxu1 }
 0x202   : > { %1848 = vst.msk [vmem:[#allocation2 + $0x140] sm:$0xf] %vm1807_vm9, %v1744_v10  ;;  %v1742_v9 = vpop.permute.xlu0 %1741  ;;  %v2203_v60 = vrot.slane %v2202_v26, 4  ;;  %v7385_v8 = vrot.slane %v2015_v54, 5  ;;  %v2021_v10 = vrot.slane %v2019_v56, 4  ;;  %v3466_v63 = vshll.u32 %v3318_v39, 16 }
 0x203   : > { %1847 = vst.msk [vmem:[#allocation2 + $0x138] sm:$0xf] %vm1807_vm9, %v1742_v9  ;;  %v7341_v28 = vpop.permute.xlu2 %2825  ;;  %v4185_v17 = vsel %vm6441_vm7, %v4183_v11, %v4184_v36  ;;  %v3652_v25 = vrot.slane %v3650_v12, 4  ;;  %v3470_v48 = vshrl.u32 %v3318_v39, 16  ;;  %v4186_v58 = vrot.slane %v4184_v36, 4 }
 0x204   : > { %v2208_v9 = vsel %vm6139_vm2, %v2203_v60, %v7375_v62  ;;  %v2022_v19 = vor.u32 %v2021_v10, %v7385_v8  ;;  %4341 = vst.msk [vmem:[#allocation2 + $0x8c] sm:$0xf] %vm350_vm3, %v4185_v17  ;;  %v7443_v60 = vld [vmem:[%s6129_s11 + $0x3c] sm:$0xf]  ;;  %v4190_v10 = vrot.slane %v7446_v2, 5  ;;  %v2711_v39 = vrot.slane %v2709_v55, 4 }
 0x205   : > { %v7458_v12 = vld [vmem:[%s6129_s11 + $0x48] sm:$0xf] }
 0x206   : > { %v2023_v32 = vrot.slane %v2022_v19, 4  ;;  %v1887_v36 = vld [vmem:[%s6129_s11 + $0x88] sm:$0xf] }
 0x207   : > { %2445 = vrot.lane.b32.xlu1 %v2198_v20, %s6032_s17  ;;  %v2025_v20 = vshll.u32 %v7388_v13, 16 }
 0x208   : > { %3858 = vrot.lane.b32.xlu0 %v3459_v22, %s6035_s27  ;;  %v2012_v22 = vor.u32 %v2011_v15, %v7219_v47  ;;  %v7420_v47 = vld [vmem:[%s6129_s11 + $0x38] sm:$0xf]  ;;  %v3462_v15 = vrot.slane %v3460_v49, 4 }
 0x209   : > { %v1750_v41 = vpop.permute.xlu1 %1749  ;;  %3856 = vrot.lane.b32.xlu2 %v3449_v46, %s6035_s27  ;;  %v7417_v35 = vrot.slane %v2025_v20, 5  ;;  %v3653_v46 = vor.u32 %v3652_v25, %v3648_v7  ;;  %v7452_v7 = vrot.slane %v3466_v63, 5  ;;  %v3476_v20 = vshll.u32 %v7458_v12, 16  ;;  %v7474_v25 = vpop.f32.mrf.mxu1 }
 0x20a   : > { %1851 = vst.msk [vmem:[#allocation2 + $0x158] sm:$0xf] %vm1807_vm9, %v1750_v41  ;;  %v1748_v50 = vpop.permute.xlu0 %1747  ;;  %v2013_v41 = vrot.slane %v2012_v22, 4  ;;  %v2219_v22 = vshrl.u32 %v1887_v36, 16 }
 0x20b   : > { %1850 = vst.msk [vmem:[#allocation2 + $0x150] sm:$0xf] %vm1807_vm9, %v1748_v50  ;;  %v3117_v0 = vpop.permute.xlu2 %3116  ;;  %v2712_v50 = vrot.slane %v7420_v47, 5  ;;  %v2028_v6 = vsel %vm6139_vm2, %v2023_v32, %v7417_v35  ;;  %v3654_v56 = vrot.slane %v3653_v46, 4  ;;  %v5596_v59 = vld [vmem:[#allocation2 + $0x88] sm:$0xf0]  ;;  %v3463_v32 = vor.u32 %v3462_v15, %v7302_v5 }
 0x20c   : > { %v2018_v54 = vsel %vm6139_vm2, %v2013_v41, %v7385_v8  ;;  %v3472_v8 = vrot.slane %v3470_v48, 4 }
 0x20d   : > { %v2714_v4 = vrot.slane %v2712_v50, 4  ;;  %v3464_v44 = vrot.slane %v3463_v32, 4  ;;  %v2713_v55 = vsel %vm6441_vm7, %v2711_v39, %v2712_v50 }
 0x20e   : > { %v3473_v19 = vor.u32 %v3472_v8, %v7452_v7 }
 0x20f   : > { %2883 = vrot.lane.b32.xlu1 %v2770_v34, %s6034_s25  ;;  %v5798_v34 = vld [vmem:[#allocation2 + $0x84] sm:$0xf] }
 0x210   : > { %2881 = vrot.lane.b32.xlu0 %v2767_v51, %s6034_s25  ;;  %v4187_v51 = vrot.slane %v4052_v33, 5  ;;  %v3474_v41 = vrot.slane %v3473_v19, 4 }
 0x211   : > { %v2392_v53 = vpop.permute.xlu1 %2391  ;;  %2447 = vrot.lane.b32.xlu2 %v2208_v9, %s6032_s17 }
 0x212   : > { %2535 = vst.msk [vmem:[#allocation2 + $0x8] sm:$0xf] %vm2533_vm11, %v2392_v53  ;;  %v2390_v61 = vpop.permute.xlu0 %2389  ;;  %v4189_v3 = vrot.slane %v4187_v51, 4  ;;  %v2715_v53 = vrot.slane %v7443_v60, 5 }
 0x213   : > { %2534 = vst.msk [vmem:[#allocation2] sm:$0xf] %vm2533_vm11, %v2390_v61  ;;  %v2394_v27 = vpop.permute.xlu2 %2393  ;;  %v4188_v61 = vsel %vm6441_vm7, %v4186_v58, %v4187_v51  ;;  %v4054_v58 = vld [vmem:[%s6129_s11 + $0x6c] sm:$0xf] }
 0x214   : > { %2970 = vst.msk [vmem:[#allocation2] sm:$0xf] %vm2969_vm12, %v7341_v28  ;;  %v7411_v28 = vld [vmem:[%s6129_s11 + $0x90] sm:$0xf]  ;;  %v4191_v17 = vsel %vm6441_vm7, %v4189_v3, %v4190_v10  ;;  %v4193_v8 = vrot.slane %v4054_v58, 5 }
 0x215   : > { %2536 = vst.msk [vmem:[#allocation2 + $0x10] sm:$0xf] %vm2533_vm11, %v2394_v27  ;;  %v3656_v37 = vshll.u32 %v7411_v28, 16  ;;  %v2716_v27 = vsel %vm6441_vm7, %v2714_v4, %v2715_v53  ;;  %v7518_v3 = vld [vmem:[%s6129_s11 + $0x70] sm:$0xf]  ;;  %v4192_v4 = vrot.slane %v4190_v10, 4 }
 0x216   : > { %4342 = vst.msk [vmem:[#allocation2 + $0x94] sm:$0xf] %vm350_vm3, %v4188_v61 }
 0x217   : > { %3896 = vrot.lane.b32.xlu1 %v3649_v45, %s6035_s27  ;;  %v7440_v42 = vrot.slane %v3656_v37, 5  ;;  %v3028_v45 = vld [vmem:[%s6129_s11 + $0x40] sm:$0xf]  ;;  %4343 = vst.msk [vmem:[#allocation2 + $0x9c] sm:$0xf] %vm350_vm3, %v4191_v17  ;;  %v2221_v37 = vrot.slane %v2219_v22, 4  ;;  %v4194_v21 = vsel %vm6441_vm7, %v4192_v4, %v4193_v8 }
 0x218   : > { %3172 = vrot.lane.b32.xlu0 %v3047_v57, %s6033_s24  ;;  %v2215_v57 = vshll.u32 %v1887_v36, 16  ;;  %v3338_v17 = vld [vmem:[%s6129_s11 + $0x94] sm:$0xf]  ;;  %4344 = vst.msk [vmem:[#allocation2 + $0xa4] sm:$0xf] %vm350_vm3, %v4194_v21 }
 0x219   : > { %v3115_v40 = vpop.permute.xlu1 %3114  ;;  %3170 = vrot.lane.b32.xlu2 %v3046_v43, %s6033_s24  ;;  %v3659_v9 = vsel %vm6139_vm2, %v3654_v56, %v7440_v42  ;;  %v7487_v43 = vrot.slane %v3476_v20, 5  ;;  %v3469_v56 = vsel %vm6139_vm2, %v3464_v44, %v7452_v7  ;;  %v2771_v7 = vrot.slane %v2769_v38, 4 }
 0x21a   : > { %3259 = vst.msk [vmem:[#allocation2] sm:$0xf] %vm3258_vm13, %v3115_v40  ;;  %v2828_v26 = vpop.permute.xlu0 %2827  ;;  %v7489_v46 = vrot.slane %v2215_v57, 5  ;;  %v7507_v33 = vpop.f32.mrf.mxu1  ;;  %v2029_v38 = vshrl.u32 %v7388_v13, 16  ;;  %v3670_v22 = vshrl.u32 %v3338_v17, 16 }
 0x21b   : > { %2971 = vst.msk [vmem:[#allocation2 + $0x8] sm:$0xf] %vm2969_vm12, %v2828_v26  ;;  %v2832_v1 = vpop.permute.xlu2 %2831  ;;  %v2209_v26 = vshrl.u32 %v7344_v29, 16  ;;  %v3479_v47 = vsel %vm6139_vm2, %v3474_v41, %v7487_v43 }
 0x21c   : > { %3260 = vst.msk [vmem:[#allocation2 + $0x8] sm:$0xf] %vm3258_vm13, %v3117_v0  ;;  %v5599_v0 = vor.u32 %v5798_v34, %v5596_v59  ;;  %v2222_v50 = vor.u32 %v2221_v37, %v7489_v46  ;;  %v7513_v59 = vld [vmem:[%s6129_s11 + $0x88] sm:$0xf]  ;;  %v3672_v37 = vrot.slane %v3670_v22, 4 }
 0x21d   : > { %v5800_v29 = vld [vmem:[#allocation2 + $0x94] sm:$0xf] }
 0x21e   : > { %5764 = vmatmul.msk.bf16.gmra.mxu1 %vm4708_vm10, %v5599_v0  ;;  %v2223_v15 = vrot.slane %v2222_v50, 4 }
 0x21f   : > { %2411 = vrot.lane.b32.xlu1 %v2028_v6, %s6032_s17  ;;  %v7498_v6 = vld [vmem:[%s6129_s11 + $0x8c] sm:$0xf] }
 0x220   : > { %2409 = vrot.lane.b32.xlu0 %v2018_v54, %s6032_s17  ;;  %v5604_v54 = vld [vmem:[#allocation2 + $0x98] sm:$0xf0]  ;;  %v2225_v51 = vshll.u32 %v7498_v6, 16 }
 0x221   : > { %v3843_v11 = vpop.permute.xlu1 %3842  ;;  %3898 = vrot.lane.b32.xlu2 %v3659_v9, %s6035_s27  ;;  %v5607_v0 = vor.u32 %v5800_v29, %v5604_v54  ;;  %v4196_v9 = vrot.slane %v7518_v3, 5  ;;  %v3048_v29 = vld [vmem:[%s6129_s11 + $0x90] sm:$0xf]  ;;  %v5802_v54 = vld [vmem:[#allocation2 + $0xa4] sm:$0xf] }
 0x222   : > { %3986 = vst.msk [vmem:[#allocation2 + $0x8] sm:$0xf] %vm3984_vm14, %v3843_v11  ;;  %v3841_v18 = vpop.permute.xlu0 %3840  ;;  %v2772_v11 = vrot.slane %v7513_v59, 5  ;;  %v7528_v61 = vrot.slane %v2225_v51, 5  ;;  %v7579_v3 = vld [vmem:[%s6129_s11 + $0x78] sm:$0xf] }
 0x223   : > { %3985 = vst.msk [vmem:[#allocation2] sm:$0xf] %vm3984_vm14, %v3841_v18  ;;  %v3845_v40 = vpop.permute.xlu2 %3844  ;;  %v3029_v18 = vld [vmem:[%s6129_s11 + $0x44] sm:$0xf] }
 0x224   : > { %v2773_v57 = vsel %vm6441_vm7, %v2771_v7, %v2772_v11  ;;  %v2228_v13 = vsel %vm6139_vm2, %v2223_v15, %v7528_v61  ;;  %v2774_v59 = vrot.slane %v2772_v11, 4 }
 0x227   : > { %3134 = vrot.lane.b32.xlu1 %v3028_v45, %s6033_s24  ;;  %v4195_v45 = vrot.slane %v4193_v8, 4  ;;  %v4198_v8 = vrot.slane %v4196_v9, 4 }
 0x228   : > { %2847 = vrot.lane.b32.xlu0 %v2716_v27, %s6034_s25  ;;  %v7544_v27 = vpop.f32.mrf.mxu1 }
 0x229   : > { %v2830_v5 = vpop.permute.xlu1 %2829  ;;  %v5783_v49 = vld [vmem:[#allocation2 + $0x4] sm:$0xf0]  ;;  %2845 = vrot.lane.b32.xlu2 %v2713_v55, %s6034_s25  ;;  %v4197_v20 = vsel %vm6441_vm7, %v4195_v45, %v4196_v9  ;;  %v4202_v9 = vrot.slane %v7579_v3, 5 }
 0x22a   : > { %2972 = vst.msk [vmem:[#allocation2 + $0x10] sm:$0xf] %vm2969_vm12, %v2830_v5  ;;  %v2396_v63 = vpop.permute.xlu0 %2395  ;;  %v5530_v48 = vld [vmem:[#allocation2] sm:$0xf] }
 0x22b   : > { %2537 = vst.msk [vmem:[#allocation2 + $0x18] sm:$0xf] %vm2533_vm11, %v2396_v63  ;;  %v5531_v34 = vor.u32 %v5783_v49, %v5530_v48  ;;  %v2400_v2 = vpop.permute.xlu2 %2399  ;;  %v1869_v49 = vld [vmem:[%s6129_s11 + $0x40] sm:$0xf]  ;;  %v7562_v63 = vld [vmem:[%s6129_s11 + $0x98] sm:$0xf] }
 0x22c   : > { %2973 = vst.msk [vmem:[#allocation2 + $0x18] sm:$0xf] %vm2969_vm12, %v2832_v1  ;;  %v2211_v1 = vrot.slane %v2209_v26, 4  ;;  %v3660_v26 = vshrl.u32 %v7411_v28, 16  ;;  %v7565_v48 = vld [vmem:[%s6129_s11 + $0x8c] sm:$0xf] }
 0x22d   : > { %4789 = vmatmul.bf16.vlgmr.msra.gmra.mxu0 %v5531_v34  ;;  %2539 = vst.msk [vmem:[#allocation2 + $0x28] sm:$0xf] %vm2533_vm11, %v2400_v2  ;;  %v3049_v34 = vld [vmem:[%s6129_s11 + $0x94] sm:$0xf]  ;;  %v2775_v51 = vrot.slane %v7565_v48, 5  ;;  %v2039_v15 = vshrl.u32 %v1869_v49, 16 }
 0x22e   : > { %5765 = vmatmul.msk.bf16.gmra.mxu1 %vm4708_vm10, %v5607_v0  ;;  %v2212_v10 = vor.u32 %v2211_v1, %v7375_v62  ;;  %v3666_v62 = vshll.u32 %v3338_v17, 16  ;;  %4345 = vst.msk [vmem:[#allocation2 + $0xac] sm:$0xf] %vm350_vm3, %v4197_v20  ;;  %v3662_v1 = vrot.slane %v3660_v26, 4 }
 0x22f   : > { %3862 = vrot.lane.b32.xlu1 %v3479_v47, %s6035_s27  ;;  %v2035_v47 = vshll.u32 %v1869_v49, 16  ;;  %v2776_v45 = vsel %vm6441_vm7, %v2774_v59, %v2775_v51 }
 0x230   : > { %3860 = vrot.lane.b32.xlu0 %v3469_v56, %s6035_s27  ;;  %v2213_v32 = vrot.slane %v2212_v10, 4  ;;  %v7553_v41 = vrot.slane %v3666_v62, 5  ;;  %v3676_v56 = vshll.u32 %v7562_v63, 16  ;;  %v2595_v10 = vld [vmem:[%s6129_s11 + $0x40] sm:$0xf]  ;;  %v3480_v62 = vshrl.u32 %v7458_v12, 16 }
 0x231   : > { %v3121_v36 = vpop.permute.xlu1 %3120  ;;  %3136 = vrot.lane.b32.xlu2 %v3029_v18, %s6033_s24  ;;  %v2037_v7 = vrot.slane %v2035_v47, 5 }
 0x232   : > { %3262 = vst.msk [vmem:[#allocation2 + $0x18] sm:$0xf] %vm3258_vm13, %v3121_v36  ;;  %v3119_v19 = vpop.permute.xlu0 %3118  ;;  %v2218_v44 = vsel %vm6139_vm2, %v2213_v32, %v7489_v46  ;;  %v3673_v50 = vor.u32 %v3672_v37, %v7553_v41  ;;  %v7573_v46 = vpop.f32.mrf.mxu1  ;;  %v7584_v17 = vrot.slane %v3676_v56, 5  ;;  %v2718_v32 = vrot.slane %v2595_v10, 5  ;;  %v7608_v37 = vld [vmem:[%s6129_s11 + $0x44] sm:$0xf] }
 0x233   : > { %3261 = vst.msk [vmem:[#allocation2 + $0x10] sm:$0xf] %vm3258_vm13, %v3119_v19  ;;  %v3123_v39 = vpop.permute.xlu2 %3122  ;;  %v3663_v19 = vor.u32 %v3662_v1, %v7440_v42  ;;  %v1889_v56 = vld [vmem:[%s6129_s11 + $0x90] sm:$0xf]  ;;  %v4058_v10 = vld [vmem:[%s6129_s11 + $0x7c] sm:$0xf] }
 0x234   : > { %3987 = vst.msk [vmem:[#allocation2 + $0x10] sm:$0xf] %vm3984_vm14, %v3845_v40  ;;  %v2031_v40 = vrot.slane %v2029_v38, 4  ;;  %v3674_v36 = vrot.slane %v3673_v50, 4  ;;  %v2717_v50 = vrot.slane %v2715_v53, 4  ;;  %v2235_v53 = vshll.u32 %v1889_v56, 16 }
 0x235   : > { %v5612_v0 = vld [vmem:[#allocation2 + $0xa8] sm:$0xf0]  ;;  %v3664_v26 = vrot.slane %v3663_v19, 4 }
 0x236   : > { %v2032_v28 = vor.u32 %v2031_v40, %v7417_v35  ;;  %v5615_v58 = vor.u32 %v5802_v54, %v5612_v0  ;;  %v4056_v35 = vld [vmem:[%s6129_s11 + $0x74] sm:$0xf]  ;;  %v3679_v12 = vsel %vm6139_vm2, %v3674_v36, %v7584_v17 }
 0x237   : > { %2885 = vrot.lane.b32.xlu1 %v2773_v57, %s6034_s25  ;;  %v4199_v11 = vrot.slane %v4056_v35, 5  ;;  %v3669_v54 = vsel %vm6139_vm2, %v3664_v26, %v7553_v41  ;;  %v2239_v41 = vshrl.u32 %v1889_v56, 16  ;;  %v3031_v56 = vld [vmem:[%s6129_s11 + $0x4c] sm:$0xf] }
 0x238   : > { %2451 = vrot.lane.b32.xlu0 %v2228_v13, %s6032_s17  ;;  %v2033_v4 = vrot.slane %v2032_v28, 4  ;;  %v2721_v28 = vrot.slane %v7608_v37, 5 }
 0x239   : > { %v2398_v5 = vpop.permute.xlu1 %2397  ;;  %2449 = vrot.lane.b32.xlu2 %v2218_v44, %s6032_s17  ;;  %v4200_v57 = vsel %vm6441_vm7, %v4198_v8, %v4199_v11  ;;  %v4201_v13 = vrot.slane %v4199_v11, 4  ;;  %v7614_v44 = vld [vmem:[%s6129_s11 + $0x44] sm:$0xf]  ;;  %v2229_v8 = vshrl.u32 %v7498_v6, 16  ;;  %v4204_v11 = vrot.slane %v4202_v9, 4 }
 0x23a   : > { %2538 = vst.msk [vmem:[#allocation2 + $0x20] sm:$0xf] %vm2533_vm11, %v2398_v5  ;;  %v3847_v55 = vpop.permute.xlu0 %3846  ;;  %v2038_v42 = vsel %vm6139_vm2, %v2033_v4, %v2037_v7  ;;  %v7602_v40 = vpop.f32.mrf.mxu1  ;;  %v2041_v5 = vrot.slane %v2039_v15, 4  ;;  %v2045_v1 = vshll.u32 %v7614_v44, 16  ;;  %v7652_v6 = vrot.slane %v2235_v53, 5 }
 0x23b   : > { %3988 = vst.msk [vmem:[#allocation2 + $0x18] sm:$0xf] %vm3984_vm14, %v3847_v55  ;;  %v3851_v2 = vpop.permute.xlu2 %3850  ;;  %v5538_v38 = vld [vmem:[#allocation2 + $0x10] sm:$0xf]  ;;  %v3482_v55 = vrot.slane %v3480_v62, 4 }
 0x23c   : > { %4346 = vst.msk [vmem:[#allocation2 + $0xb4] sm:$0xf] %vm350_vm3, %v4200_v57  ;;  %v2042_v59 = vor.u32 %v2041_v5, %v2037_v7 }
 0x23e   : > { %5766 = vmatmul.msk.bf16.gmra.mxu1 %vm4708_vm10, %v5615_v58  ;;  %v3483_v58 = vor.u32 %v3482_v55, %v7487_v43  ;;  %v2719_v43 = vsel %vm6441_vm7, %v2717_v50, %v2718_v32  ;;  %v2043_v7 = vrot.slane %v2042_v59, 4 }
 0x23f   : > { %3176 = vrot.lane.b32.xlu1 %v3049_v34, %s6033_s24  ;;  %v2720_v34 = vrot.slane %v2718_v32, 4 }
 0x240   : > { %3174 = vrot.lane.b32.xlu0 %v3048_v29, %s6033_s24  ;;  %v3320_v29 = vld [vmem:[%s6129_s11 + $0x4c] sm:$0xf] }
 0x241   : > { %v2836_v18 = vpop.permute.xlu1 %2835  ;;  %2887 = vrot.lane.b32.xlu2 %v2776_v45, %s6034_s25  ;;  %v3486_v35 = vshll.u32 %v3320_v29, 16  ;;  %v2722_v60 = vsel %vm6441_vm7, %v2720_v34, %v2721_v28  ;;  %v3484_v45 = vrot.slane %v3483_v58, 4 }
 0x242   : > { %2975 = vst.msk [vmem:[#allocation2 + $0x28] sm:$0xf] %vm2969_vm12, %v2836_v18  ;;  %v2834_v21 = vpop.permute.xlu0 %2833  ;;  %v5785_v20 = vld [vmem:[#allocation2 + $0x14] sm:$0xf0]  ;;  %v7637_v3 = vpop.f32.mrf.mxu1 }
 0x243   : > { %2974 = vst.msk [vmem:[#allocation2 + $0x20] sm:$0xf] %vm2969_vm12, %v2834_v21  ;;  %v5539_v22 = vor.u32 %v5785_v20, %v5538_v38  ;;  %v2838_v49 = vpop.permute.xlu2 %2837  ;;  %v5804_v4 = vld [vmem:[#allocation2 + $0xb4] sm:$0xf]  ;;  %v7646_v19 = vrot.slane %v3486_v35, 5  ;;  %v2241_v38 = vrot.slane %v2239_v41, 4 }
 0x244   : > { %3263 = vst.msk [vmem:[#allocation2 + $0x20] sm:$0xf] %vm3258_vm13, %v3123_v39  ;;  %v4203_v39 = vsel %vm6441_vm7, %v4201_v13, %v4202_v9  ;;  %v7649_v21 = vld [vmem:[%s6129_s11 + $0x80] sm:$0xf]  ;;  %v4205_v20 = vrot.slane %v4058_v10, 5 }
 0x245   : > { %4794 = vmatmul.bf16.gmra.mxu0 %v5539_v22  ;;  %4347 = vst.msk [vmem:[#allocation2 + $0xbc] sm:$0xf] %vm350_vm3, %v4203_v39  ;;  %v4208_v9 = vrot.slane %v7649_v21, 5  ;;  %v3490_v22 = vshrl.u32 %v3320_v29, 16  ;;  %v7657_v13 = vld [vmem:[%s6129_s11 + $0x94] sm:$0xf]  ;;  %v3489_v55 = vsel %vm6139_vm2, %v3484_v45, %v7646_v19  ;;  %v2242_v29 = vor.u32 %v2241_v38, %v7652_v6 }
 0x246   : > { %v4206_v26 = vsel %vm6441_vm7, %v4204_v11, %v4205_v20  ;;  %v4207_v5 = vrot.slane %v4205_v20, 4 }
 0x247   : > { %2413 = vrot.lane.b32.xlu1 %v2038_v42, %s6032_s17  ;;  %v2231_v42 = vrot.slane %v2229_v8, 4  ;;  %4348 = vst.msk [vmem:[#allocation2 + $0xc4] sm:$0xf] %vm350_vm3, %v4206_v26  ;;  %v2243_v58 = vrot.slane %v2242_v29, 4  ;;  %v7719_v26 = vld [vmem:[%s6129_s11 + $0x88] sm:$0xf] }
 0x248   : > { %3902 = vrot.lane.b32.xlu0 %v3679_v12, %s6035_s27  ;;  %v4214_v29 = vrot.slane %v7719_v26, 5 }
 0x249   : > { %v3849_v47 = vpop.permute.xlu1 %3848  ;;  %3900 = vrot.lane.b32.xlu2 %v3669_v54, %s6035_s27  ;;  %v4209_v54 = vsel %vm6441_vm7, %v4207_v5, %v4208_v9  ;;  %v2232_v59 = vor.u32 %v2231_v42, %v7528_v61  ;;  %v7692_v61 = vld [vmem:[%s6129_s11 + $0x90] sm:$0xf]  ;;  %v4210_v5 = vrot.slane %v4208_v9, 4  ;;  %v1871_v9 = vld [vmem:[%s6129_s11 + $0x48] sm:$0xf] }
 0x24a   : > { %3989 = vst.msk [vmem:[#allocation2 + $0x20] sm:$0xf] %vm3984_vm14, %v3849_v47  ;;  %v3125_v0 = vpop.permute.xlu0 %3124  ;;  %v2245_v47 = vshll.u32 %v7657_v13, 16  ;;  %v7673_v50 = vpop.f32.mrf.mxu1  ;;  %v2778_v11 = vrot.slane %v7692_v61, 5  ;;  %v3050_v61 = vld [vmem:[%s6129_s11 + $0x98] sm:$0xf] }
 0x24b   : > { %3264 = vst.msk [vmem:[#allocation2 + $0x28] sm:$0xf] %vm3258_vm13, %v3125_v0  ;;  %v3129_v36 = vpop.permute.xlu2 %3128  ;;  %v7683_v0 = vld [vmem:[%s6129_s11 + $0x50] sm:$0xf]  ;;  %v2233_v41 = vrot.slane %v2232_v59, 4 }
 0x24c   : > { %3990 = vst.msk [vmem:[#allocation2 + $0x28] sm:$0xf] %vm3984_vm14, %v3851_v2  ;;  %v7642_v2 = vrot.slane %v2045_v1, 5  ;;  %v5620_v15 = vld [vmem:[#allocation2 + $0xb8] sm:$0xf0]  ;;  %v7689_v35 = vrot.slane %v2245_v47, 5 }
 0x24d   : > { %v5623_v18 = vor.u32 %v5804_v4, %v5620_v15  ;;  %4349 = vst.msk [vmem:[#allocation2 + $0xcc] sm:$0xf] %vm350_vm3, %v4209_v54  ;;  %v3030_v4 = vld [vmem:[%s6129_s11 + $0x48] sm:$0xf]  ;;  %v3680_v15 = vshrl.u32 %v7562_v63, 16  ;;  %v2238_v20 = vsel %vm6139_vm2, %v2233_v41, %v7652_v6  ;;  %v2780_v6 = vrot.slane %v2778_v11, 4 }
 0x24e   : > { %v2048_v32 = vsel %vm6139_vm2, %v2043_v7, %v7642_v2  ;;  %v2248_v45 = vsel %vm6139_vm2, %v2243_v58, %v7689_v35  ;;  %v5806_v38 = vld [vmem:[#allocation2 + $0xc4] sm:$0xf]  ;;  %v2055_v41 = vshll.u32 %v1871_v9, 16 }
 0x24f   : > { %2851 = vrot.lane.b32.xlu1 %v2722_v60, %s6034_s25  ;;  %5767 = vmatmul.msk.bf16.gmra.mxu1 %vm4708_vm10, %v5623_v18  ;;  %v3340_v60 = vld [vmem:[%s6129_s11 + $0x9c] sm:$0xf]  ;;  %v4060_v63 = vld [vmem:[%s6129_s11 + $0x84] sm:$0xf]  ;;  %v3682_v59 = vrot.slane %v3680_v15, 4  ;;  %v2777_v15 = vrot.slane %v2775_v51, 4 }
 0x250   : > { %2849 = vrot.lane.b32.xlu0 %v2719_v43, %s6034_s25  ;;  %v3496_v43 = vshll.u32 %v7683_v0, 16  ;;  %v3686_v18 = vshll.u32 %v3340_v60, 16  ;;  %v3690_v10 = vshrl.u32 %v3340_v60, 16  ;;  %v4211_v42 = vrot.slane %v4060_v63, 5 }
 0x251   : > { %v2404_v57 = vpop.permute.xlu1 %2403  ;;  %v5546_v62 = vld [vmem:[#allocation2 + $0x20] sm:$0xf]  ;;  %2415 = vrot.lane.b32.xlu2 %v2048_v32, %s6032_s17  ;;  %v2779_v51 = vsel %vm6441_vm7, %v2777_v15, %v2778_v11  ;;  %v3322_v15 = vld [vmem:[%s6129_s11 + $0x54] sm:$0xf] }
 0x252   : > { %2541 = vst.msk [vmem:[#allocation2 + $0x38] sm:$0xf] %vm2533_vm11, %v2404_v57  ;;  %v2402_v12 = vpop.permute.xlu0 %2401 }
 0x253   : > { %2540 = vst.msk [vmem:[#allocation2 + $0x30] sm:$0xf] %vm2533_vm11, %v2402_v12  ;;  %v5787_v39 = vld [vmem:[#allocation2 + $0x24] sm:$0xf0]  ;;  %v2406_v1 = vpop.permute.xlu2 %2405 }
 0x254   : > { %2976 = vst.msk [vmem:[#allocation2 + $0x30] sm:$0xf] %vm2969_vm12, %v2838_v49  ;;  %v5547_v34 = vor.u32 %v5787_v39, %v5546_v62  ;;  %v3492_v49 = vrot.slane %v3490_v22, 4  ;;  %v7713_v62 = vrot.slane %v3496_v43, 5  ;;  %v5628_v22 = vld [vmem:[#allocation2 + $0xc8] sm:$0xf0] }
 0x255   : > { %2542 = vst.msk [vmem:[#allocation2 + $0x40] sm:$0xf] %vm2533_vm11, %v2406_v1  ;;  %v5631_v12 = vor.u32 %v5806_v38, %v5628_v22  ;;  %v4213_v39 = vrot.slane %v4211_v42, 4  ;;  %v7762_v38 = vrot.slane %v2055_v41, 5 }
 0x256   : > { %4799 = vmatmul.bf16.gmra.mxu0 %v5547_v34  ;;  %v3493_v8 = vor.u32 %v3492_v49, %v7646_v19  ;;  %v7707_v19 = vpop.f32.mrf.mxu1  ;;  %v3692_v34 = vrot.slane %v3690_v10, 4  ;;  %v4212_v49 = vsel %vm6441_vm7, %v4210_v5, %v4211_v42 }
 0x257   : > { %3864 = vrot.lane.b32.xlu1 %v3489_v55, %s6035_s27  ;;  %v7725_v55 = vrot.slane %v3686_v18, 5  ;;  %v4215_v58 = vsel %vm6441_vm7, %v4213_v39, %v4214_v29  ;;  %4350 = vst.msk [vmem:[#allocation2 + $0xd4] sm:$0xf] %vm350_vm3, %v4212_v49  ;;  %v4062_v49 = vld [vmem:[%s6129_s11 + $0x8c] sm:$0xf] }
 0x258   : > { %3140 = vrot.lane.b32.xlu0 %v3031_v56, %s6033_s24  ;;  %v3494_v57 = vrot.slane %v3493_v8, 4  ;;  %v7731_v56 = vld [vmem:[%s6129_s11 + $0xa0] sm:$0xf]  ;;  %4351 = vst.msk [vmem:[#allocation2 + $0xdc] sm:$0xf] %vm350_vm3, %v4215_v58  ;;  %v4216_v58 = vrot.slane %v4214_v29, 4 }
 0x259   : > { %v3127_v53 = vpop.permute.xlu1 %3126  ;;  %3138 = vrot.lane.b32.xlu2 %v3030_v4, %s6033_s24  ;;  %v3693_v60 = vor.u32 %v3692_v34, %v7725_v55  ;;  %v2059_v4 = vshrl.u32 %v1871_v9, 16 }
 0x25a   : > { %3265 = vst.msk [vmem:[#allocation2 + $0x30] sm:$0xf] %vm3258_vm13, %v3127_v53  ;;  %v2840_v7 = vpop.permute.xlu0 %2839  ;;  %v3499_v21 = vsel %vm6139_vm2, %v3494_v57, %v7713_v62  ;;  %v3696_v53 = vshll.u32 %v7731_v56, 16 }
 0x25b   : > { %2977 = vst.msk [vmem:[#allocation2 + $0x38] sm:$0xf] %vm2969_vm12, %v2840_v7  ;;  %v2844_v32 = vpop.permute.xlu2 %2843  ;;  %v3683_v7 = vor.u32 %v3682_v59, %v7584_v17  ;;  %v3694_v10 = vrot.slane %v3693_v60, 4  ;;  %v2061_v63 = vrot.slane %v2059_v4, 4 }
 0x25c   : > { %3266 = vst.msk [vmem:[#allocation2 + $0x38] sm:$0xf] %vm3258_vm13, %v3129_v36  ;;  %v7716_v36 = vld [vmem:[%s6129_s11 + $0x94] sm:$0xf] }
 0x25d   : > { %v2781_v54 = vrot.slane %v7716_v36, 5  ;;  %v3684_v48 = vrot.slane %v3683_v7, 4  ;;  %v2062_v11 = vor.u32 %v2061_v63, %v7762_v38  ;;  %v3051_v7 = vld [vmem:[%s6129_s11 + $0x9c] sm:$0xf] }
 0x25e   : > { %v7747_v8 = vpop.f32.mrf.mxu1  ;;  %v5808_v5 = vld [vmem:[#allocation2 + $0xd4] sm:$0xf] }
 0x25f   : > { %2455 = vrot.lane.b32.xlu1 %v2248_v45, %s6032_s17  ;;  %5768 = vmatmul.msk.bf16.gmra.mxu1 %vm4708_vm10, %v5631_v12  ;;  %v2782_v43 = vsel %vm6441_vm7, %v2780_v6, %v2781_v54  ;;  %v7760_v45 = vrot.slane %v3696_v53, 5  ;;  %v7769_v12 = vld [vmem:[%s6129_s11 + $0x4c] sm:$0xf]  ;;  %v5636_v6 = vld [vmem:[#allocation2 + $0xd8] sm:$0xf0]  ;;  %v3689_v34 = vsel %vm6139_vm2, %v3684_v48, %v7725_v55  ;;  %v2723_v55 = vrot.slane %v2721_v28, 4 }
 0x260   : > { %2453 = vrot.lane.b32.xlu0 %v2238_v20, %s6032_s17  ;;  %v2049_v20 = vshrl.u32 %v7614_v44, 16  ;;  %v2063_v53 = vrot.slane %v2062_v11, 4  ;;  %v1891_v11 = vld [vmem:[%s6129_s11 + $0x98] sm:$0xf] }
 0x261   : > { %v3855_v47 = vpop.permute.xlu1 %3854  ;;  %3866 = vrot.lane.b32.xlu2 %v3499_v21, %s6035_s27  ;;  %v3699_v44 = vsel %vm6139_vm2, %v3694_v10, %v7760_v45  ;;  %v5639_v21 = vor.u32 %v5808_v5, %v5636_v6  ;;  %v3500_v5 = vshrl.u32 %v7683_v0, 16  ;;  %v2255_v0 = vshll.u32 %v1891_v11, 16 }
 0x262   : > { %3992 = vst.msk [vmem:[#allocation2 + $0x38] sm:$0xf] %vm3984_vm14, %v3855_v47  ;;  %v3853_v1 = vpop.permute.xlu0 %3852  ;;  %v7784_v47 = vld [vmem:[%s6129_s11 + $0x48] sm:$0xf]  ;;  %v2051_v59 = vrot.slane %v2049_v20, 4  ;;  %v2249_v20 = vshrl.u32 %v7657_v13, 16 }
 0x263   : > { %3991 = vst.msk [vmem:[#allocation2 + $0x30] sm:$0xf] %vm3984_vm14, %v3853_v1  ;;  %v3857_v18 = vpop.permute.xlu2 %3856  ;;  %v7789_v1 = vld [vmem:[%s6129_s11 + $0x90] sm:$0xf]  ;;  %v2724_v60 = vrot.slane %v7784_v47, 5 }
 0x264   : > { %v4220_v41 = vrot.slane %v7789_v1, 5  ;;  %v2052_v29 = vor.u32 %v2051_v59, %v7642_v2  ;;  %v7835_v47 = vld [vmem:[%s6129_s11 + $0x58] sm:$0xf]  ;;  %v3033_v59 = vld [vmem:[%s6129_s11 + $0x54] sm:$0xf] }
 0x265   : > { %v2725_v2 = vsel %vm6441_vm7, %v2723_v55, %v2724_v60  ;;  %v2726_v55 = vrot.slane %v2724_v60, 4 }
 0x266   : > { %v7778_v39 = vpop.f32.mrf.mxu1 }
 0x267   : > { %3178 = vrot.lane.b32.xlu1 %v3050_v61, %s6033_s24  ;;  %v4217_v61 = vrot.slane %v4062_v49, 5 }
 0x268   : > { %2891 = vrot.lane.b32.xlu0 %v2782_v43, %s6034_s25 }
 0x269   : > { %v2842_v17 = vpop.permute.xlu1 %2841  ;;  %v5789_v57 = vld [vmem:[#allocation2 + $0x34] sm:$0xf0]  ;;  %2889 = vrot.lane.b32.xlu2 %v2779_v51, %s6034_s25  ;;  %v4219_v10 = vrot.slane %v4217_v61, 4  ;;  %v4218_v37 = vsel %vm6441_vm7, %v4216_v58, %v4217_v61  ;;  %v3516_v61 = vshll.u32 %v7835_v47, 16 }
 0x26a   : > { %2978 = vst.msk [vmem:[#allocation2 + $0x40] sm:$0xf] %vm2969_vm12, %v2842_v17  ;;  %v2408_v22 = vpop.permute.xlu0 %2407  ;;  %v5554_v42 = vld [vmem:[#allocation2 + $0x30] sm:$0xf]  ;;  %v3506_v17 = vshll.u32 %v3322_v15, 16 }
 0x26b   : > { %2543 = vst.msk [vmem:[#allocation2 + $0x48] sm:$0xf] %vm2533_vm11, %v2408_v22  ;;  %v5555_v26 = vor.u32 %v5789_v57, %v5554_v42  ;;  %v2448_v9 = vpop.permute.xlu2 %2447  ;;  %v4221_v28 = vsel %vm6441_vm7, %v4219_v10, %v4220_v41  ;;  %v3510_v57 = vshrl.u32 %v3322_v15, 16  ;;  %v2053_v22 = vrot.slane %v2052_v29, 4 }
 0x26c   : > { %2979 = vst.msk [vmem:[#allocation2 + $0x48] sm:$0xf] %vm2969_vm12, %v2844_v32  ;;  %v2065_v32 = vshll.u32 %v7769_v12, 16  ;;  %v7826_v42 = vrot.slane %v3506_v17, 5  ;;  %v2257_v10 = vrot.slane %v2255_v0, 5  ;;  %v7854_v60 = vrot.slane %v3516_v61, 5 }
 0x26d   : > { %4804 = vmatmul.bf16.gmra.mxu0 %v5555_v26  ;;  %2563 = vst.msk [vmem:[#allocation2 + $0xe8] sm:$0xf] %vm2533_vm11, %v2448_v9  ;;  %v3512_v26 = vrot.slane %v3510_v57, 4  ;;  %v2058_v6 = vsel %vm6139_vm2, %v2053_v22, %v7762_v38  ;;  %v3342_v61 = vld [vmem:[%s6129_s11 + $0xa4] sm:$0xf] }
 0x26e   : > { %v7799_v43 = vrot.slane %v2065_v32, 5  ;;  %v7817_v48 = vpop.f32.mrf.mxu1  ;;  %4352 = vst.msk [vmem:[#allocation2 + $0xe4] sm:$0xf] %vm350_vm3, %v4218_v37  ;;  %v7838_v32 = vld [vmem:[%s6129_s11 + $0x4c] sm:$0xf] }
 0x26f   : > { %3906 = vrot.lane.b32.xlu1 %v3699_v44, %s6035_s27  ;;  %5769 = vmatmul.msk.bf16.gmra.mxu1 %vm4708_vm10, %v5639_v21  ;;  %4353 = vst.msk [vmem:[#allocation2 + $0xec] sm:$0xf] %vm350_vm3, %v4221_v28  ;;  %v3032_v21 = vld [vmem:[%s6129_s11 + $0x50] sm:$0xf]  ;;  %v3513_v49 = vor.u32 %v3512_v26, %v7826_v42  ;;  %v2617_v37 = vld [vmem:[%s6129_s11 + $0x98] sm:$0xf] }
 0x270   : > { %3904 = vrot.lane.b32.xlu0 %v3689_v34, %s6035_s27  ;;  %v2068_v51 = vsel %vm6139_vm2, %v2063_v53, %v7799_v43  ;;  %v2727_v53 = vrot.slane %v7838_v32, 5  ;;  %v2784_v26 = vrot.slane %v2617_v37, 5 }
 0x271   : > { %v3133_v4 = vpop.permute.xlu1 %3132  ;;  %3180 = vrot.lane.b32.xlu2 %v3051_v7, %s6033_s24 }
 0x272   : > { %3268 = vst.msk [vmem:[#allocation2 + $0x48] sm:$0xf] %vm3258_vm13, %v3133_v4  ;;  %v3131_v63 = vpop.permute.xlu0 %3130  ;;  %v3502_v4 = vrot.slane %v3500_v5, 4  ;;  %v3700_v5 = vshrl.u32 %v7731_v56, 16 }
 0x273   : > { %3267 = vst.msk [vmem:[#allocation2 + $0x40] sm:$0xf] %vm3258_vm13, %v3131_v63  ;;  %v3171_v13 = vpop.permute.xlu2 %3170  ;;  %v2259_v63 = vshrl.u32 %v1891_v11, 16  ;;  %v7868_v11 = vld [vmem:[%s6129_s11 + $0x9c] sm:$0xf] }
 0x274   : > { %3993 = vst.msk [vmem:[#allocation2 + $0x40] sm:$0xf] %vm3984_vm14, %v3857_v18  ;;  %v2251_v18 = vrot.slane %v2249_v20, 4  ;;  %v3514_v20 = vrot.slane %v3513_v49, 4  ;;  %v3503_v17 = vor.u32 %v3502_v4, %v7713_v62  ;;  %v3702_v0 = vrot.slane %v3700_v5, 4 }
 0x275   : > { %v5810_v58 = vld [vmem:[#allocation2 + $0xe4] sm:$0xf]  ;;  %v2261_v56 = vrot.slane %v2259_v63, 4  ;;  %v1873_v4 = vld [vmem:[%s6129_s11 + $0x50] sm:$0xf]  ;;  %v3706_v63 = vshll.u32 %v3342_v61, 16 }
 0x276   : > { %v2252_v9 = vor.u32 %v2251_v18, %v7689_v35  ;;  %v7846_v38 = vpop.f32.mrf.mxu1  ;;  %v5644_v7 = vld [vmem:[#allocation2 + $0xe8] sm:$0xf0] }
 0x277   : > { %2853 = vrot.lane.b32.xlu1 %v2725_v2, %s6034_s25  ;;  %v5647_v29 = vor.u32 %v5810_v58, %v5644_v7  ;;  %v2728_v2 = vsel %vm6441_vm7, %v2726_v55, %v2727_v53  ;;  %v2783_v58 = vrot.slane %v2781_v54, 4  ;;  %v2262_v7 = vor.u32 %v2261_v56, %v2257_v10 }
 0x278   : > { %2419 = vrot.lane.b32.xlu0 %v2068_v51, %s6032_s17  ;;  %v2253_v35 = vrot.slane %v2252_v9, 4  ;;  %v2787_v9 = vrot.slane %v7868_v11, 5  ;;  %v3703_v54 = vor.u32 %v3702_v0, %v7760_v45 }
 0x279   : > { %v2446_v44 = vpop.permute.xlu1 %2445  ;;  %2417 = vrot.lane.b32.xlu2 %v2058_v6, %s6032_s17  ;;  %v3519_v6 = vsel %vm6139_vm2, %v3514_v20, %v7854_v60  ;;  %v2785_v20 = vsel %vm6441_vm7, %v2783_v58, %v2784_v26 }
 0x27a   : > { %2562 = vst.msk [vmem:[#allocation2 + $0xe0] sm:$0xf] %vm2533_vm11, %v2446_v44  ;;  %v3859_v34 = vpop.permute.xlu0 %3858  ;;  %v2258_v44 = vsel %vm6139_vm2, %v2253_v35, %v2257_v10  ;;  %v2079_v10 = vshrl.u32 %v1873_v4, 16  ;;  %v3704_v45 = vrot.slane %v3703_v54, 4 }
 0x27b   : > { %3994 = vst.msk [vmem:[#allocation2 + $0x48] sm:$0xf] %vm3984_vm14, %v3859_v34  ;;  %v3899_v15 = vpop.permute.xlu2 %3898  ;;  %v5562_v51 = vld [vmem:[#allocation2 + $0x40] sm:$0xf]  ;;  %v3504_v34 = vrot.slane %v3503_v17, 4 }
 0x27d   : > { %v3509_v55 = vsel %vm6139_vm2, %v3504_v34, %v7826_v42  ;;  %v2075_v42 = vshll.u32 %v1873_v4, 16 }
 0x27e   : > { %v7871_v62 = vpop.f32.mrf.mxu1 }
 0x27f   : > { %3144 = vrot.lane.b32.xlu1 %v3033_v59, %s6033_s24  ;;  %5770 = vmatmul.msk.bf16.gmra.mxu1 %vm4708_vm10, %v5647_v29 }
 0x280   : > { %3142 = vrot.lane.b32.xlu0 %v3032_v21, %s6033_s24  ;;  %v2786_v21 = vrot.slane %v2784_v26, 4 }
 0x281   : > { %v2884_v28 = vpop.permute.xlu1 %2883  ;;  %2855 = vrot.lane.b32.xlu2 %v2728_v2, %s6034_s25  ;;  %v2263_v2 = vrot.slane %v2262_v7, 4 }
 0x282   : > { %2999 = vst.msk [vmem:[#allocation2 + $0xe8] sm:$0xf] %vm2969_vm12, %v2884_v28  ;;  %v2882_v57 = vpop.permute.xlu0 %2881  ;;  %v5791_v22 = vld [vmem:[#allocation2 + $0x44] sm:$0xf0]  ;;  %v2788_v36 = vsel %vm6441_vm7, %v2786_v21, %v2787_v9  ;;  %v2069_v28 = vshrl.u32 %v7769_v12, 16 }
 0x283   : > { %2998 = vst.msk [vmem:[#allocation2 + $0xe0] sm:$0xf] %vm2969_vm12, %v2882_v57  ;;  %v5563_v18 = vor.u32 %v5791_v22, %v5562_v51  ;;  %v2846_v59 = vpop.permute.xlu2 %2845  ;;  %v2077_v51 = vrot.slane %v2075_v42, 5  ;;  %v2081_v22 = vrot.slane %v2079_v10, 4  ;;  %v7909_v12 = vld [vmem:[%s6129_s11 + $0x54] sm:$0xf] }
 0x284   : > { %3287 = vst.msk [vmem:[#allocation2 + $0xe0] sm:$0xf] %vm3258_vm13, %v3171_v13  ;;  %v7877_v13 = vld [vmem:[%s6129_s11 + $0x9c] sm:$0xf]  ;;  %v2085_v58 = vshll.u32 %v7909_v12, 16  ;;  %v2089_v11 = vshrl.u32 %v7909_v12, 16 }
 0x285   : > { %4809 = vmatmul.bf16.gmra.mxu0 %v5563_v18  ;;  %v2265_v29 = vshll.u32 %v7877_v13, 16  ;;  %v3052_v42 = vld [vmem:[%s6129_s11 + $0xa0] sm:$0xf] }
 0x286   : > { %v7899_v37 = vpop.f32.mrf.mxu1 }
 0x287   : > { %2457 = vrot.lane.b32.xlu1 %v2258_v44, %s6032_s17  ;;  %v7904_v17 = vrot.slane %v2265_v29, 5  ;;  %v3710_v44 = vshrl.u32 %v3342_v61, 16  ;;  %v7926_v29 = vld [vmem:[%s6129_s11 + $0xa8] sm:$0xf] }
 0x288   : > { %3870 = vrot.lane.b32.xlu0 %v3519_v6, %s6035_s27  ;;  %v2071_v6 = vrot.slane %v2069_v28, 4  ;;  %v3716_v28 = vshll.u32 %v7926_v29, 16 }
 0x289   : > { %v3897_v49 = vpop.permute.xlu1 %3896  ;;  %3868 = vrot.lane.b32.xlu2 %v3509_v55, %s6035_s27  ;;  %v2268_v26 = vsel %vm6139_vm2, %v2263_v2, %v7904_v17  ;;  %v3053_v55 = vld [vmem:[%s6129_s11 + $0xa4] sm:$0xf]  ;;  %v3712_v7 = vrot.slane %v3710_v44, 4  ;;  %v7938_v2 = vld [vmem:[%s6129_s11 + $0x50] sm:$0xf] }
 0x28a   : > { %4013 = vst.msk [vmem:[#allocation2 + $0xe0] sm:$0xf] %vm3984_vm14, %v3897_v49  ;;  %v3173_v35 = vpop.permute.xlu0 %3172  ;;  %v2082_v49 = vor.u32 %v2081_v22, %v2077_v51  ;;  %v2072_v4 = vor.u32 %v2071_v6, %v7799_v43  ;;  %v3324_v43 = vld [vmem:[%s6129_s11 + $0x5c] sm:$0xf]  ;;  %v4064_v22 = vld [vmem:[%s6129_s11 + $0x94] sm:$0xf] }
 0x28b   : > { %3288 = vst.msk [vmem:[#allocation2 + $0xe8] sm:$0xf] %vm3258_vm13, %v3173_v35  ;;  %v3137_v57 = vpop.permute.xlu2 %3136  ;;  %v4223_v44 = vrot.slane %v4064_v22, 5 }
 0x28c   : > { %4014 = vst.msk [vmem:[#allocation2 + $0xe8] sm:$0xf] %vm3984_vm14, %v3899_v15  ;;  %v3708_v15 = vrot.slane %v3706_v63, 5  ;;  %v2083_v35 = vrot.slane %v2082_v49, 4  ;;  %v2073_v63 = vrot.slane %v2072_v4, 4  ;;  %v4222_v49 = vrot.slane %v4220_v41, 4 }
 0x28d   : > { %v7972_v41 = vld [vmem:[%s6129_s11 + $0x60] sm:$0xf] }
 0x28e   : > { %v3709_v0 = vsel %vm6139_vm2, %v3704_v45, %v3708_v15  ;;  %v7921_v61 = vpop.f32.mrf.mxu1  ;;  %v3713_v10 = vor.u32 %v3712_v7, %v3708_v15  ;;  %v3520_v45 = vshrl.u32 %v7835_v47, 16  ;;  %v2078_v6 = vsel %vm6139_vm2, %v2073_v63, %v2077_v51 }
 0x28f   : > { %2895 = vrot.lane.b32.xlu1 %v2788_v36, %s6034_s25  ;;  %v7931_v36 = vrot.slane %v2085_v58, 5  ;;  %v4225_v58 = vrot.slane %v4223_v44, 4 }
 0x290   : > { %2893 = vrot.lane.b32.xlu0 %v2785_v20, %s6034_s25  ;;  %v3714_v47 = vrot.slane %v3713_v10, 4  ;;  %v3522_v7 = vrot.slane %v3520_v45, 4  ;;  %v1893_v10 = vld [vmem:[%s6129_s11 + $0xa0] sm:$0xf] }
 0x291   : > { %v2412_v18 = vpop.permute.xlu1 %2411  ;;  %v5642_v5 = vld [vmem:[#allocation2 + $0xe0] sm:$0xf]  ;;  %2459 = vrot.lane.b32.xlu2 %v2268_v26, %s6032_s17  ;;  %v2088_v15 = vsel %vm6139_vm2, %v2083_v35, %v7931_v36  ;;  %v2730_v26 = vrot.slane %v7938_v2, 5  ;;  %v3536_v2 = vshll.u32 %v7972_v41, 16 }
 0x292   : > { %2545 = vst.msk [vmem:[#allocation2 + $0x58] sm:$0xf] %vm2533_vm11, %v2412_v18  ;;  %v2410_v34 = vpop.permute.xlu0 %2409  ;;  %v3526_v18 = vshll.u32 %v3324_v43, 16  ;;  %v3523_v45 = vor.u32 %v3522_v7, %v7854_v60  ;;  %v2269_v60 = vshrl.u32 %v7877_v13, 16 }
 0x293   : > { %2544 = vst.msk [vmem:[#allocation2 + $0x50] sm:$0xf] %vm2533_vm11, %v2410_v34  ;;  %v5811_v56 = vld [vmem:[#allocation2 + $0xe4] sm:$0xf0]  ;;  %v7951_v34 = vrot.slane %v3716_v28, 5 }
 0x294   : > { %2980 = vst.msk [vmem:[#allocation2 + $0x50] sm:$0xf] %vm2969_vm12, %v2846_v59  ;;  %v5643_v21 = vor.u32 %v5811_v56, %v5642_v5  ;;  %v2450_v59 = vpop.permute.xlu2 %2449  ;;  %v3530_v5 = vshrl.u32 %v3324_v43, 16  ;;  %v7966_v51 = vrot.slane %v3526_v18, 5  ;;  %v3034_v28 = vld [vmem:[%s6129_s11 + $0x58] sm:$0xf] }
 0x295   : > { %2564 = vst.msk [vmem:[#allocation2 + $0xf0] sm:$0xf] %vm2533_vm11, %v2450_v59  ;;  %v4224_v59 = vsel %vm6441_vm7, %v4222_v49, %v4223_v44  ;;  %v3719_v63 = vsel %vm6139_vm2, %v3714_v47, %v7951_v34  ;;  %v2279_v18 = vshrl.u32 %v1893_v10, 16  ;;  %v8003_v49 = vrot.slane %v3536_v2, 5 }
 0x296   : > { %4859 = vmatmul.bf16.vlgmr.msra.gmra.mxu2 %v5643_v21  ;;  %v7959_v21 = vld [vmem:[%s6129_s11 + $0x54] sm:$0xf]  ;;  %v3532_v4 = vrot.slane %v3530_v5, 4  ;;  %4354 = vst.msk [vmem:[#allocation2 + $0xf4] sm:$0xf] %vm350_vm3, %v4224_v59  ;;  %v2729_v5 = vrot.slane %v2727_v53, 4 }
 0x297   : > { %3908 = vrot.lane.b32.xlu1 %v3709_v0, %s6035_s27  ;;  %v2733_v1 = vrot.slane %v7959_v21, 5  ;;  %v2281_v32 = vrot.slane %v2279_v18, 4 }
 0x298   : > { %3184 = vrot.lane.b32.xlu0 %v3053_v55, %s6033_s24  ;;  %v2731_v53 = vsel %vm6441_vm7, %v2729_v5, %v2730_v26 }
 0x299   : > { %v3135_v54 = vpop.permute.xlu1 %3134  ;;  %3182 = vrot.lane.b32.xlu2 %v3052_v42, %s6033_s24 }
 0x29a   : > { %3269 = vst.msk [vmem:[#allocation2 + $0x50] sm:$0xf] %vm3258_vm13, %v3135_v54  ;;  %v2848_v20 = vpop.permute.xlu0 %2847  ;;  %v2732_v54 = vrot.slane %v2730_v26, 4 }
 0x29b   : > { %2981 = vst.msk [vmem:[#allocation2 + $0x58] sm:$0xf] %vm2969_vm12, %v2848_v20  ;;  %v7953_v56 = vpop.f32.mrf.mxu1  ;;  %v3533_v20 = vor.u32 %v3532_v4, %v7966_v51 }
 0x29c   : > { %3270 = vst.msk [vmem:[#allocation2 + $0x58] sm:$0xf] %vm3258_vm13, %v3137_v57  ;;  %v7956_v57 = vld [vmem:[%s6129_s11 + $0x98] sm:$0xf]  ;;  %v2888_v0 = vpop.permute.xlu2 %2887  ;;  %v2734_v22 = vsel %vm6441_vm7, %v2732_v54, %v2733_v1 }
 0x29d   : > { %v4226_v55 = vrot.slane %v7956_v57, 5  ;;  %v3534_v47 = vrot.slane %v3533_v20, 4 }
 0x29f   : > { %2423 = vrot.lane.b32.xlu1 %v2088_v15, %s6032_s17  ;;  %v4227_v42 = vsel %vm6441_vm7, %v4225_v58, %v4226_v55  ;;  %v2275_v15 = vshll.u32 %v1893_v10, 16  ;;  %v3524_v58 = vrot.slane %v3523_v45, 4  ;;  %v3539_v26 = vsel %vm6139_vm2, %v3534_v47, %v8003_v49  ;;  %v2619_v45 = vld [vmem:[%s6129_s11 + $0xa0] sm:$0xf] }
 0x2a0   : > { %2421 = vrot.lane.b32.xlu0 %v2078_v6, %s6032_s17  ;;  %4355 = vst.msk [vmem:[#allocation2 + $0xfc] sm:$0xf] %vm350_vm3, %v4227_v42  ;;  %v8011_v42 = vld [vmem:[%s6129_s11 + $0xa4] sm:$0xf]  ;;  %v2790_v5 = vrot.slane %v2619_v45, 5 }
 0x2a1   : > { %v3863_v35 = vpop.permute.xlu1 %3862  ;;  %3910 = vrot.lane.b32.xlu2 %v3719_v63, %s6035_s27  ;;  %v8005_v59 = vrot.slane %v2275_v15, 5  ;;  %v2271_v15 = vrot.slane %v2269_v60, 4  ;;  %v3035_v60 = vld [vmem:[%s6129_s11 + $0x5c] sm:$0xf] }
 0x2a2   : > { %3996 = vst.msk [vmem:[#allocation2 + $0x58] sm:$0xf] %vm3984_vm14, %v3863_v35  ;;  %v3861_v43 = vpop.permute.xlu0 %3860  ;;  %v5812_v35 = vld [vmem:[#allocation2 + $0xf4] sm:$0xf] }
 0x2a3   : > { %3995 = vst.msk [vmem:[#allocation2 + $0x50] sm:$0xf] %vm3984_vm14, %v3861_v43  ;;  %v7998_v6 = vpop.f32.mrf.mxu1 }
 0x2a4   : > { %v3901_v44 = vpop.permute.xlu2 %3900 }
 0x2a7   : > { %3146 = vrot.lane.b32.xlu1 %v3034_v28, %s6033_s24  ;;  %v5652_v28 = vld [vmem:[#allocation2 + $0xf8] sm:$0xf0] }
 0x2a8   : > { %2859 = vrot.lane.b32.xlu0 %v2734_v22, %s6034_s25  ;;  %v5655_v20 = vor.u32 %v5812_v35, %v5652_v28  ;;  %v2285_v22 = vshll.u32 %v8011_v42, 16 }
 0x2a9   : > { %v2886_v4 = vpop.permute.xlu1 %2885  ;;  %v5793_v7 = vld [vmem:[#allocation2 + $0x54] sm:$0xf0]  ;;  %2857 = vrot.lane.b32.xlu2 %v2731_v53, %s6034_s25  ;;  %v2272_v53 = vor.u32 %v2271_v15, %v7904_v17 }
 0x2aa   : > { %3000 = vst.msk [vmem:[#allocation2 + $0xf0] sm:$0xf] %vm2969_vm12, %v2886_v4  ;;  %v2452_v13 = vpop.permute.xlu0 %2451  ;;  %v4790_v54 = vpop.f32.mrf.mxu0  ;;  %v5570_v63 = vld [vmem:[#allocation2 + $0x50] sm:$0xf]  ;;  %5771 = vmatmul.msk.bf16.gmra.mxu1 %vm4708_vm10, %v5655_v20  ;;  %v8043_v4 = vrot.slane %v2285_v22, 5 }
 0x2ab   : > { %2565 = vst.msk [vmem:[#allocation2 + $0xf8] sm:$0xf] %vm2533_vm11, %v2452_v13  ;;  %v8015_v43 = vadd.f32 %v7434_v52, %v4790_v54  ;;  %v5571_v10 = vor.u32 %v5793_v7, %v5570_v63  ;;  %v3529_v52 = vsel %vm6139_vm2, %v3524_v58, %v7966_v51  ;;  %v2789_v51 = vrot.slane %v2787_v9, 4  ;;  %v3344_v7 = vld [vmem:[%s6129_s11 + $0xac] sm:$0xf] }
 0x2ac   : > { %3001 = vst.msk [vmem:[#allocation2 + $0xf8] sm:$0xf] %vm2969_vm12, %v2888_v0  ;;  %v2282_v0 = vor.u32 %v2281_v32, %v8005_v59  ;;  %v2416_v18 = vpop.permute.xlu2 %2415  ;;  %v8047_v32 = vpop.f32.mrf.mxu1  ;;  %v3726_v17 = vshll.u32 %v3344_v7, 16  ;;  %v3730_v63 = vshrl.u32 %v3344_v7, 16 }
 0x2ad   : > { %v5215_v2 = vpack.c.bf16 %v8015_v43, %v8015_v43  ;;  %4814 = vmatmul.bf16.gmra.mxu0 %v5571_v10  ;;  %2547 = vst.msk [vmem:[#allocation2 + $0x68] sm:$0xf] %vm2533_vm11, %v2416_v18  ;;  %v2791_v54 = vsel %vm6441_vm7, %v2789_v51, %v2790_v5  ;;  %v8081_v18 = vld [vmem:[%s6129_s11 + $0xa4] sm:$0xf] }
 0x2ae   : > { %v2283_v58 = vrot.slane %v2282_v0, 4  ;;  %v3732_v20 = vrot.slane %v3730_v63, 4  ;;  %v8074_v0 = vld [vmem:[%s6129_s11 + $0xb0] sm:$0xf] }
 0x2af   : > { %5264 = vst.msk [vmem:[%s8020_s9] sm:$0xf] %vm5263_vm15, %v5215_v2  ;;  %3874 = vrot.lane.b32.xlu1 %v3539_v26, %s6035_s27  ;;  %v1875_v26 = vld [vmem:[%s6129_s11 + $0x58] sm:$0xf]  ;;  %v3720_v2 = vshrl.u32 %v7926_v29, 16 }
 0x2b0   : > { %3872 = vrot.lane.b32.xlu0 %v3529_v52, %s6035_s27  ;;  %v2288_v12 = vsel %vm6139_vm2, %v2283_v58, %v8043_v4  ;;  %v8070_v52 = vrot.slane %v3726_v17, 5  ;;  %v3055_v58 = vld [vmem:[%s6129_s11 + $0xac] sm:$0xf] }
 0x2b1   : > { %v3177_v47 = vpop.permute.xlu1 %3176  ;;  %3148 = vrot.lane.b32.xlu2 %v3035_v60, %s6033_s24  ;;  %v3054_v60 = vld [vmem:[%s6129_s11 + $0xa8] sm:$0xf] }
 0x2b2   : > { %3290 = vst.msk [vmem:[#allocation2 + $0xf8] sm:$0xf] %vm3258_vm13, %v3177_v47  ;;  %v3175_v35 = vpop.permute.xlu0 %3174  ;;  %v4792_v13 = vpop.f32.mrf.mxu0  ;;  %v2095_v47 = vshll.u32 %v1875_v26, 16  ;;  %v3733_v7 = vor.u32 %v3732_v20, %v8070_v52 }
 0x2b3   : > { %3289 = vst.msk [vmem:[#allocation2 + $0xf0] sm:$0xf] %vm3258_vm13, %v3175_v35  ;;  %v8054_v9 = vadd.f32 %v7474_v25, %v4792_v13  ;;  %v2273_v25 = vrot.slane %v2272_v53, 4  ;;  %v2792_v53 = vrot.slane %v2790_v5, 4  ;;  %v2793_v35 = vrot.slane %v8081_v18, 5 }
 0x2b4   : > { %4015 = vst.msk [vmem:[#allocation2 + $0xf0] sm:$0xf] %vm3984_vm14, %v3901_v44  ;;  %v3139_v28 = vpop.permute.xlu2 %3138  ;;  %v2091_v44 = vrot.slane %v2089_v11, 4  ;;  %v8085_v29 = vpop.f32.mrf.mxu1  ;;  %v3722_v13 = vrot.slane %v3720_v2, 4  ;;  %v4066_v11 = vld [vmem:[%s6129_s11 + $0x9c] sm:$0xf] }
 0x2b5   : > { %v5216_v10 = vpack.c.bf16 %v8054_v9, %v8054_v9  ;;  %v2278_v22 = vsel %vm6139_vm2, %v2273_v25, %v8005_v59  ;;  %v3736_v59 = vshll.u32 %v8074_v0, 16  ;;  %v8097_v63 = vrot.slane %v2095_v47, 5 }
 0x2b6   : > { %v2092_v51 = vor.u32 %v2091_v44, %v7931_v36  ;;  %v4229_v36 = vrot.slane %v4066_v11, 5  ;;  %v4228_v5 = vrot.slane %v4226_v55, 4  ;;  %v2099_v2 = vshrl.u32 %v1875_v26, 16  ;;  %v8137_v11 = vld [vmem:[%s6129_s11 + $0x5c] sm:$0xf] }
 0x2b7   : > { %5265 = vst.msk [vmem:[%s8020_s9 + $0x4] sm:$0xf] %vm5263_vm15, %v5216_v10  ;;  %2897 = vrot.lane.b32.xlu1 %v2791_v54, %s6034_s25  ;;  %v8100_v10 = vld [vmem:[%s6129_s11 + $0xa0] sm:$0xf]  ;;  %v8103_v25 = vrot.slane %v3736_v59, 5 }
 0x2b8   : > { %2463 = vrot.lane.b32.xlu0 %v2288_v12, %s6032_s17  ;;  %v2093_v17 = vrot.slane %v2092_v51, 4  ;;  %v3734_v12 = vrot.slane %v3733_v7, 4  ;;  %v4231_v44 = vrot.slane %v4229_v36, 4  ;;  %v4232_v51 = vrot.slane %v8100_v10, 5 }
 0x2b9   : > { %v2414_v45 = vpop.permute.xlu1 %2413  ;;  %2461 = vrot.lane.b32.xlu2 %v2278_v22, %s6032_s17  ;;  %v2794_v22 = vsel %vm6441_vm7, %v2792_v53, %v2793_v35  ;;  %v4230_v26 = vsel %vm6441_vm7, %v4228_v5, %v4229_v36  ;;  %v2101_v5 = vrot.slane %v2099_v2, 4  ;;  %v2735_v2 = vrot.slane %v2733_v1, 4 }
 0x2ba   : > { %2546 = vst.msk [vmem:[#allocation2 + $0x60] sm:$0xf] %vm2533_vm11, %v2414_v45  ;;  %v3903_v15 = vpop.permute.xlu0 %3902  ;;  %v2601_v45 = vld [vmem:[%s6129_s11 + $0x58] sm:$0xf]  ;;  %v4233_v59 = vsel %vm6441_vm7, %v4231_v44, %v4232_v51  ;;  %v2098_v53 = vsel %vm6139_vm2, %v2093_v17, %v8097_v63  ;;  %v8143_v44 = vld [vmem:[%s6129_s11 + $0x5c] sm:$0xf] }
 0x2bb   : > { %4016 = vst.msk [vmem:[#allocation2 + $0xf8] sm:$0xf] %vm3984_vm14, %v3903_v15  ;;  %v3723_v15 = vor.u32 %v3722_v13, %v7951_v34  ;;  %v5650_v57 = vld [vmem:[#allocation2 + $0xf0] sm:$0xf]  ;;  %v3739_v13 = vsel %vm6139_vm2, %v3734_v12, %v8103_v25 }
 0x2bc   : > { %v8094_v54 = vpop.permute.xlu2 %3866  ;;  %v8139_v36 = vpop.f32.mrf.mxu1  ;;  %4356 = vst.msk [vmem:[#allocation2 + $0x104] sm:$0xf] %vm350_vm3, %v4230_v26 }
 0x2bd   : > { %4357 = vst.msk [vmem:[#allocation2 + $0x10c] sm:$0xf] %vm350_vm3, %v4233_v59 }
 0x2bf   : > { %3188 = vrot.lane.b32.xlu1 %v3055_v58, %s6033_s24 }
 0x2c0   : > { %3186 = vrot.lane.b32.xlu0 %v3054_v60, %s6033_s24  ;;  %v3540_v60 = vshrl.u32 %v7972_v41, 16  ;;  %v2736_v41 = vrot.slane %v2601_v45, 5  ;;  %v9423_v45 = vrot.slane %v8137_v11, 5 }
 0x2c1   : > { %v2852_v20 = vpop.permute.xlu1 %2851  ;;  %2899 = vrot.lane.b32.xlu2 %v2794_v22, %s6034_s25  ;;  %v3326_v22 = vld [vmem:[%s6129_s11 + $0x64] sm:$0xf] }
 0x2c2   : > { %2983 = vst.msk [vmem:[#allocation2 + $0x68] sm:$0xf] %vm2969_vm12, %v2852_v20  ;;  %v2850_v47 = vpop.permute.xlu0 %2849  ;;  %v4795_v58 = vpop.f32.mrf.mxu0  ;;  %v5813_v55 = vld [vmem:[#allocation2 + $0xf4] sm:$0xf0]  ;;  %v3542_v20 = vrot.slane %v3540_v60, 4  ;;  %v2738_v12 = vrot.slane %v2736_v41, 4 }
 0x2c3   : > { %2982 = vst.msk [vmem:[#allocation2 + $0x60] sm:$0xf] %vm2969_vm12, %v2850_v47  ;;  %v8120_v7 = vadd.f32 %v7507_v33, %v4795_v58  ;;  %v5651_v34 = vor.u32 %v5813_v55, %v5650_v57  ;;  %v1895_v58 = vld [vmem:[%s6129_s11 + $0xa8] sm:$0xf]  ;;  %v2102_v57 = vor.u32 %v2101_v5, %v8097_v63  ;;  %v2105_v55 = vshll.u32 %v8143_v44, 16 }
 0x2c4   : > { %3271 = vst.msk [vmem:[#allocation2 + $0x60] sm:$0xf] %vm3258_vm13, %v3139_v28  ;;  %v3724_v28 = vrot.slane %v3723_v15, 4  ;;  %v2890_v17 = vpop.permute.xlu2 %2889  ;;  %v3543_v1 = vor.u32 %v3542_v20, %v8003_v49  ;;  %v2740_v63 = vsel %vm6441_vm7, %v2738_v12, %v9423_v45  ;;  %v2299_v59 = vshrl.u32 %v1895_v58, 16  ;;  %v8291_v45 = vld [vmem:[%s6129_s11 + $0x64] sm:$0xf] }
 0x2c5   : > { %v5217_v33 = vpack.c.bf16 %v8120_v7, %v8120_v7  ;;  %4864 = vmatmul.bf16.gmra.mxu2 %v5651_v34  ;;  %v2289_v34 = vshrl.u32 %v8011_v42, 16  ;;  %v2295_v42 = vshll.u32 %v1895_v58, 16  ;;  %v2737_v49 = vsel %vm6441_vm7, %v2735_v2, %v2736_v41 }
 0x2c6   : > { %v3729_v47 = vsel %vm6139_vm2, %v3724_v28, %v8070_v52  ;;  %v3546_v52 = vshll.u32 %v3326_v22, 16  ;;  %v3544_v20 = vrot.slane %v3543_v1, 4  ;;  %v2301_v41 = vrot.slane %v2299_v59, 4 }
 0x2c7   : > { %5266 = vst.msk [vmem:[%s8020_s9 + $0x8] sm:$0xf] %vm5263_vm15, %v5217_v33  ;;  %2425 = vrot.lane.b32.xlu1 %v2098_v53, %s6032_s17  ;;  %v5814_v53 = vld [vmem:[#allocation2 + $0x104] sm:$0xf]  ;;  %v2103_v33 = vrot.slane %v2102_v57, 4  ;;  %v3550_v57 = vshrl.u32 %v3326_v22, 16 }
 0x2c8   : > { %3914 = vrot.lane.b32.xlu0 %v3739_v13, %s6035_s27  ;;  %v8178_v13 = vrot.slane %v2105_v55, 5  ;;  %v3548_v12 = vrot.slane %v3546_v52, 5  ;;  %v8190_v55 = vld [vmem:[%s6129_s11 + $0xac] sm:$0xf] }
 0x2c9   : > { %v3865_v15 = vpop.permute.xlu1 %3864  ;;  %3912 = vrot.lane.b32.xlu2 %v3729_v47, %s6035_s27  ;;  %v8186_v47 = vrot.slane %v2295_v42, 5 }
 0x2ca   : > { %3997 = vst.msk [vmem:[#allocation2 + $0x60] sm:$0xf] %vm3984_vm14, %v3865_v15  ;;  %v3141_v26 = vpop.permute.xlu0 %3140  ;;  %v4797_v60 = vpop.f32.mrf.mxu0  ;;  %v3549_v42 = vsel %vm6139_vm2, %v3544_v20, %v3548_v12 }
 0x2cb   : > { %3272 = vst.msk [vmem:[#allocation2 + $0x68] sm:$0xf] %vm3258_vm13, %v3141_v26  ;;  %v8164_v21 = vadd.f32 %v7544_v27, %v4797_v60  ;;  %v8183_v15 = vpop.f32.mrf.mxu1  ;;  %v2291_v26 = vrot.slane %v2289_v34, 4  ;;  %v2108_v60 = vsel %vm6139_vm2, %v2103_v33, %v8178_v13  ;;  %v2302_v59 = vor.u32 %v2301_v41, %v8186_v47 }
 0x2cc   : > { %3998 = vst.msk [vmem:[#allocation2 + $0x68] sm:$0xf] %vm3984_vm14, %v8094_v54  ;;  %v5660_v54 = vld [vmem:[#allocation2 + $0x108] sm:$0xf0]  ;;  %v3181_v28 = vpop.permute.xlu2 %3180  ;;  %v3552_v33 = vrot.slane %v3550_v57, 4 }
 0x2cd   : > { %v5218_v27 = vpack.c.bf16 %v8164_v21, %v8164_v21  ;;  %v5663_v5 = vor.u32 %v5814_v53, %v5660_v54  ;;  %v2305_v53 = vshll.u32 %v8190_v55, 16  ;;  %v8211_v54 = vld [vmem:[%s6129_s11 + $0x68] sm:$0xf] }
 0x2cf   : > { %5267 = vst.msk [vmem:[%s8020_s9 + $0xc] sm:$0xf] %vm5263_vm15, %v5218_v27  ;;  %2863 = vrot.lane.b32.xlu1 %v2740_v63, %s6034_s25  ;;  %5772 = vmatmul.msk.bf16.vlgmr.msra.gmra.mxu3 %vm4708_vm10, %v5663_v5  ;;  %v3037_v27 = vld [vmem:[%s6129_s11 + $0x64] sm:$0xf]  ;;  %v2303_v5 = vrot.slane %v2302_v59, 4  ;;  %v8218_v20 = vrot.slane %v2305_v53, 5 }
 0x2d0   : > { %2861 = vrot.lane.b32.xlu0 %v2737_v49, %s6034_s25  ;;  %v2292_v49 = vor.u32 %v2291_v26, %v8043_v4  ;;  %v3346_v4 = vld [vmem:[%s6129_s11 + $0xb4] sm:$0xf]  ;;  %v3036_v26 = vld [vmem:[%s6129_s11 + $0x60] sm:$0xf] }
 0x2d1   : > { %v2456_v2 = vpop.permute.xlu1 %2455  ;;  %v5578_v58 = vld [vmem:[#allocation2 + $0x60] sm:$0xf]  ;;  %2427 = vrot.lane.b32.xlu2 %v2108_v60, %s6032_s17  ;;  %v3553_v60 = vor.u32 %v3552_v33, %v3548_v12  ;;  %v2308_v12 = vsel %vm6139_vm2, %v2303_v5, %v8218_v20 }
 0x2d2   : > { %2567 = vst.msk [vmem:[#allocation2 + $0x108] sm:$0xf] %vm2533_vm11, %v2456_v2  ;;  %v2454_v1 = vpop.permute.xlu0 %2453  ;;  %v2293_v2 = vrot.slane %v2292_v49, 4 }
 0x2d3   : > { %2566 = vst.msk [vmem:[#allocation2 + $0x100] sm:$0xf] %vm2533_vm11, %v2454_v1  ;;  %v4800_v52 = vpop.f32.mrf.mxu0  ;;  %v5795_v63 = vld [vmem:[#allocation2 + $0x64] sm:$0xf0]  ;;  %v8224_v57 = vpop.f32.mrf.mxu1  ;;  %v3556_v1 = vshll.u32 %v8211_v54, 16  ;;  %v3554_v33 = vrot.slane %v3553_v60, 4 }
 0x2d4   : > { %3002 = vst.msk [vmem:[#allocation2 + $0x100] sm:$0xf] %vm2969_vm12, %v2890_v17  ;;  %v8201_v22 = vadd.f32 %v7573_v46, %v4800_v52  ;;  %v5579_v34 = vor.u32 %v5795_v63, %v5578_v58  ;;  %v2418_v46 = vpop.permute.xlu2 %2417  ;;  %v8222_v58 = vld [vmem:[%s6129_s11 + $0xa8] sm:$0xf]  ;;  %v2298_v49 = vsel %vm6139_vm2, %v2293_v2, %v8186_v47  ;;  %v8258_v2 = vld [vmem:[%s6129_s11 + $0xb8] sm:$0xf] }
 0x2d5   : > { %2548 = vst.msk [vmem:[#allocation2 + $0x70] sm:$0xf] %vm2533_vm11, %v2418_v46  ;;  %v2796_v53 = vrot.slane %v8222_v58, 5  ;;  %v1877_v60 = vld [vmem:[%s6129_s11 + $0x60] sm:$0xf] }
 0x2d6   : > { %v5219_v17 = vpack.c.bf16 %v8201_v22, %v8201_v22  ;;  %4819 = vmatmul.bf16.gmra.mxu0 %v5579_v34  ;;  %v3750_v34 = vshrl.u32 %v3346_v4, 16 }
 0x2d7   : > { %3876 = vrot.lane.b32.xlu1 %v3549_v42, %s6035_s27  ;;  %v3746_v42 = vshll.u32 %v3346_v4, 16  ;;  %v2798_v47 = vrot.slane %v2796_v53, 4 }
 0x2d8   : > { %5268 = vst.msk [vmem:[%s8020_s9 + $0x10] sm:$0xf] %vm5263_vm15, %v5219_v17  ;;  %3152 = vrot.lane.b32.xlu0 %v3037_v27, %s6033_s24  ;;  %v3740_v27 = vshrl.u32 %v8074_v0, 16  ;;  %v8248_v17 = vld [vmem:[%s6129_s11 + $0xac] sm:$0xf]  ;;  %v3752_v0 = vrot.slane %v3750_v34, 4 }
 0x2d9   : > { %v3179_v41 = vpop.permute.xlu1 %3178  ;;  %3150 = vrot.lane.b32.xlu2 %v3036_v26, %s6033_s24  ;;  %v8251_v5 = vrot.slane %v3746_v42, 5  ;;  %v3056_v42 = vld [vmem:[%s6129_s11 + $0xb0] sm:$0xf]  ;;  %v3756_v34 = vshll.u32 %v8258_v2, 16 }
 0x2da   : > { %3291 = vst.msk [vmem:[#allocation2 + $0x100] sm:$0xf] %vm3258_vm13, %v3179_v41  ;;  %v2892_v52 = vpop.permute.xlu0 %2891  ;;  %v9422_v41 = vrot.slane %v8248_v17, 5  ;;  %v3742_v58 = vrot.slane %v3740_v27, 4  ;;  %v2119_v27 = vshrl.u32 %v1877_v60, 16 }
 0x2db   : > { %3003 = vst.msk [vmem:[#allocation2 + $0x108] sm:$0xf] %vm2969_vm12, %v2892_v52  ;;  %v4802_v63 = vpop.f32.mrf.mxu0  ;;  %v3753_v52 = vor.u32 %v3752_v0, %v8251_v5 }
 0x2dc   : > { %3292 = vst.msk [vmem:[#allocation2 + $0x108] sm:$0xf] %vm3258_vm13, %v3181_v28  ;;  %v8232_v59 = vadd.f32 %v7602_v40, %v4802_v63  ;;  %v8243_v28 = vrot.slane %v3556_v1, 5  ;;  %v2856_v46 = vpop.permute.xlu2 %2855  ;;  %v8267_v63 = vpop.f32.mrf.mxu1 }
 0x2dd   : > { %9437 = vst [vmem:[#allocation9_spill] sm:$0xff] %v8267_v63 }
 0x2de   : > { %v5220_v40 = vpack.c.bf16 %v8232_v59, %v8232_v59  ;;  %v3559_v26 = vsel %vm6139_vm2, %v3554_v33, %v8243_v28  ;;  %v3743_v33 = vor.u32 %v3742_v58, %v8103_v25 }
 0x2df   : > { %2467 = vrot.lane.b32.xlu1 %v2308_v12, %s6032_s17  ;;  %v2115_v12 = vshll.u32 %v1877_v60, 16  ;;  %v8283_v60 = vrot.slane %v3756_v34, 5 }
 0x2e0   : > { %5269 = vst.msk [vmem:[%s8020_s9 + $0x14] sm:$0xf] %vm5263_vm15, %v5220_v40  ;;  %2465 = vrot.lane.b32.xlu0 %v2298_v49, %s6032_s17  ;;  %v2800_v49 = vsel %vm6441_vm7, %v2798_v47, %v9422_v41  ;;  %v2795_v40 = vrot.slane %v2793_v35, 4  ;;  %v2121_v47 = vrot.slane %v2119_v27, 4  ;;  %v8288_v41 = vld [vmem:[%s6129_s11 + $0xa8] sm:$0xf] }
 0x2e1   : > { %v3907_v4 = vpop.permute.xlu1 %3906  ;;  %3878 = vrot.lane.b32.xlu2 %v3559_v26, %s6035_s27  ;;  %v3754_v26 = vrot.slane %v3753_v52, 4  ;;  %v8285_v23 = vrot.slane %v2115_v12, 5  ;;  %v3744_v35 = vrot.slane %v3743_v33, 4  ;;  %v4234_v52 = vrot.slane %v4232_v51, 4 }
 0x2e2   : > { %4018 = vst.msk [vmem:[#allocation2 + $0x108] sm:$0xf] %vm3984_vm14, %v3907_v4  ;;  %v3905_v1 = vpop.permute.xlu0 %3904  ;;  %v4068_v4 = vld [vmem:[%s6129_s11 + $0xa4] sm:$0xf]  ;;  %v9425_v27 = vrot.slane %v8288_v41, 5 }
 0x2e3   : > { %4017 = vst.msk [vmem:[#allocation2 + $0x100] sm:$0xf] %vm3984_vm14, %v3905_v1  ;;  %v2109_v1 = vshrl.u32 %v8143_v44, 16  ;;  %v4235_v25 = vrot.slane %v4068_v4, 5  ;;  %v2797_v44 = vsel %vm6441_vm7, %v2795_v40, %v2796_v53  ;;  %v3759_v10 = vsel %vm6139_vm2, %v3754_v26, %v8283_v60 }
 0x2e4   : > { %v3869_v0 = vpop.permute.xlu2 %3868  ;;  %v2122_v51 = vor.u32 %v2121_v47, %v8285_v23  ;;  %v2125_v40 = vshll.u32 %v8291_v45, 16 }
 0x2e5   : > { %v4236_v53 = vsel %vm6441_vm7, %v4234_v52, %v4235_v25  ;;  %v4237_v4 = vrot.slane %v4235_v25, 4  ;;  %v2111_v26 = vrot.slane %v2109_v1, 4 }
 0x2e6   : > { %4358 = vst.msk [vmem:[#allocation2 + $0x114] sm:$0xf] %vm350_vm3, %v4236_v53  ;;  %v2123_v52 = vrot.slane %v2122_v51, 4  ;;  %v8331_v1 = vrot.slane %v2125_v40, 5  ;;  %v2309_v51 = vshrl.u32 %v8190_v55, 16 }
 0x2e7   : > { %3190 = vrot.lane.b32.xlu1 %v3056_v42, %s6033_s24  ;;  %v4239_v25 = vsel %vm6441_vm7, %v4237_v4, %v9425_v27 }
 0x2e8   : > { %2903 = vrot.lane.b32.xlu0 %v2800_v49, %s6034_s25  ;;  %4359 = vst.msk [vmem:[#allocation2 + $0x11c] sm:$0xf] %vm350_vm3, %v4239_v25 }
 0x2e9   : > { %v2854_v18 = vpop.permute.xlu1 %2853  ;;  %v5815_v58 = vld [vmem:[#allocation2 + $0x104] sm:$0xf0]  ;;  %2901 = vrot.lane.b32.xlu2 %v2797_v44, %s6034_s25 }
 0x2ea   : > { %2984 = vst.msk [vmem:[#allocation2 + $0x70] sm:$0xf] %vm2969_vm12, %v2854_v18  ;;  %v2420_v42 = vpop.permute.xlu0 %2419  ;;  %v4805_v34 = vpop.f32.mrf.mxu0  ;;  %v5658_v12 = vld [vmem:[#allocation2 + $0x100] sm:$0xf]  ;;  %v3749_v18 = vsel %vm6139_vm2, %v3744_v35, %v8251_v5  ;;  %v9439_v5 = vrot.slane %v8137_v11, 5 }
 0x2eb   : > { %2549 = vst.msk [vmem:[#allocation2 + $0x78] sm:$0xf] %vm2533_vm11, %v2420_v42  ;;  %v8301_v49 = vadd.f32 %v7637_v3, %v4805_v34  ;;  %v5659_v33 = vor.u32 %v5815_v58, %v5658_v12  ;;  %v8318_v58 = vpop.f32.mrf.mxu1  ;;  %v3057_v34 = vld [vmem:[%s6129_s11 + $0xb4] sm:$0xf]  ;;  %v3328_v12 = vld [vmem:[%s6129_s11 + $0x6c] sm:$0xf] }
 0x2ec   : > { %2985 = vst.msk [vmem:[#allocation2 + $0x78] sm:$0xf] %vm2969_vm12, %v2856_v46  ;;  %v2603_v46 = vld [vmem:[%s6129_s11 + $0x60] sm:$0xf]  ;;  %v2460_v47 = vpop.permute.xlu2 %2459  ;;  %v2741_v35 = vrot.slane %v9439_v5, 4  ;;  %v3570_v4 = vshrl.u32 %v3328_v12, 16 }
 0x2ed   : > { %v5221_v3 = vpack.c.bf16 %v8301_v49, %v8301_v49  ;;  %4869 = vmatmul.bf16.gmra.mxu2 %v5659_v33  ;;  %9438 = vst [vmem:[#allocation10_spill] sm:$0xff] %v8318_v58  ;;  %v2742_v44 = vrot.slane %v2603_v46, 5  ;;  %v2112_v33 = vor.u32 %v2111_v26, %v8178_v13  ;;  %v3566_v13 = vshll.u32 %v3328_v12, 16  ;;  %v5816_v55 = vld [vmem:[#allocation2 + $0x114] sm:$0xf] }
 0x2ee   : > { %2569 = vst.msk [vmem:[#allocation2 + $0x118] sm:$0xf] %vm2533_vm11, %v2460_v47  ;;  %v2311_v26 = vrot.slane %v2309_v51, 4  ;;  %v3572_v25 = vrot.slane %v3570_v4, 4 }
 0x2ef   : > { %5270 = vst.msk [vmem:[%s8020_s9 + $0x18] sm:$0xf] %vm5263_vm15, %v5221_v3  ;;  %3918 = vrot.lane.b32.xlu1 %v3759_v10, %s6035_s27  ;;  %v2743_v40 = vsel %vm6441_vm7, %v2741_v35, %v2742_v44  ;;  %v8359_v47 = vrot.slane %v3566_v13, 5  ;;  %v5668_v5 = vld [vmem:[#allocation2 + $0x118] sm:$0xf0]  ;;  %v3560_v35 = vshrl.u32 %v8211_v54, 16 }
 0x2f0   : > { %3916 = vrot.lane.b32.xlu0 %v3749_v18, %s6035_s27  ;;  %v2113_v18 = vrot.slane %v2112_v33, 4  ;;  %v5671_v12 = vor.u32 %v5816_v55, %v5668_v5  ;;  %v3039_v54 = vld [vmem:[%s6129_s11 + $0x6c] sm:$0xf]  ;;  %v2312_v51 = vor.u32 %v2311_v26, %v8218_v20 }
 0x2f1   : > { %v3145_v42 = vpop.permute.xlu1 %3144  ;;  %3192 = vrot.lane.b32.xlu2 %v3057_v34, %s6033_s24  ;;  %v3573_v13 = vor.u32 %v3572_v25, %v8359_v47 }
 0x2f2   : > { %3274 = vst.msk [vmem:[#allocation2 + $0x78] sm:$0xf] %vm3258_vm13, %v3145_v42  ;;  %v3143_v53 = vpop.permute.xlu0 %3142  ;;  %v4807_v10 = vpop.f32.mrf.mxu0  ;;  %v1897_v42 = vld [vmem:[%s6129_s11 + $0xb0] sm:$0xf]  ;;  %v2118_v34 = vsel %vm6139_vm2, %v2113_v18, %v8285_v23  ;;  %5773 = vmatmul.msk.bf16.gmra.mxu3 %vm4708_vm10, %v5671_v12  ;;  %v3038_v23 = vld [vmem:[%s6129_s11 + $0x68] sm:$0xf] }
 0x2f3   : > { %3273 = vst.msk [vmem:[#allocation2 + $0x70] sm:$0xf] %vm3258_vm13, %v3143_v53  ;;  %v8341_v11 = vadd.f32 %v7673_v50, %v4807_v10  ;;  %v2128_v50 = vsel %vm6139_vm2, %v2123_v52, %v8331_v1  ;;  %v8368_v53 = vld [vmem:[%s6129_s11 + $0x70] sm:$0xf]  ;;  %v8371_v10 = vld [vmem:[%s6129_s11 + $0x64] sm:$0xf] }
 0x2f4   : > { %3999 = vst.msk [vmem:[#allocation2 + $0x70] sm:$0xf] %vm3984_vm14, %v3869_v0  ;;  %v3183_v46 = vpop.permute.xlu2 %3182  ;;  %v8356_v0 = vpop.f32.mrf.mxu1  ;;  %v3576_v4 = vshll.u32 %v8368_v53, 16  ;;  %v3562_v18 = vrot.slane %v3560_v35, 4  ;;  %v2313_v5 = vrot.slane %v2312_v51, 4  ;;  %v3574_v26 = vrot.slane %v3573_v13, 4 }
 0x2f5   : > { %v5222_v3 = vpack.c.bf16 %v8341_v11, %v8341_v11  ;;  %9440 = vst [vmem:[#allocation11_spill] sm:$0xff] %v8356_v0  ;;  %v2319_v25 = vshrl.u32 %v1897_v42, 16 }
 0x2f6   : > { %v8384_v12 = vrot.slane %v3576_v4, 5  ;;  %v3563_v35 = vor.u32 %v3562_v18, %v8243_v28  ;;  %v3760_v4 = vshrl.u32 %v8258_v2, 16 }
 0x2f7   : > { %5271 = vst.msk [vmem:[%s8020_s9 + $0x1c] sm:$0xf] %vm5263_vm15, %v5222_v3  ;;  %2865 = vrot.lane.b32.xlu1 %v2743_v40, %s6034_s25  ;;  %v2315_v40 = vshll.u32 %v1897_v42, 16  ;;  %v2744_v3 = vrot.slane %v2742_v44, 4 }
 0x2f8   : > { %2431 = vrot.lane.b32.xlu0 %v2128_v50, %s6032_s17  ;;  %v9424_v50 = vrot.slane %v8371_v10, 5  ;;  %v3564_v2 = vrot.slane %v3563_v35, 4  ;;  %v3348_v35 = vld [vmem:[%s6129_s11 + $0xbc] sm:$0xf] }
 0x2f9   : > { %v2458_v52 = vpop.permute.xlu1 %2457  ;;  %2429 = vrot.lane.b32.xlu2 %v2118_v34, %s6032_s17  ;;  %v2317_v20 = vrot.slane %v2315_v40, 5 }
 0x2fa   : > { %2568 = vst.msk [vmem:[#allocation2 + $0x110] sm:$0xf] %vm2533_vm11, %v2458_v52  ;;  %v3871_v33 = vpop.permute.xlu0 %3870  ;;  %v2746_v44 = vsel %vm6441_vm7, %v2744_v3, %v9424_v50 }
 0x2fb   : > { %4000 = vst.msk [vmem:[#allocation2 + $0x78] sm:$0xf] %vm3984_vm14, %v3871_v33  ;;  %v2623_v33 = vld [vmem:[%s6129_s11 + $0xb0] sm:$0xf]  ;;  %v2318_v28 = vsel %vm6139_vm2, %v2313_v5, %v2317_v20 }
 0x2fc   : > { %v3911_v55 = vpop.permute.xlu2 %3910  ;;  %v8386_v34 = vpop.f32.mrf.mxu1  ;;  %v5586_v40 = vld [vmem:[#allocation2 + $0x70] sm:$0xf]  ;;  %v2802_v3 = vrot.slane %v2623_v33, 5  ;;  %v2129_v33 = vshrl.u32 %v8291_v45, 16 }
 0x2fd   : > { %9441 = vst [vmem:[#allocation12_spill] sm:$0xff] %v8386_v34 }
 0x2fe   : > { %v2804_v5 = vrot.slane %v2802_v3, 4 }
 0x2ff   : > { %3156 = vrot.lane.b32.xlu1 %v3039_v54, %s6033_s24 }
 0x300   : > { %3154 = vrot.lane.b32.xlu0 %v3038_v23, %s6033_s24 }
 0x301   : > { %v2896_v52 = vpop.permute.xlu1 %2895  ;;  %2867 = vrot.lane.b32.xlu2 %v2746_v44, %s6034_s25  ;;  %v3762_v44 = vrot.slane %v3760_v4, 4 }
 0x302   : > { %3005 = vst.msk [vmem:[#allocation2 + $0x118] sm:$0xf] %vm2969_vm12, %v2896_v52  ;;  %v2894_v54 = vpop.permute.xlu0 %2893  ;;  %v4810_v51 = vpop.f32.mrf.mxu0  ;;  %v5797_v13 = vld [vmem:[#allocation2 + $0x74] sm:$0xf0]  ;;  %v8410_v52 = vld [vmem:[%s6129_s11 + $0xb4] sm:$0xf] }
 0x303   : > { %3004 = vst.msk [vmem:[#allocation2 + $0x110] sm:$0xf] %vm2969_vm12, %v2894_v54  ;;  %v8397_v42 = vadd.f32 %v7707_v19, %v4810_v51  ;;  %v5587_v23 = vor.u32 %v5797_v13, %v5586_v40  ;;  %v3579_v19 = vsel %vm6139_vm2, %v3574_v26, %v8384_v12  ;;  %v8413_v51 = vld [vmem:[%s6129_s11 + $0xb4] sm:$0xf]  ;;  %v1879_v40 = vld [vmem:[%s6129_s11 + $0x68] sm:$0xf] }
 0x304   : > { %3293 = vst.msk [vmem:[#allocation2 + $0x110] sm:$0xf] %vm3258_vm13, %v3183_v46  ;;  %v2321_v46 = vrot.slane %v2319_v25, 4  ;;  %v2858_v54 = vpop.permute.xlu2 %2857  ;;  %v9442_v26 = vrot.slane %v8248_v17, 5  ;;  %v3569_v25 = vsel %vm6139_vm2, %v3564_v2, %v8359_v47  ;;  %v8433_v17 = vpop.f32.mrf.mxu1  ;;  %v2139_v27 = vshrl.u32 %v1879_v40, 16 }
 0x305   : > { %v5223_v18 = vpack.c.bf16 %v8397_v42, %v8397_v42  ;;  %4824 = vmatmul.bf16.gmra.mxu0 %v5587_v23  ;;  %9443 = vst [vmem:[#allocation13_spill] sm:$0xff] %v8433_v17  ;;  %v9444_v47 = vrot.slane %v8410_v52, 5  ;;  %v3763_v2 = vor.u32 %v3762_v44, %v8283_v60  ;;  %v3330_v17 = vld [vmem:[%s6129_s11 + $0x74] sm:$0xf] }
 0x306   : > { %v2801_v23 = vrot.slane %v9442_v26, 4  ;;  %v2322_v50 = vor.u32 %v2321_v46, %v2317_v20  ;;  %v2135_v26 = vshll.u32 %v1879_v40, 16  ;;  %v3766_v46 = vshll.u32 %v3348_v35, 16 }
 0x307   : > { %5272 = vst.msk [vmem:[%s8020_s9 + $0x20] sm:$0xf] %vm5263_vm15, %v5223_v18  ;;  %2469 = vrot.lane.b32.xlu1 %v2318_v28, %s6032_s17  ;;  %v2325_v18 = vshll.u32 %v8413_v51, 16  ;;  %v2806_v20 = vsel %vm6441_vm7, %v2804_v5, %v9444_v47  ;;  %v2141_v60 = vrot.slane %v2139_v27, 4  ;;  %v3764_v44 = vrot.slane %v3763_v2, 4 }
 0x308   : > { %3882 = vrot.lane.b32.xlu0 %v3579_v19, %s6035_s27  ;;  %v2803_v40 = vsel %vm6441_vm7, %v2801_v23, %v2802_v3  ;;  %v2323_v45 = vrot.slane %v2322_v50, 4  ;;  %v8452_v5 = vrot.slane %v2135_v26, 5  ;;  %v3770_v23 = vshrl.u32 %v3348_v35, 16 }
 0x309   : > { %v3909_v13 = vpop.permute.xlu1 %3908  ;;  %3880 = vrot.lane.b32.xlu2 %v3569_v25, %s6035_s27  ;;  %v3768_v25 = vrot.slane %v3766_v46, 5  ;;  %v3059_v46 = vld [vmem:[%s6129_s11 + $0xbc] sm:$0xf] }
 0x30a   : > { %4019 = vst.msk [vmem:[#allocation2 + $0x110] sm:$0xf] %vm3984_vm14, %v3909_v13  ;;  %v3185_v28 = vpop.permute.xlu0 %3184  ;;  %v4812_v19 = vpop.f32.mrf.mxu0  ;;  %v8447_v13 = vrot.slane %v2325_v18, 5  ;;  %v2142_v47 = vor.u32 %v2141_v60, %v8452_v5 }
 0x30b   : > { %3294 = vst.msk [vmem:[#allocation2 + $0x118] sm:$0xf] %vm3258_vm13, %v3185_v28  ;;  %v8431_v4 = vadd.f32 %v7747_v8, %v4812_v19  ;;  %v8456_v28 = vld [vmem:[%s6129_s11 + $0x6c] sm:$0xf]  ;;  %v2131_v19 = vrot.slane %v2129_v33, 4  ;;  %v3769_v35 = vsel %vm6139_vm2, %v3764_v44, %v3768_v25 }
 0x30c   : > { %4020 = vst.msk [vmem:[#allocation2 + $0x118] sm:$0xf] %vm3984_vm14, %v3911_v55  ;;  %v3149_v55 = vpop.permute.xlu2 %3148  ;;  %v2328_v18 = vsel %vm6139_vm2, %v2323_v45, %v8447_v13  ;;  %v2145_v33 = vshll.u32 %v8456_v28, 16  ;;  %v4070_v45 = vld [vmem:[%s6129_s11 + $0xac] sm:$0xf] }
 0x30d   : > { %v5224_v8 = vpack.c.bf16 %v8431_v4, %v8431_v4  ;;  %v2132_v2 = vor.u32 %v2131_v19, %v8331_v1  ;;  %v8480_v1 = vld [vmem:[%s6129_s11 + $0xb0] sm:$0xf]  ;;  %v9445_v19 = vrot.slane %v8288_v41, 5 }
 0x30f   : > { %5273 = vst.msk [vmem:[%s8020_s9 + $0x24] sm:$0xf] %vm5263_vm15, %v5224_v8  ;;  %2907 = vrot.lane.b32.xlu1 %v2806_v20, %s6034_s25  ;;  %v4989_v8 = vpop.f32.mrf.mxu1  ;;  %v2133_v44 = vrot.slane %v2132_v2, 4  ;;  %v3580_v2 = vshrl.u32 %v8368_v53, 16 }
 0x310   : > { %2905 = vrot.lane.b32.xlu0 %v2803_v40, %s6034_s25  ;;  %v3772_v40 = vrot.slane %v3770_v23, 4  ;;  %v4240_v23 = vrot.slane %v9445_v19, 4  ;;  %v3590_v19 = vshrl.u32 %v3330_v17, 16 }
 0x311   : > { %v2424_v3 = vpop.permute.xlu1 %2423  ;;  %v5666_v50 = vld [vmem:[#allocation2 + $0x110] sm:$0xf]  ;;  %2471 = vrot.lane.b32.xlu2 %v2328_v18, %s6032_s17 }
 0x312   : > { %2551 = vst.msk [vmem:[#allocation2 + $0x88] sm:$0xf] %vm2533_vm11, %v2424_v3  ;;  %v2422_v26 = vpop.permute.xlu0 %2421  ;;  %v8473_v3 = vld [vmem:[%s6129_s11 + $0xc0] sm:$0xf] }
 0x313   : > { %2550 = vst.msk [vmem:[#allocation2 + $0x80] sm:$0xf] %vm2533_vm11, %v2422_v26  ;;  %v5817_v27 = vld [vmem:[#allocation2 + $0x114] sm:$0xf0]  ;;  %v8476_v26 = vrot.slane %v2145_v33, 5  ;;  %v9426_v33 = vrot.slane %v8480_v1, 5 }
 0x314   : > { %2986 = vst.msk [vmem:[#allocation2 + $0x80] sm:$0xf] %vm2969_vm12, %v2858_v54  ;;  %v5667_v20 = vor.u32 %v5817_v27, %v5666_v50  ;;  %v2462_v60 = vpop.permute.xlu2 %2461  ;;  %v4241_v54 = vrot.slane %v4070_v45, 5  ;;  %v2143_v50 = vrot.slane %v2142_v47, 4  ;;  %v3058_v45 = vld [vmem:[%s6129_s11 + $0xb8] sm:$0xf] }
 0x315   : > { %2570 = vst.msk [vmem:[#allocation2 + $0x120] sm:$0xf] %vm2533_vm11, %v2462_v60  ;;  %v3776_v47 = vshll.u32 %v8473_v3, 16 }
 0x316   : > { %4874 = vmatmul.bf16.gmra.mxu2 %v5667_v20  ;;  %v4243_v18 = vrot.slane %v4241_v54, 4  ;;  %v4242_v41 = vsel %vm6441_vm7, %v4240_v23, %v4241_v54 }
 0x317   : > { %3920 = vrot.lane.b32.xlu1 %v3769_v35, %s6035_s27  ;;  %v3773_v35 = vor.u32 %v3772_v40, %v3768_v25  ;;  %v2148_v25 = vsel %vm6139_vm2, %v2143_v50, %v8476_v26  ;;  %v3586_v40 = vshll.u32 %v3330_v17, 16  ;;  %v8514_v23 = vrot.slane %v3776_v47, 5  ;;  %4360 = vst.msk [vmem:[#allocation2 + $0x124] sm:$0xf] %vm350_vm3, %v4242_v41  ;;  %v8520_v17 = vld [vmem:[%s6129_s11 + $0x6c] sm:$0xf] }
 0x318   : > { %3196 = vrot.lane.b32.xlu0 %v3059_v46, %s6033_s24  ;;  %v8493_v46 = vld [vmem:[%s6129_s11 + $0x68] sm:$0xf]  ;;  %v4245_v53 = vsel %vm6441_vm7, %v4243_v18, %v9426_v33  ;;  %v4991_v18 = vpop.f32.mrf.mxu1  ;;  %v9427_v47 = vrot.slane %v8520_v17, 5 }
 0x319   : > { %v4860_v27 = vpop.f32.mrf.mxu2  ;;  %v3147_v20 = vpop.permute.xlu1 %3146  ;;  %3194 = vrot.lane.b32.xlu2 %v3058_v45, %s6033_s24  ;;  %v2748_v54 = vrot.slane %v8493_v46, 5  ;;  %v3774_v50 = vrot.slane %v3773_v35, 4  ;;  %4361 = vst.msk [vmem:[#allocation2 + $0x12c] sm:$0xf] %vm350_vm3, %v4245_v53  ;;  %v8527_v46 = vld [vmem:[%s6129_s11 + $0x78] sm:$0xf] }
 0x31a   : > { %v8489_v60 = vadd.f32 %v4989_v8, %v4860_v27  ;;  %3275 = vst.msk [vmem:[#allocation2 + $0x80] sm:$0xf] %vm3258_vm13, %v3147_v20  ;;  %v2860_v34 = vpop.permute.xlu0 %2859  ;;  %v3582_v27 = vrot.slane %v3580_v2, 4 }
 0x31b   : > { %2987 = vst.msk [vmem:[#allocation2 + $0x88] sm:$0xf] %vm2969_vm12, %v2860_v34  ;;  %v2138_v34 = vsel %vm6139_vm2, %v2133_v44, %v8452_v5  ;;  %v3588_v5 = vrot.slane %v3586_v40, 5  ;;  %v3592_v44 = vrot.slane %v3590_v19, 4  ;;  %v2750_v35 = vrot.slane %v2748_v54, 4 }
 0x31c   : > { %v5243_v8 = vpack.c.bf16 %v8489_v60, %v8489_v60  ;;  %3276 = vst.msk [vmem:[#allocation2 + $0x88] sm:$0xf] %vm3258_vm13, %v3149_v55  ;;  %v2900_v55 = vpop.permute.xlu2 %2899  ;;  %v3779_v41 = vsel %vm6139_vm2, %v3774_v50, %v8514_v23  ;;  %v1899_v40 = vld [vmem:[%s6129_s11 + $0xb8] sm:$0xf]  ;;  %v3040_v19 = vld [vmem:[%s6129_s11 + $0x70] sm:$0xf]  ;;  %v3583_v33 = vor.u32 %v3582_v27, %v8384_v12 }
 0x31d   : > { %v3593_v53 = vor.u32 %v3592_v44, %v3588_v5 }
 0x31e   : > { %5292 = vst.msk [vmem:[%s8020_s9 + $0x70] sm:$0xf] %vm5263_vm15, %v5243_v8  ;;  %v5818_v50 = vld [vmem:[#allocation2 + $0x124] sm:$0xf]  ;;  %v3584_v63 = vrot.slane %v3583_v33, 4 }
 0x31f   : > { %2435 = vrot.lane.b32.xlu1 %v2148_v25, %s6032_s17  ;;  %v3594_v27 = vrot.slane %v3593_v53, 4  ;;  %v8563_v33 = vld [vmem:[%s6129_s11 + $0xbc] sm:$0xf] }
 0x320   : > { %2433 = vrot.lane.b32.xlu0 %v2138_v34, %s6032_s17  ;;  %v3596_v34 = vshll.u32 %v8527_v46, 16  ;;  %v5676_v58 = vld [vmem:[#allocation2 + $0x128] sm:$0xf0] }
 0x321   : > { %v4862_v20 = vpop.f32.mrf.mxu2  ;;  %v3875_v45 = vpop.permute.xlu1 %3874  ;;  %3922 = vrot.lane.b32.xlu2 %v3779_v41, %s6035_s27  ;;  %v5679_v12 = vor.u32 %v5818_v50, %v5676_v58 }
 0x322   : > { %v8532_v25 = vadd.f32 %v4991_v18, %v4862_v20  ;;  %4002 = vst.msk [vmem:[#allocation2 + $0x88] sm:$0xf] %vm3984_vm14, %v3875_v45  ;;  %v3873_v8 = vpop.permute.xlu0 %3872  ;;  %v2752_v18 = vsel %vm6441_vm7, %v2750_v35, %v9427_v47  ;;  %v2335_v20 = vshll.u32 %v1899_v40, 16  ;;  %v2339_v45 = vshrl.u32 %v1899_v40, 16 }
 0x323   : > { %4001 = vst.msk [vmem:[#allocation2 + $0x80] sm:$0xf] %vm3984_vm14, %v3873_v8  ;;  %v9446_v8 = vrot.slane %v8371_v10, 5  ;;  %v8553_v41 = vrot.slane %v3596_v34, 5  ;;  %v2329_v35 = vshrl.u32 %v8413_v51, 16  ;;  %5774 = vmatmul.msk.bf16.gmra.mxu3 %vm4708_vm10, %v5679_v12 }
 0x324   : > { %v5244_v2 = vpack.c.bf16 %v8532_v25, %v8532_v25  ;;  %v3913_v44 = vpop.permute.xlu2 %3912  ;;  %v8556_v10 = vrot.slane %v2335_v20, 5 }
 0x325   : > { %v2747_v0 = vrot.slane %v9446_v8, 4  ;;  %v2341_v8 = vrot.slane %v2339_v45, 4 }
 0x326   : > { %5293 = vst.msk [vmem:[%s8020_s9 + $0x74] sm:$0xf] %vm5263_vm15, %v5244_v2 }
 0x327   : > { %3158 = vrot.lane.b32.xlu1 %v3040_v19, %s6033_s24  ;;  %v2749_v2 = vsel %vm6441_vm7, %v2747_v0, %v2748_v54  ;;  %v3599_v0 = vsel %vm6139_vm2, %v3594_v27, %v8553_v41  ;;  %v3589_v54 = vsel %vm6139_vm2, %v3584_v63, %v3588_v5  ;;  %v9447_v63 = vrot.slane %v8410_v52, 5 }
 0x328   : > { %2871 = vrot.lane.b32.xlu0 %v2752_v18, %s6034_s25  ;;  %v2331_v18 = vrot.slane %v2329_v35, 4 }
 0x329   : > { %v2898_v40 = vpop.permute.xlu1 %2897  ;;  %v5799_v47 = vld [vmem:[#allocation2 + $0x84] sm:$0xf0]  ;;  %2869 = vrot.lane.b32.xlu2 %v2749_v2, %s6034_s25  ;;  %v2807_v5 = vrot.slane %v9447_v63, 4  ;;  %v3350_v2 = vld [vmem:[%s6129_s11 + $0xc4] sm:$0xf] }
 0x32a   : > { %3006 = vst.msk [vmem:[#allocation2 + $0x120] sm:$0xf] %vm2969_vm12, %v2898_v40  ;;  %v2464_v58 = vpop.permute.xlu0 %2463  ;;  %v4815_v19 = vpop.f32.mrf.mxu0  ;;  %v5594_v53 = vld [vmem:[#allocation2 + $0x80] sm:$0xf]  ;;  %v2332_v35 = vor.u32 %v2331_v18, %v8447_v13  ;;  %v3786_v13 = vshll.u32 %v3350_v2, 16  ;;  %v3780_v18 = vshrl.u32 %v8473_v3, 16 }
 0x32b   : > { %2571 = vst.msk [vmem:[#allocation2 + $0x128] sm:$0xf] %vm2533_vm11, %v2464_v58  ;;  %v8567_v51 = vadd.f32 %v7778_v39, %v4815_v19  ;;  %v5595_v34 = vor.u32 %v5799_v47, %v5594_v53  ;;  %v2625_v39 = vld [vmem:[%s6129_s11 + $0xb8] sm:$0xf]  ;;  %v2342_v47 = vor.u32 %v2341_v8, %v8556_v10  ;;  %v3041_v8 = vld [vmem:[%s6129_s11 + $0x74] sm:$0xf] }
 0x32c   : > { %3007 = vst.msk [vmem:[#allocation2 + $0x128] sm:$0xf] %vm2969_vm12, %v2900_v55  ;;  %v2345_v55 = vshll.u32 %v8563_v33, 16  ;;  %v2428_v20 = vpop.permute.xlu2 %2427  ;;  %v2808_v45 = vrot.slane %v2625_v39, 5  ;;  %v2149_v53 = vshrl.u32 %v8456_v28, 16 }
 0x32d   : > { %v5225_v50 = vpack.c.bf16 %v8567_v51, %v8567_v51  ;;  %4829 = vmatmul.bf16.gmra.mxu0 %v5595_v34  ;;  %2553 = vst.msk [vmem:[#allocation2 + $0x98] sm:$0xf] %vm2533_vm11, %v2428_v20  ;;  %v2343_v27 = vrot.slane %v2342_v47, 4  ;;  %v1881_v39 = vld [vmem:[%s6129_s11 + $0x70] sm:$0xf]  ;;  %v8613_v47 = vrot.slane %v3786_v13, 5 }
 0x32e   : > { %v8588_v40 = vrot.slane %v2345_v55, 5  ;;  %v2809_v34 = vsel %vm6441_vm7, %v2807_v5, %v2808_v45  ;;  %v3061_v3 = vld [vmem:[%s6129_s11 + $0xc4] sm:$0xf]  ;;  %v4072_v13 = vld [vmem:[%s6129_s11 + $0xb4] sm:$0xf] }
 0x32f   : > { %5274 = vst.msk [vmem:[%s8020_s9 + $0x28] sm:$0xf] %vm5263_vm15, %v5225_v50  ;;  %3886 = vrot.lane.b32.xlu1 %v3599_v0, %s6035_s27  ;;  %v3790_v0 = vshrl.u32 %v3350_v2, 16  ;;  %v2155_v2 = vshll.u32 %v1881_v39, 16 }
 0x330   : > { %3884 = vrot.lane.b32.xlu0 %v3589_v54, %s6035_s27  ;;  %v2348_v28 = vsel %vm6139_vm2, %v2343_v27, %v8588_v40  ;;  %v8624_v27 = vld [vmem:[%s6129_s11 + $0xbc] sm:$0xf] }
 0x331   : > { %v3189_v12 = vpop.permute.xlu1 %3188  ;;  %3160 = vrot.lane.b32.xlu2 %v3041_v8, %s6033_s24  ;;  %v3792_v55 = vrot.slane %v3790_v0, 4 }
 0x332   : > { %3296 = vst.msk [vmem:[#allocation2 + $0x128] sm:$0xf] %vm3258_vm13, %v3189_v12  ;;  %v3187_v58 = vpop.permute.xlu0 %3186  ;;  %v4817_v19 = vpop.f32.mrf.mxu0  ;;  %v8621_v12 = vld [vmem:[%s6129_s11 + $0xc8] sm:$0xf] }
 0x333   : > { %3295 = vst.msk [vmem:[#allocation2 + $0x120] sm:$0xf] %vm3258_vm13, %v3187_v58  ;;  %v8597_v52 = vadd.f32 %v7817_v48, %v4817_v19  ;;  %v2333_v48 = vrot.slane %v2332_v35, 4  ;;  %v3060_v35 = vld [vmem:[%s6129_s11 + $0xc0] sm:$0xf]  ;;  %v3793_v58 = vor.u32 %v3792_v55, %v8613_v47  ;;  %v2810_v19 = vrot.slane %v2808_v45, 4 }
 0x334   : > { %4021 = vst.msk [vmem:[#allocation2 + $0x120] sm:$0xf] %vm3984_vm14, %v3913_v44  ;;  %v3151_v50 = vpop.permute.xlu2 %3150  ;;  %v2151_v44 = vrot.slane %v2149_v53, 4  ;;  %v9448_v45 = vrot.slane %v8480_v1, 5  ;;  %v2607_v53 = vld [vmem:[%s6129_s11 + $0x70] sm:$0xf] }
 0x335   : > { %v5226_v54 = vpack.c.bf16 %v8597_v52, %v8597_v52  ;;  %v2338_v63 = vsel %vm6139_vm2, %v2333_v48, %v8556_v10  ;;  %v3796_v10 = vshll.u32 %v8621_v12, 16  ;;  %v8639_v48 = vld [vmem:[%s6129_s11 + $0xb8] sm:$0xf]  ;;  %v3794_v55 = vrot.slane %v3793_v58, 4 }
 0x336   : > { %v2152_v8 = vor.u32 %v2151_v44, %v8476_v26  ;;  %v2159_v44 = vshrl.u32 %v1881_v39, 16 }
 0x337   : > { %5275 = vst.msk [vmem:[%s8020_s9 + $0x2c] sm:$0xf] %vm5263_vm15, %v5226_v54  ;;  %2909 = vrot.lane.b32.xlu1 %v2809_v34, %s6034_s25  ;;  %v3782_v34 = vrot.slane %v3780_v18, 4  ;;  %v4247_v54 = vrot.slane %v4072_v13, 5  ;;  %v8644_v18 = vrot.slane %v3796_v10, 5  ;;  %v9449_v13 = vrot.slane %v8624_v27, 5 }
 0x338   : > { %2475 = vrot.lane.b32.xlu0 %v2348_v28, %s6032_s17  ;;  %v2153_v26 = vrot.slane %v2152_v8, 4  ;;  %v8636_v28 = vrot.slane %v2155_v2, 5  ;;  %v3600_v10 = vshrl.u32 %v8527_v46, 16 }
 0x339   : > { %v2426_v20 = vpop.permute.xlu1 %2425  ;;  %2473 = vrot.lane.b32.xlu2 %v2338_v63, %s6032_s17  ;;  %v4249_v63 = vrot.slane %v4247_v54, 4  ;;  %v2812_v8 = vsel %vm6441_vm7, %v2810_v19, %v9449_v13  ;;  %v3783_v2 = vor.u32 %v3782_v34, %v8514_v23  ;;  %v4994_v19 = vpop.f32.mrf.mxu1  ;;  %v3799_v46 = vsel %vm6139_vm2, %v3794_v55, %v8644_v18  ;;  %v8675_v13 = vld [vmem:[%s6129_s11 + $0x74] sm:$0xf] }
 0x33a   : > { %2552 = vst.msk [vmem:[#allocation2 + $0x90] sm:$0xf] %vm2533_vm11, %v2426_v20  ;;  %v3915_v5 = vpop.permute.xlu0 %3914  ;;  %v4246_v20 = vrot.slane %v9448_v45, 4  ;;  %v2158_v34 = vsel %vm6139_vm2, %v2153_v26, %v8636_v28 }
 0x33b   : > { %4022 = vst.msk [vmem:[#allocation2 + $0x128] sm:$0xf] %vm3984_vm14, %v3915_v5  ;;  %v5674_v1 = vld [vmem:[#allocation2 + $0x120] sm:$0xf] }
 0x33c   : > { %v3879_v0 = vpop.permute.xlu2 %3878  ;;  %v4248_v58 = vsel %vm6441_vm7, %v4246_v20, %v4247_v54  ;;  %v8671_v54 = vld [vmem:[%s6129_s11 + $0x74] sm:$0xf]  ;;  %v3784_v20 = vrot.slane %v3783_v2, 4 }
 0x33d   : > { %4362 = vst.msk [vmem:[#allocation2 + $0x134] sm:$0xf] %vm350_vm3, %v4248_v58  ;;  %v9428_v55 = vrot.slane %v8671_v54, 5 }
 0x33e   : > { %v3789_v58 = vsel %vm6139_vm2, %v3784_v20, %v8613_v47 }
 0x33f   : > { %3200 = vrot.lane.b32.xlu1 %v3061_v3, %s6033_s24  ;;  %v9430_v3 = vrot.slane %v8639_v48, 5 }
 0x340   : > { %3198 = vrot.lane.b32.xlu0 %v3060_v35, %s6033_s24 }
 0x341   : > { %v2864_v5 = vpop.permute.xlu1 %2863  ;;  %v4251_v23 = vsel %vm6441_vm7, %v4249_v63, %v9430_v3  ;;  %2911 = vrot.lane.b32.xlu2 %v2812_v8, %s6034_s25  ;;  %v2161_v63 = vrot.slane %v2159_v44, 4  ;;  %v3332_v44 = vld [vmem:[%s6129_s11 + $0x7c] sm:$0xf]  ;;  %v8799_v3 = vld [vmem:[%s6129_s11 + $0xc0] sm:$0xf] }
 0x342   : > { %2989 = vst.msk [vmem:[#allocation2 + $0x98] sm:$0xf] %vm2969_vm12, %v2864_v5  ;;  %v2862_v39 = vpop.permute.xlu0 %2861  ;;  %v5819_v35 = vld [vmem:[#allocation2 + $0x124] sm:$0xf0]  ;;  %v2754_v5 = vrot.slane %v2607_v53, 5  ;;  %v3602_v53 = vrot.slane %v3600_v10, 4 }
 0x343   : > { %2988 = vst.msk [vmem:[#allocation2 + $0x90] sm:$0xf] %vm2969_vm12, %v2862_v39  ;;  %v5675_v45 = vor.u32 %v5819_v35, %v5674_v1  ;;  %v9450_v39 = vrot.slane %v8520_v17, 5  ;;  %v2162_v10 = vor.u32 %v2161_v63, %v8636_v28 }
 0x344   : > { %3277 = vst.msk [vmem:[#allocation2 + $0x90] sm:$0xf] %vm3258_vm13, %v3151_v50  ;;  %v2902_v50 = vpop.permute.xlu2 %2901  ;;  %v2756_v8 = vrot.slane %v2754_v5, 4  ;;  %v5820_v28 = vld [vmem:[#allocation2 + $0x134] sm:$0xf] }
 0x345   : > { %4879 = vmatmul.bf16.gmra.mxu2 %v5675_v45  ;;  %4363 = vst.msk [vmem:[#allocation2 + $0x13c] sm:$0xf] %vm350_vm3, %v4251_v23  ;;  %v2753_v2 = vrot.slane %v9450_v39, 4  ;;  %v2165_v45 = vshll.u32 %v8675_v13, 16  ;;  %v2163_v63 = vrot.slane %v2162_v10, 4  ;;  %v3610_v10 = vshrl.u32 %v3332_v44, 16 }
 0x346   : > { %v2758_v47 = vsel %vm6441_vm7, %v2756_v8, %v9428_v55 }
 0x347   : > { %2437 = vrot.lane.b32.xlu1 %v2158_v34, %s6032_s17  ;;  %v3606_v34 = vshll.u32 %v3332_v44, 16  ;;  %v2755_v20 = vsel %vm6441_vm7, %v2753_v2, %v2754_v5 }
 0x348   : > { %3926 = vrot.lane.b32.xlu0 %v3799_v46, %s6035_s27  ;;  %v4865_v26 = vpop.f32.mrf.mxu2  ;;  %v2349_v46 = vshrl.u32 %v8563_v33, 16 }
 0x349   : > { %v8684_v1 = vadd.f32 %v4994_v19, %v4865_v26  ;;  %v3877_v35 = vpop.permute.xlu1 %3876  ;;  %v3603_v19 = vor.u32 %v3602_v53, %v8553_v41  ;;  %3924 = vrot.lane.b32.xlu2 %v3789_v58, %s6035_s27  ;;  %v8707_v41 = vrot.slane %v2165_v45, 5  ;;  %v4996_v53 = vpop.f32.mrf.mxu1  ;;  %v3608_v8 = vrot.slane %v3606_v34, 5  ;;  %v1901_v45 = vld [vmem:[%s6129_s11 + $0xc0] sm:$0xf] }
 0x34a   : > { %4003 = vst.msk [vmem:[#allocation2 + $0x90] sm:$0xf] %vm3984_vm14, %v3877_v35  ;;  %v3153_v23 = vpop.permute.xlu0 %3152  ;;  %v2351_v58 = vrot.slane %v2349_v46, 4 }
 0x34b   : > { %v5245_v17 = vpack.c.bf16 %v8684_v1, %v8684_v1  ;;  %3278 = vst.msk [vmem:[#allocation2 + $0x98] sm:$0xf] %vm3258_vm13, %v3153_v23  ;;  %v3604_v39 = vrot.slane %v3603_v19, 4 }
 0x34c   : > { %4004 = vst.msk [vmem:[#allocation2 + $0x98] sm:$0xf] %vm3984_vm14, %v3879_v0  ;;  %v5684_v33 = vld [vmem:[#allocation2 + $0x138] sm:$0xf0]  ;;  %v3193_v0 = vpop.permute.xlu2 %3192 }
 0x34d   : > { %5294 = vst.msk [vmem:[%s8020_s9 + $0x78] sm:$0xf] %vm5263_vm15, %v5245_v17  ;;  %v5687_v26 = vor.u32 %v5820_v28, %v5684_v33  ;;  %v2168_v17 = vsel %vm6139_vm2, %v2163_v63, %v8707_v41  ;;  %v3609_v44 = vsel %vm6139_vm2, %v3604_v39, %v3608_v8  ;;  %v2352_v63 = vor.u32 %v2351_v58, %v8588_v40 }
 0x34e   : > { %v2355_v33 = vshll.u32 %v1901_v45, 16 }
 0x34f   : > { %2875 = vrot.lane.b32.xlu1 %v2758_v47, %s6034_s25  ;;  %5775 = vmatmul.msk.bf16.gmra.mxu3 %vm4708_vm10, %v5687_v26  ;;  %v3612_v26 = vrot.slane %v3610_v10, 4  ;;  %v3042_v10 = vld [vmem:[%s6129_s11 + $0x78] sm:$0xf] }
 0x350   : > { %2873 = vrot.lane.b32.xlu0 %v2755_v20, %s6034_s25  ;;  %v4867_v35 = vpop.f32.mrf.mxu2  ;;  %v2357_v40 = vrot.slane %v2355_v33, 5 }
 0x351   : > { %v8712_v23 = vadd.f32 %v4996_v53, %v4867_v35  ;;  %v2468_v5 = vpop.permute.xlu1 %2467  ;;  %v5602_v2 = vld [vmem:[#allocation2 + $0x90] sm:$0xf]  ;;  %2439 = vrot.lane.b32.xlu2 %v2168_v17, %s6032_s17  ;;  %v3043_v53 = vld [vmem:[%s6129_s11 + $0x7c] sm:$0xf]  ;;  %v8736_v35 = vld [vmem:[%s6129_s11 + $0x80] sm:$0xf]  ;;  %v3613_v17 = vor.u32 %v3612_v26, %v3608_v8 }
 0x352   : > { %2573 = vst.msk [vmem:[#allocation2 + $0x138] sm:$0xf] %vm2533_vm11, %v2468_v5  ;;  %v2466_v19 = vpop.permute.xlu0 %2465  ;;  %v2359_v5 = vshrl.u32 %v1901_v45, 16  ;;  %v8765_v26 = vld [vmem:[%s6129_s11 + $0xc4] sm:$0xf] }
 0x353   : > { %v5246_v34 = vpack.c.bf16 %v8712_v23, %v8712_v23  ;;  %2572 = vst.msk [vmem:[#allocation2 + $0x130] sm:$0xf] %vm2533_vm11, %v2466_v19  ;;  %v4820_v46 = vpop.f32.mrf.mxu0  ;;  %v5801_v47 = vld [vmem:[#allocation2 + $0x94] sm:$0xf0]  ;;  %v3616_v19 = vshll.u32 %v8736_v35, 16 }
 0x354   : > { %3008 = vst.msk [vmem:[#allocation2 + $0x130] sm:$0xf] %vm2969_vm12, %v2902_v50  ;;  %v8726_v28 = vadd.f32 %v7846_v38, %v4820_v46  ;;  %v5603_v20 = vor.u32 %v5801_v47, %v5602_v2  ;;  %v2430_v50 = vpop.permute.xlu2 %2429  ;;  %v2353_v38 = vrot.slane %v2352_v63, 4  ;;  %v2627_v2 = vld [vmem:[%s6129_s11 + $0xc0] sm:$0xf]  ;;  %v3800_v46 = vshrl.u32 %v8621_v12, 16 }
 0x355   : > { %5295 = vst.msk [vmem:[%s8020_s9 + $0x7c] sm:$0xf] %vm5263_vm15, %v5246_v34  ;;  %v8758_v63 = vld [vmem:[%s6129_s11 + $0xc4] sm:$0xf]  ;;  %v3614_v12 = vrot.slane %v3613_v17, 4  ;;  %v8760_v33 = vrot.slane %v3616_v19, 5 }
 0x356   : > { %v5227_v39 = vpack.c.bf16 %v8726_v28, %v8726_v28  ;;  %4834 = vmatmul.bf16.gmra.mxu0 %v5603_v20  ;;  %2554 = vst.msk [vmem:[#allocation2 + $0xa0] sm:$0xf] %vm2533_vm11, %v2430_v50  ;;  %v2358_v8 = vsel %vm6139_vm2, %v2353_v38, %v2357_v40  ;;  %v2814_v20 = vrot.slane %v2627_v2, 5  ;;  %v9429_v38 = vrot.slane %v8758_v63, 5  ;;  %v1883_v19 = vld [vmem:[%s6129_s11 + $0x78] sm:$0xf] }
 0x357   : > { %3888 = vrot.lane.b32.xlu1 %v3609_v44, %s6035_s27  ;;  %v1612_v44 = vld [vmem:[%s6129_s11 + $0xc0] sm:$0xf]  ;;  %v3619_v17 = vsel %vm6139_vm2, %v3614_v12, %v8760_v33 }
 0x358   : > { %5276 = vst.msk [vmem:[%s8020_s9 + $0x30] sm:$0xf] %vm5263_vm15, %v5227_v39  ;;  %3164 = vrot.lane.b32.xlu0 %v3043_v53, %s6033_s24  ;;  %v2361_v53 = vrot.slane %v2359_v5, 4  ;;  %v3802_v39 = vrot.slane %v3800_v46, 4  ;;  %v2816_v50 = vrot.slane %v2814_v20, 4  ;;  %v9451_v5 = vrot.slane %v8624_v27, 5 }
 0x359   : > { %v3191_v58 = vpop.permute.xlu1 %3190  ;;  %3162 = vrot.lane.b32.xlu2 %v3042_v10, %s6033_s24  ;;  %v2365_v46 = vshll.u32 %v8765_v26, 16  ;;  %v2169_v27 = vshrl.u32 %v8675_v13, 16 }
 0x35a   : > { %3297 = vst.msk [vmem:[#allocation2 + $0x130] sm:$0xf] %vm3258_vm13, %v3191_v58  ;;  %v2904_v34 = vpop.permute.xlu0 %2903  ;;  %v3352_v58 = vld [vmem:[%s6129_s11 + $0xcc] sm:$0xf]  ;;  %v2813_v10 = vrot.slane %v9451_v5, 4  ;;  %v2818_v12 = vsel %vm6441_vm7, %v2816_v50, %v9429_v38 }
 0x35b   : > { %3009 = vst.msk [vmem:[#allocation2 + $0x138] sm:$0xf] %vm2969_vm12, %v2904_v34  ;;  %v4822_v47 = vpop.f32.mrf.mxu0  ;;  %v2362_v34 = vor.u32 %v2361_v53, %v2357_v40  ;;  %v2175_v40 = vshll.u32 %v1883_v19, 16  ;;  %v2179_v53 = vshrl.u32 %v1883_v19, 16  ;;  %v8791_v5 = vrot.slane %v2365_v46, 5 }
 0x35c   : > { %3298 = vst.msk [vmem:[#allocation2 + $0x138] sm:$0xf] %vm3258_vm13, %v3193_v0  ;;  %v8751_v45 = vadd.f32 %v7871_v62, %v4822_v47  ;;  %v2868_v62 = vpop.permute.xlu2 %2867  ;;  %v3810_v50 = vshrl.u32 %v3352_v58, 16  ;;  %v2171_v19 = vrot.slane %v2169_v27, 4  ;;  %v9452_v46 = vrot.slane %v8639_v48, 5 }
 0x35d   : > { %v2181_v38 = vrot.slane %v2179_v53, 4 }
 0x35e   : > { %v5228_v0 = vpack.c.bf16 %v8751_v45, %v8751_v45 }
 0x35f   : > { %2477 = vrot.lane.b32.xlu1 %v2358_v8, %s6032_s17  ;;  %v3803_v8 = vor.u32 %v3802_v39, %v8644_v18  ;;  %v4074_v39 = vld [vmem:[%s6129_s11 + $0xbc] sm:$0xf] }
 0x360   : > { %5277 = vst.msk [vmem:[%s8020_s9 + $0x34] sm:$0xf] %vm5263_vm15, %v5228_v0  ;;  %1753 = vrot.lane.b32.xlu0 %v1612_v44, %s6031_s14  ;;  %v3806_v44 = vshll.u32 %v3352_v58, 16  ;;  %v2815_v0 = vsel %vm6441_vm7, %v2813_v10, %v2814_v20  ;;  %v4253_v55 = vrot.slane %v4074_v39, 5 }
 0x361   : > { %v3919_v2 = vpop.permute.xlu1 %3918  ;;  %3890 = vrot.lane.b32.xlu2 %v3619_v17, %s6035_s27  ;;  %v3804_v13 = vrot.slane %v3803_v8, 4  ;;  %v8796_v17 = vrot.slane %v2175_v40, 5  ;;  %v4252_v8 = vrot.slane %v9452_v46, 4 }
 0x362   : > { %4024 = vst.msk [vmem:[#allocation2 + $0x138] sm:$0xf] %vm3984_vm14, %v3919_v2  ;;  %v3917_v47 = vpop.permute.xlu0 %3916  ;;  %v2363_v2 = vrot.slane %v2362_v34, 4 }
 0x363   : > { %4023 = vst.msk [vmem:[#allocation2 + $0x130] sm:$0xf] %vm3984_vm14, %v3917_v47  ;;  %v3808_v47 = vrot.slane %v3806_v44, 5  ;;  %v4255_v44 = vrot.slane %v4253_v55, 4  ;;  %v4254_v53 = vsel %vm6441_vm7, %v4252_v8, %v4253_v55  ;;  %v2182_v39 = vor.u32 %v2181_v38, %v8796_v17 }
 0x364   : > { %v3881_v18 = vpop.permute.xlu2 %3880  ;;  %v2368_v34 = vsel %vm6139_vm2, %v2363_v2, %v8791_v5  ;;  %v2172_v55 = vor.u32 %v2171_v19, %v8707_v41  ;;  %4364 = vst.msk [vmem:[#allocation2 + $0x144] sm:$0xf] %vm350_vm3, %v4254_v53  ;;  %v3062_v19 = vld [vmem:[%s6129_s11 + $0xc8] sm:$0xf] }
 0x365   : > { %v3809_v2 = vsel %vm6139_vm2, %v3804_v13, %v3808_v47  ;;  %v2183_v13 = vrot.slane %v2182_v39, 4 }
 0x367   : > { %2915 = vrot.lane.b32.xlu1 %v2818_v12, %s6034_s25  ;;  %v4256_v12 = vrot.slane %v8799_v3, 5 }
 0x368   : > { %2913 = vrot.lane.b32.xlu0 %v2815_v0, %s6034_s25  ;;  %v4999_v0 = vpop.f32.mrf.mxu3 }
 0x369   : > { %v2866_v20 = vpop.permute.xlu1 %2865  ;;  %v5821_v10 = vld [vmem:[#allocation2 + $0x134] sm:$0xf0]  ;;  %v4257_v48 = vsel %vm6441_vm7, %v4255_v44, %v4256_v12  ;;  %2479 = vrot.lane.b32.xlu2 %v2368_v34, %s6032_s17  ;;  %v3334_v44 = vld [vmem:[%s6129_s11 + $0x84] sm:$0xf] }
 0x36a   : > { %2990 = vst.msk [vmem:[#allocation2 + $0xa0] sm:$0xf] %vm2969_vm12, %v2866_v20  ;;  %v2432_v58 = vpop.permute.xlu0 %2431  ;;  %v5682_v40 = vld [vmem:[#allocation2 + $0x130] sm:$0xf]  ;;  %v3063_v20 = vld [vmem:[%s6129_s11 + $0xcc] sm:$0xf] }
 0x36b   : > { %2555 = vst.msk [vmem:[#allocation2 + $0xa8] sm:$0xf] %vm2533_vm11, %v2432_v58  ;;  %v5683_v27 = vor.u32 %v5821_v10, %v5682_v40  ;;  %v3812_v10 = vrot.slane %v3810_v50, 4  ;;  %v2609_v34 = vld [vmem:[%s6129_s11 + $0x78] sm:$0xf]  ;;  %v2173_v50 = vrot.slane %v2172_v55, 4 }
 0x36c   : > { %2991 = vst.msk [vmem:[#allocation2 + $0xa8] sm:$0xf] %vm2969_vm12, %v2868_v62  ;;  %v2472_v46 = vpop.permute.xlu2 %2471  ;;  %v8824_v62 = vld [vmem:[%s6129_s11 + $0xd0] sm:$0xf]  ;;  %v3630_v39 = vshrl.u32 %v3334_v44, 16 }
 0x36d   : > { %4884 = vmatmul.bf16.gmra.mxu2 %v5683_v27  ;;  %4365 = vst.msk [vmem:[#allocation2 + $0x14c] sm:$0xf] %vm350_vm3, %v4257_v48  ;;  %v3813_v58 = vor.u32 %v3812_v10, %v3808_v47  ;;  %v3816_v40 = vshll.u32 %v8824_v62, 16  ;;  %v3620_v48 = vshrl.u32 %v8736_v35, 16  ;;  %v3626_v47 = vshll.u32 %v3334_v44, 16 }
 0x36e   : > { %2575 = vst.msk [vmem:[#allocation2 + $0x148] sm:$0xf] %vm2533_vm11, %v2472_v46  ;;  %v2178_v35 = vsel %vm6139_vm2, %v2173_v50, %v8796_v17 }
 0x36f   : > { %3928 = vrot.lane.b32.xlu1 %v3809_v2, %s6035_s27  ;;  %v2188_v2 = vsel %vm6139_vm2, %v2183_v13, %v7252_v30  ;;  %v3814_v55 = vrot.slane %v3813_v58, 4  ;;  %v8851_v10 = vrot.slane %v3816_v40, 5  ;;  %v3628_v13 = vrot.slane %v3626_v47, 5 }
 0x370   : > { %3204 = vrot.lane.b32.xlu0 %v3063_v20, %s6033_s24  ;;  %v4870_v38 = vpop.f32.mrf.mxu2  ;;  %v5822_v20 = vld [vmem:[#allocation2 + $0x144] sm:$0xf]  ;;  %v3622_v44 = vrot.slane %v3620_v48, 4  ;;  %v9453_v48 = vrot.slane %v7318_v16, 5 }
 0x371   : > { %v8831_v8 = vadd.f32 %v4999_v0, %v4870_v38  ;;  %v3157_v41 = vpop.permute.xlu1 %3156  ;;  %v2760_v0 = vrot.slane %v2609_v34, 5  ;;  %3202 = vrot.lane.b32.xlu2 %v3062_v19, %s6033_s24  ;;  %v3819_v58 = vsel %vm6139_vm2, %v3814_v55, %v8851_v10 }
 0x372   : > { %3280 = vst.msk [vmem:[#allocation2 + $0xa8] sm:$0xf] %vm3258_vm13, %v3157_v41  ;;  %v3155_v27 = vpop.permute.xlu0 %3154  ;;  %v3632_v41 = vrot.slane %v3630_v39, 4 }
 0x373   : > { %v5247_v53 = vpack.c.bf16 %v8831_v8, %v8831_v8  ;;  %3279 = vst.msk [vmem:[#allocation2 + $0xa0] sm:$0xf] %vm3258_vm13, %v3155_v27  ;;  %v2762_v50 = vrot.slane %v2760_v0, 4 }
 0x374   : > { %4005 = vst.msk [vmem:[#allocation2 + $0xa0] sm:$0xf] %vm3984_vm14, %v3881_v18  ;;  %v5692_v46 = vld [vmem:[#allocation2 + $0x148] sm:$0xf0]  ;;  %v5001_v18 = vpop.f32.mrf.mxu3  ;;  %v3195_v38 = vpop.permute.xlu2 %3194  ;;  %v3633_v47 = vor.u32 %v3632_v41, %v3628_v13  ;;  %v1903_v41 = vld [vmem:[%s6129_s11 + $0xc8] sm:$0xf] }
 0x375   : > { %5296 = vst.msk [vmem:[%s8020_s9 + $0x80] sm:$0xf] %vm5263_vm15, %v5247_v53  ;;  %v5695_v34 = vor.u32 %v5822_v20, %v5692_v46  ;;  %v2369_v53 = vshrl.u32 %v8765_v26, 16  ;;  %v2764_v39 = vsel %vm6441_vm7, %v2762_v50, %v9453_v48  ;;  %v3623_v20 = vor.u32 %v3622_v44, %v8760_v33  ;;  %v2629_v48 = vld [vmem:[%s6129_s11 + $0xc8] sm:$0xf] }
 0x376   : > { %v3634_v26 = vrot.slane %v3633_v47, 4 }
 0x377   : > { %2443 = vrot.lane.b32.xlu1 %v2188_v2, %s6032_s17  ;;  %5776 = vmatmul.msk.bf16.gmra.mxu3 %vm4708_vm10, %v5695_v34  ;;  %v3044_v2 = vld [vmem:[%s6129_s11 + $0x80] sm:$0xf] }
 0x378   : > { %2441 = vrot.lane.b32.xlu0 %v2178_v35, %s6032_s17  ;;  %v4872_v30 = vpop.f32.mrf.mxu2  ;;  %v9454_v35 = vrot.slane %v8671_v54, 5 }
 0x379   : > { %v8856_v19 = vadd.f32 %v5001_v18, %v4872_v30  ;;  %v2470_v17 = vpop.permute.xlu1 %2469  ;;  %3930 = vrot.lane.b32.xlu2 %v3819_v58, %s6035_s27  ;;  %v2371_v18 = vrot.slane %v2369_v53, 4  ;;  %v3624_v30 = vrot.slane %v3623_v20, 4 }
 0x37a   : > { %2574 = vst.msk [vmem:[#allocation2 + $0x140] sm:$0xf] %vm2533_vm11, %v2470_v17  ;;  %v3883_v40 = vpop.permute.xlu0 %3882  ;;  %v2759_v55 = vrot.slane %v9454_v35, 4  ;;  %v3820_v35 = vshrl.u32 %v8824_v62, 16  ;;  %v1614_v62 = vld [vmem:[%s6129_s11 + $0xc8] sm:$0xf] }
 0x37b   : > { %v5248_v27 = vpack.c.bf16 %v8856_v19, %v8856_v19  ;;  %4006 = vst.msk [vmem:[#allocation2 + $0xa8] sm:$0xf] %vm3984_vm14, %v3883_v40  ;;  %v5610_v54 = vld [vmem:[#allocation2 + $0xa0] sm:$0xf]  ;;  %v2372_v40 = vor.u32 %v2371_v18, %v8791_v5  ;;  %v2379_v5 = vshrl.u32 %v1903_v41, 16  ;;  %v2820_v18 = vrot.slane %v2629_v48, 5 }
 0x37c   : > { %v3923_v46 = vpop.permute.xlu2 %3922  ;;  %v2761_v16 = vsel %vm6441_vm7, %v2759_v55, %v2760_v0  ;;  %v3639_v0 = vsel %vm6139_vm2, %v3634_v26, %v7347_v14 }
 0x37d   : > { %5297 = vst.msk [vmem:[%s8020_s9 + $0x84] sm:$0xf] %vm5263_vm15, %v5248_v27  ;;  %v2375_v27 = vshll.u32 %v1903_v41, 16  ;;  %v2373_v14 = vrot.slane %v2372_v40, 4  ;;  %v1904_v41 = vld [vmem:[%s6129_s11 + $0xcc] sm:$0x1] }
 0x37f   : > { %3166 = vrot.lane.b32.xlu1 %v3044_v2, %s6033_s24 }
 0x380   : > { %2879 = vrot.lane.b32.xlu0 %v2764_v39, %s6034_s25  ;;  %v3045_v39 = vld [vmem:[%s6129_s11 + $0x84] sm:$0xf] }
 0x381   : > { %v2908_v34 = vpop.permute.xlu1 %2907  ;;  %2877 = vrot.lane.b32.xlu2 %v2761_v16, %s6034_s25  ;;  %v2381_v16 = vrot.slane %v2379_v5, 4 }
 0x382   : > { %3011 = vst.msk [vmem:[#allocation2 + $0x148] sm:$0xf] %vm2969_vm12, %v2908_v34  ;;  %v2906_v17 = vpop.permute.xlu0 %2905  ;;  %v4825_v33 = vpop.f32.mrf.mxu0  ;;  %v5803_v50 = vld [vmem:[#allocation2 + $0xa4] sm:$0xf0] }
 0x383   : > { %3010 = vst.msk [vmem:[#allocation2 + $0x140] sm:$0xf] %vm2969_vm12, %v2906_v17  ;;  %v8885_v44 = vadd.f32 %v7899_v37, %v4825_v33  ;;  %v5611_v58 = vor.u32 %v5803_v50, %v5610_v54  ;;  %v3629_v37 = vsel %vm6139_vm2, %v3624_v30, %v3628_v13  ;;  %v2630_v30 = vld [vmem:[%s6129_s11 + $0xcc] sm:$0x1]  ;;  %v2822_v17 = vrot.slane %v2820_v18, 4 }
 0x384   : > { %3299 = vst.msk [vmem:[#allocation2 + $0x140] sm:$0xf] %vm3258_vm13, %v3195_v38  ;;  %v2870_v2 = vpop.permute.xlu2 %2869  ;;  %v2377_v38 = vrot.slane %v2375_v27, 5  ;;  %v2823_v33 = vrot.slane %v2630_v30, 5  ;;  %v3354_v54 = vld [vmem:[%s6129_s11 + $0xd4] sm:$0xf] }
 0x385   : > { %v5229_v53 = vpack.c.bf16 %v8885_v44, %v8885_v44  ;;  %4839 = vmatmul.bf16.gmra.mxu0 %v5611_v58  ;;  %v1613_v27 = vld [vmem:[%s6129_s11 + $0xc4] sm:$0xf] }
 0x386   : > { %v2378_v26 = vsel %vm6139_vm2, %v2373_v14, %v2377_v38 }
 0x387   : > { %5278 = vst.msk [vmem:[%s8020_s9 + $0x38] sm:$0xf] %vm5263_vm15, %v5229_v53  ;;  %3894 = vrot.lane.b32.xlu1 %v3639_v0, %s6035_s27  ;;  %v9455_v0 = vrot.slane %v8758_v63, 5  ;;  %v2382_v53 = vor.u32 %v2381_v16, %v2377_v38  ;;  %v2824_v63 = vsel %vm6441_vm7, %v2822_v17, %v2823_v33  ;;  %v3826_v38 = vshll.u32 %v3354_v54, 16 }
 0x388   : > { %3892 = vrot.lane.b32.xlu0 %v3629_v37, %s6035_s27  ;;  %v2385_v37 = vshll.u32 %v1904_v41, 16  ;;  %v3830_v33 = vshrl.u32 %v3354_v54, 16 }
 0x389   : > { %v3921_v47 = vpop.permute.xlu1 %3920  ;;  %3168 = vrot.lane.b32.xlu2 %v3045_v39, %s6033_s24  ;;  %v2819_v40 = vrot.slane %v9455_v0, 4  ;;  %v3828_v30 = vrot.slane %v3826_v38, 5 }
 0x38a   : > { %4025 = vst.msk [vmem:[#allocation2 + $0x140] sm:$0xf] %vm3984_vm14, %v3921_v47  ;;  %v3197_v20 = vpop.permute.xlu0 %3196  ;;  %v4827_v13 = vpop.f32.mrf.mxu0 }
 0x38b   : > { %3300 = vst.msk [vmem:[#allocation2 + $0x148] sm:$0xf] %vm3258_vm13, %v3197_v20  ;;  %v8907_v55 = vadd.f32 %v7921_v61, %v4827_v13  ;;  %v2821_v39 = vsel %vm6441_vm7, %v2819_v40, %v2820_v18  ;;  %v5004_v20 = vpop.f32.mrf.mxu3  ;;  %v2383_v13 = vrot.slane %v2382_v53, 4  ;;  %v4258_v18 = vrot.slane %v4256_v12, 4 }
 0x38c   : > { %4026 = vst.msk [vmem:[#allocation2 + $0x148] sm:$0xf] %vm3984_vm14, %v3923_v46  ;;  %v3161_v61 = vpop.permute.xlu2 %3160  ;;  %v3822_v46 = vrot.slane %v3820_v35, 4  ;;  %v2387_v35 = vrot.slane %v2385_v37, 5  ;;  %v3832_v53 = vrot.slane %v3830_v33, 4 }
 0x38d   : > { %v5230_v34 = vpack.c.bf16 %v8907_v55, %v8907_v55  ;;  %5047 = vmatpush.msrb.mxu3 %v8907_v55  ;;  %v3355_v37 = vld [vmem:[%s6129_s11 + $0xd8] sm:$0x1] }
 0x38e   : > { %v3823_v5 = vor.u32 %v3822_v46, %v8851_v10  ;;  %v3836_v38 = vshll.u32 %v3355_v37, 16 }
 0x38f   : > { %5279 = vst.msk [vmem:[%s8020_s9 + $0x3c] sm:$0xf] %vm5263_vm15, %v5230_v34  ;;  %5048 = vmatpush.msrb.mxu3 %v8885_v44  ;;  %2481 = vrot.lane.b32.xlu1 %v2378_v26, %s6032_s17  ;;  %v4076_v26 = vld [vmem:[%s6129_s11 + $0xc4] sm:$0xf] }
 0x390   : > { %1757 = vrot.lane.b32.xlu0 %v1614_v62, %s6031_s14  ;;  %v3824_v34 = vrot.slane %v3823_v5, 4  ;;  %v8945_v62 = vld [vmem:[%s6129_s11 + $0xc8] sm:$0xf] }
 0x391   : > { %5049 = vmatpush.msrb.mxu3 %v8751_v45  ;;  %v2436_v50 = vpop.permute.xlu1 %2435  ;;  %v5690_v58 = vld [vmem:[#allocation2 + $0x140] sm:$0xf]  ;;  %1755 = vrot.lane.b32.xlu2 %v1613_v27, %s6031_s14  ;;  %v4262_v41 = vrot.slane %v8945_v62, 5  ;;  %v3065_v27 = vld [vmem:[%s6129_s11 + $0xd4] sm:$0xf] }
 0x392   : > { %2557 = vst.msk [vmem:[#allocation2 + $0xb8] sm:$0xf] %vm2533_vm11, %v2436_v50  ;;  %v2434_v14 = vpop.permute.xlu0 %2433  ;;  %v2388_v50 = vsel %vm6139_vm2, %v2383_v13, %v2387_v35  ;;  %v3829_v0 = vsel %vm6139_vm2, %v3824_v34, %v3828_v30 }
 0x393   : > { %2556 = vst.msk [vmem:[#allocation2 + $0xb0] sm:$0xf] %vm2533_vm11, %v2434_v14  ;;  %5050 = vmatpush.msrb.mxu3 %v8726_v28  ;;  %v5823_v47 = vld [vmem:[#allocation2 + $0x144] sm:$0xf0]  ;;  %v5006_v14 = vpop.f32.mrf.mxu3 }
 0x394   : > { %2992 = vst.msk [vmem:[#allocation2 + $0xb0] sm:$0xf] %vm2969_vm12, %v2870_v2  ;;  %v5691_v48 = vor.u32 %v5823_v47, %v5690_v58  ;;  %v2474_v10 = vpop.permute.xlu2 %2473  ;;  %v4259_v2 = vrot.slane %v4076_v26, 5 }
 0x395   : > { %5051 = vmatpush.msrb.mxu3 %v8597_v52  ;;  %2576 = vst.msk [vmem:[#allocation2 + $0x150] sm:$0xf] %vm2533_vm11, %v2474_v10  ;;  %v3838_v10 = vrot.slane %v3836_v38, 5  ;;  %v4264_v38 = vrot.slane %v4262_v41, 4 }
 0x396   : > { %4889 = vmatmul.bf16.gmra.mxu2 %v5691_v48  ;;  %v4261_v16 = vrot.slane %v4259_v2, 4  ;;  %v4260_v12 = vsel %vm6441_vm7, %v4258_v18, %v4259_v2  ;;  %v3064_v48 = vld [vmem:[%s6129_s11 + $0xd0] sm:$0xf] }
 0x397   : > { %5052 = vmatpush.msrb.mxu3 %v8567_v51  ;;  %2919 = vrot.lane.b32.xlu1 %v2824_v63, %s6034_s25  ;;  %4366 = vst.msk [vmem:[#allocation2 + $0x154] sm:$0xf] %vm350_vm3, %v4260_v12  ;;  %v3833_v63 = vor.u32 %v3832_v53, %v3828_v30 }
 0x398   : > { %2917 = vrot.lane.b32.xlu0 %v2821_v39, %s6034_s25  ;;  %v4263_v40 = vsel %vm6441_vm7, %v4261_v16, %v4262_v41 }
 0x399   : > { %v4875_v46 = vpop.f32.mrf.mxu2  ;;  %5053 = vmatpush.msrb.mxu3 %v8431_v4  ;;  %v3159_v17 = vpop.permute.xlu1 %3158  ;;  %2483 = vrot.lane.b32.xlu2 %v2388_v50, %s6032_s17  ;;  %4367 = vst.msk [vmem:[#allocation2 + $0x15c] sm:$0xf] %vm350_vm3, %v4263_v40  ;;  %v3834_v26 = vrot.slane %v3833_v63, 4  ;;  %v9030_v63 = vld [vmem:[%s6129_s11 + $0xd0] sm:$0xf]  ;;  %s9357_s17 = sand.u32 1, %s6011_s19  }
 0x39a   : > { %v8954_v58 = vadd.f32 %v5004_v20, %v4875_v46  ;;  %3281 = vst.msk [vmem:[#allocation2 + $0xb0] sm:$0xf] %vm3258_vm13, %v3159_v17  ;;  %v2872_v3 = vpop.permute.xlu0 %2871  ;;  %s272_s10 = scalar_lea.vmem [#allocation3], %s9357_s17  ;;  %s5325_s15 = scalar_lea.sflag [#allocation4], %s9357_s17 }
 0x39b   : > { %2993 = vst.msk [vmem:[#allocation2 + $0xb8] sm:$0xf] %vm2969_vm12, %v2872_v3  ;;  %5054 = vmatpush.msrb.mxu3 %v8397_v42  ;;  %v3839_v46 = vsel %vm6139_vm2, %v3834_v26, %v3838_v10  ;;  %s5343_s12 = sshll.u32 %s272_s10, 4  ;;  %s5344_s12 = int_to_ptr.vmem [resolvable:$true] %s5343_s12 }
 0x39c   : > { %v5249_v54 = vpack.c.bf16 %v8954_v58, %v8954_v58  ;;  %3282 = vst.msk [vmem:[#allocation2 + $0xb8] sm:$0xf] %vm3258_vm13, %v3161_v61  ;;  %v2912_v61 = vpop.permute.xlu2 %2911 }
 0x39d   : > { %5055 = vmatpush.msrb.mxu3 %v8341_v11 }
 0x39e   : > { %5298 = vst.msk [vmem:[%s8020_s9 + $0x88] sm:$0xf] %vm5263_vm15, %v5249_v54  ;;  %v5824_v35 = vld [vmem:[#allocation2 + $0x154] sm:$0xf] }
 0x39f   : > { %5056 = vmatpush.msrb.mxu3 %v8301_v49  ;;  %3932 = vrot.lane.b32.xlu1 %v3829_v0, %s6035_s27 }
 0x3a0   : > { %3208 = vrot.lane.b32.xlu0 %v3065_v27, %s6033_s24  ;;  %v5700_v34 = vld [vmem:[#allocation2 + $0x158] sm:$0xf0] }
 0x3a1   : > { %v4877_v47 = vpop.f32.mrf.mxu2  ;;  %5057 = vmatpush.msrb.mxu3 %v8232_v59  ;;  %v3887_v5 = vpop.permute.xlu1 %3886  ;;  %3206 = vrot.lane.b32.xlu2 %v3064_v48, %s6033_s24  ;;  %v5703_v30 = vor.u32 %v5824_v35, %v5700_v34 }
 0x3a2   : > { %v8983_v39 = vadd.f32 %v5006_v14, %v4877_v47  ;;  %4008 = vst.msk [vmem:[#allocation2 + $0xb8] sm:$0xf] %vm3984_vm14, %v3887_v5  ;;  %v3885_v20 = vpop.permute.xlu0 %3884  ;;  %v4078_v5 = vld [vmem:[%s6129_s11 + $0xcc] sm:$0xf] }
 0x3a3   : > { %4007 = vst.msk [vmem:[#allocation2 + $0xb0] sm:$0xf] %vm3984_vm14, %v3885_v20  ;;  %5058 = vmatpush.msrb.mxu3 %v8201_v22  ;;  %v4265_v48 = vrot.slane %v4078_v5, 5 }
 0x3a4   : > { %v5250_v13 = vpack.c.bf16 %v8983_v39, %v8983_v39  ;;  %v3925_v2 = vpop.permute.xlu2 %3924  ;;  %5777 = vmatmul.msk.bf16.gmra.mxu3 %vm4708_vm10, %v5703_v30 }
 0x3a5   : > { %5059 = vmatpush.msrb.mxu3 %v8164_v21  ;;  %v4267_v20 = vrot.slane %v4265_v48, 4  ;;  %v4266_v34 = vsel %vm6441_vm7, %v4264_v38, %v4265_v48 }
 0x3a6   : > { %5299 = vst.msk [vmem:[%s8020_s9 + $0x8c] sm:$0xf] %vm5263_vm15, %v5250_v13  ;;  %v4268_v13 = vrot.slane %v9030_v63, 5  ;;  %v5009_v41 = vpop.f32.mrf.mxu3 }
 0x3a7   : > { %5060 = vmatpush.msrb.mxu3 %v8120_v7  ;;  %4368 = vst.msk [vmem:[#allocation2 + $0x164] sm:$0xf] %vm350_vm3, %v4266_v34 }
 0x3a8   : > { %v4269_v62 = vsel %vm6441_vm7, %v4267_v20, %v4268_v13 }
 0x3a9   : > { %5061 = vmatpush.msrb.mxu3 %v8054_v9  ;;  %v2910_v18 = vpop.permute.xlu1 %2909  ;;  %v5805_v16 = vld [vmem:[#allocation2 + $0xb4] sm:$0xf0]  ;;  %3934 = vrot.lane.b32.xlu2 %v3839_v46, %s6035_s27  ;;  %4369 = vst.msk [vmem:[#allocation2 + $0x16c] sm:$0xf] %vm350_vm3, %v4269_v62  ;;  %s5341_s27 = scalar_lea.hbm %s9419_s4, %s6019_s21 }
 0x3aa   : > { %3012 = vst.msk [vmem:[#allocation2 + $0x150] sm:$0xf] %vm2969_vm12, %v2910_v18  ;;  %v2476_v17 = vpop.permute.xlu0 %2475  ;;  %v4830_v33 = vpop.f32.mrf.mxu0  ;;  %v5618_v50 = vld [vmem:[#allocation2 + $0xb0] sm:$0xf]  ;;  %s5345_s13 = sshll.u32 %s5341_s27, 4  ;;  %s5346_s13 = int_to_ptr.hbm [resolvable:$true] %s5345_s13 }
 0x3ab   : > { %2577 = vst.msk [vmem:[#allocation2 + $0x158] sm:$0xf] %vm2533_vm11, %v2476_v17  ;;  %v9002_v3 = vadd.f32 %v7953_v56, %v4830_v33  ;;  %5062 = vmatpush.msrb.mxu3 %v8015_v43  ;;  %v5619_v12 = vor.u32 %v5805_v16, %v5618_v50  ;;  %s5931_s16 = sshra.s32 %s5346_s13, 4  ;;  %s5932_s16 = int_to_ptr.hbm [resolvable:$true] %s5931_s16 }
 0x3ac   : > { %3013 = vst.msk [vmem:[#allocation2 + $0x158] sm:$0xf] %vm2969_vm12, %v2912_v61  ;;  %v2440_v54 = vpop.permute.xlu2 %2439  ;;  %s5933_s29 = scalar_lea.hbm %s5932_s16, 1  ;;  %p5938_p1 = scmp.lt.s32.totalorder %s5932_s16, %s9419_s4 }
 0x3ad   : > { %5067 = vmatpush.msra.mxu3 %v8712_v23  ;;  %v5231_v24 = vpack.c.bf16 %v9002_v3, %v9002_v3  ;;  %4844 = vmatmul.bf16.gmra.mxu0 %v5619_v12  ;;  %2559 = vst.msk [vmem:[#allocation2 + $0xc8] sm:$0xf] %vm2533_vm11, %v2440_v54  ;;  %p5934_p12 = scmp.ne.s32.totalorder %s5932_s16, %s5933_s29 }
 0x3ae   : > { %v5826_v50 = vld [vmem:[#allocation2 + $0x164] sm:$0xf] }
 0x3af   : > { %5068 = vmatpush.msra.mxu3 %v8684_v1  ;;  %5280 = vst.msk [vmem:[%s8020_s9 + $0x40] sm:$0xf] %vm5263_vm15, %v5231_v24  ;;  %v5011_v24 = vpop.f32.mrf.mxu3  ;;  %p5935_p13 = pnand %p5934_p12, %p6106_p4 }
 0x3b0   : > { %v5708_v12 = vld [vmem:[#allocation2 + $0x168] sm:$0xf0] }
 0x3b1   : > { %5069 = vmatpush.msra.mxu3 %v8532_v25  ;;  %v3201_v56 = vpop.permute.xlu1 %3200  ;;  %p5936_p0 = pneg %p5935_p13 }
 0x3b2   : > { %3302 = vst.msk [vmem:[#allocation2 + $0x158] sm:$0xf] %vm3258_vm13, %v3201_v56  ;;  %v3199_v0 = vpop.permute.xlu0 %3198  ;;  %v4832_v40 = vpop.f32.mrf.mxu0  ;;  %v5711_v56 = vor.u32 %v5826_v50, %v5708_v12  ;;  %v4270_v50 = vrot.slane %v4268_v13, 4 }
 0x3b3   : > { %5070 = vmatpush.msra.mxu3 %v8489_v60  ;;  %3301 = vst.msk [vmem:[#allocation2 + $0x150] sm:$0xf] %vm3258_vm13, %v3199_v0  ;;  %v9019_v27 = vadd.f32 %v7998_v6, %v4832_v40 }
 0x3b4   : > { %4027 = vst.msk [vmem:[#allocation2 + $0x150] sm:$0xf] %vm3984_vm14, %v3925_v2  ;;  %v3163_v61 = vpop.permute.xlu2 %3162  ;;  %5778 = vmatmul.msk.bf16.gmra.mxu3 %vm4708_vm10, %v5711_v56 }
 0x3b5   : > { %v5232_v53 = vpack.c.bf16 %v9019_v27, %v9019_v27 }
 0x3b7   : > { %5281 = vst.msk [vmem:[%s8020_s9 + $0x44] sm:$0xf] %vm5263_vm15, %v5232_v53 }
 0x3b9   : > { %v2438_v37 = vpop.permute.xlu1 %2437 }
 0x3ba   : > { %2558 = vst.msk [vmem:[#allocation2 + $0xc0] sm:$0xf] %vm2533_vm11, %v2438_v37  ;;  %v3927_v14 = vpop.permute.xlu0 %3926 }
 0x3bb   : > { %4028 = vst.msk [vmem:[#allocation2 + $0x158] sm:$0xf] %vm3984_vm14, %v3927_v14  ;;  %v5698_v26 = vld [vmem:[#allocation2 + $0x150] sm:$0xf] }
 0x3bc   : > { %v3891_v47 = vpop.permute.xlu2 %3890 }
 0x3c1   : > { %v2876_v6 = vpop.permute.xlu1 %2875 }
 0x3c2   : > { %2995 = vst.msk [vmem:[#allocation2 + $0xc8] sm:$0xf] %vm2969_vm12, %v2876_v6  ;;  %v2874_v35 = vpop.permute.xlu0 %2873  ;;  %v5825_v10 = vld [vmem:[#allocation2 + $0x154] sm:$0xf0] }
 0x3c3   : > { %2994 = vst.msk [vmem:[#allocation2 + $0xc0] sm:$0xf] %vm2969_vm12, %v2874_v35  ;;  %v5699_v2 = vor.u32 %v5825_v10, %v5698_v26 }
 0x3c4   : > { %3283 = vst.msk [vmem:[#allocation2 + $0xc0] sm:$0xf] %vm3258_vm13, %v3163_v61  ;;  %v2480_v30 = vpop.permute.xlu2 %2479 }
 0x3c5   : > { %4894 = vmatmul.bf16.gmra.mxu2 %v5699_v2 }
 0x3c8   : > { %v4880_v18 = vpop.f32.mrf.mxu2 }
 0x3c9   : > { %v9046_v16 = vadd.f32 %v5009_v41, %v4880_v18  ;;  %v3889_v46 = vpop.permute.xlu1 %3888  ;;  %v4080_v18 = vld [vmem:[%s6129_s11 + $0xd4] sm:$0xf] }
 0x3ca   : > { %4009 = vst.msk [vmem:[#allocation2 + $0xc0] sm:$0xf] %vm3984_vm14, %v3889_v46  ;;  %v3165_v17 = vpop.permute.xlu0 %3164  ;;  %v4271_v46 = vrot.slane %v4080_v18, 5 }
 0x3cb   : > { %v5251_v33 = vpack.c.bf16 %v9046_v16, %v9046_v16  ;;  %3284 = vst.msk [vmem:[#allocation2 + $0xc8] sm:$0xf] %vm3258_vm13, %v3165_v17  ;;  %v4081_v17 = vld [vmem:[%s6129_s11 + $0xd8] sm:$0x1] }
 0x3cc   : > { %4010 = vst.msk [vmem:[#allocation2 + $0xc8] sm:$0xf] %vm3984_vm14, %v3891_v47  ;;  %v3203_v54 = vpop.permute.xlu2 %3202  ;;  %v4273_v12 = vrot.slane %v4271_v46, 4 }
 0x3cd   : > { %5300 = vst.msk [vmem:[%s8020_s9 + $0x90] sm:$0xf] %vm5263_vm15, %v5251_v33 }
 0x3d0   : > { %v4882_v0 = vpop.f32.mrf.mxu2 }
 0x3d1   : > { %v9056_v40 = vadd.f32 %v5011_v24, %v4882_v0  ;;  %v2478_v53 = vpop.permute.xlu1 %2477  ;;  %v5626_v61 = vld [vmem:[#allocation2 + $0xc0] sm:$0xf]  ;;  %v4274_v24 = vrot.slane %v4081_v17, 5  ;;  %v4272_v0 = vsel %vm6441_vm7, %v4270_v50, %v4271_v46 }
 0x3d2   : > { %2578 = vst.msk [vmem:[#allocation2 + $0x160] sm:$0xf] %vm2533_vm11, %v2478_v53  ;;  %v1754_v37 = vpop.permute.xlu0 %1753  ;;  %v5014_v63 = vpop.f32.mrf.mxu3 }
 0x3d3   : > { %v5252_v14 = vpack.c.bf16 %v9056_v40, %v9056_v40  ;;  %1853 = vst.msk [vmem:[#allocation2 + $0x168] sm:$0xf] %vm1807_vm9, %v1754_v37  ;;  %v4835_v47 = vpop.f32.mrf.mxu0  ;;  %v5807_v5 = vld [vmem:[#allocation2 + $0xc4] sm:$0xf0]  ;;  %v4275_v53 = vsel %vm6441_vm7, %v4273_v12, %v4274_v24 }
 0x3d4   : > { %2579 = vst.msk [vmem:[#allocation2 + $0x168] sm:$0xf] %vm2533_vm11, %v2480_v30  ;;  %v9064_v48 = vadd.f32 %v8047_v32, %v4835_v47  ;;  %v5627_v6 = vor.u32 %v5807_v5, %v5626_v61  ;;  %v3931_v20 = vpop.permute.xlu2 %3930 }
 0x3d5   : > { %5301 = vst.msk [vmem:[%s8020_s9 + $0x94] sm:$0xf] %vm5263_vm15, %v5252_v14 }
 0x3d6   : > { %v5233_v38 = vpack.c.bf16 %v9064_v48, %v9064_v48  ;;  %4849 = vmatmul.bf16.gmra.mxu0 %v5627_v6  ;;  %4370 = vst.msk [vmem:[#allocation2 + $0x174] sm:$0xf] %vm350_vm3, %v4272_v0 }
 0x3d7   : > { %4371 = vst.msk [vmem:[#allocation2 + $0x17c] sm:$0xf] %vm350_vm3, %v4275_v53 }
 0x3d8   : > { %5282 = vst.msk [vmem:[%s8020_s9 + $0x48] sm:$0xf] %vm5263_vm15, %v5233_v38 }
 0x3d9   : > { %v2916_v35 = vpop.permute.xlu1 %2915 }
 0x3da   : > { %3015 = vst.msk [vmem:[#allocation2 + $0x168] sm:$0xf] %vm2969_vm12, %v2916_v35  ;;  %v2914_v26 = vpop.permute.xlu0 %2913 }
 0x3db   : > { %3014 = vst.msk [vmem:[#allocation2 + $0x160] sm:$0xf] %vm2969_vm12, %v2914_v26  ;;  %v4837_v32 = vpop.f32.mrf.mxu0 }
 0x3dc   : > { %3303 = vst.msk [vmem:[#allocation2 + $0x160] sm:$0xf] %vm3258_vm13, %v3203_v54  ;;  %v9076_v10 = vadd.f32 %v8085_v29, %v4837_v32  ;;  %v2878_v34 = vpop.permute.xlu2 %2877 }
 0x3dd   : > { %v5828_v6 = vld [vmem:[#allocation2 + $0x174] sm:$0xf] }
 0x3de   : > { %v5234_v2 = vpack.c.bf16 %v9076_v10, %v9076_v10  ;;  %v5716_v38 = vld [vmem:[#allocation2 + $0x178] sm:$0xf0] }
 0x3df   : > { %v5719_v35 = vor.u32 %v5828_v6, %v5716_v38 }
 0x3e0   : > { %5283 = vst.msk [vmem:[%s8020_s9 + $0x4c] sm:$0xf] %vm5263_vm15, %v5234_v2 }
 0x3e1   : > { %v3929_v62 = vpop.permute.xlu1 %3928  ;;  %5779 = vmatmul.msk.bf16.gmra.mxu3 %vm4708_vm10, %v5719_v35 }
 0x3e2   : > { %4029 = vst.msk [vmem:[#allocation2 + $0x160] sm:$0xf] %vm3984_vm14, %v3929_v62  ;;  %v3205_v41 = vpop.permute.xlu0 %3204 }
 0x3e3   : > { %3304 = vst.msk [vmem:[#allocation2 + $0x168] sm:$0xf] %vm3258_vm13, %v3205_v41 }
 0x3e4   : > { %4030 = vst.msk [vmem:[#allocation2 + $0x168] sm:$0xf] %vm3984_vm14, %v3931_v20  ;;  %v3169_v30 = vpop.permute.xlu2 %3168  ;;  %v5016_v20 = vpop.f32.mrf.mxu3 }
 0x3e9   : > { %v2444_v29 = vpop.permute.xlu1 %2443  ;;  %v5706_v33 = vld [vmem:[#allocation2 + $0x160] sm:$0xf] }
 0x3ea   : > { %2561 = vst.msk [vmem:[#allocation2 + $0xd8] sm:$0xf] %vm2533_vm11, %v2444_v29  ;;  %v2442_v54 = vpop.permute.xlu0 %2441 }
 0x3eb   : > { %2560 = vst.msk [vmem:[#allocation2 + $0xd0] sm:$0xf] %vm2533_vm11, %v2442_v54  ;;  %v5827_v56 = vld [vmem:[#allocation2 + $0x164] sm:$0xf0] }
 0x3ec   : > { %2996 = vst.msk [vmem:[#allocation2 + $0xd0] sm:$0xf] %vm2969_vm12, %v2878_v34  ;;  %v5707_v61 = vor.u32 %v5827_v56, %v5706_v33  ;;  %v1756_v13 = vpop.permute.xlu2 %1755 }
 0x3ed   : > { %1854 = vst.msk [vmem:[#allocation2 + $0x170] sm:$0xf] %vm1807_vm9, %v1756_v13 }
 0x3ee   : > { %4899 = vmatmul.bf16.gmra.mxu2 %v5707_v61 }
 0x3f0   : > { %v4885_v37 = vpop.f32.mrf.mxu2 }
 0x3f1   : > { %v9099_v14 = vadd.f32 %v5014_v63, %v4885_v37  ;;  %v3167_v47 = vpop.permute.xlu1 %3166 }
 0x3f2   : > { %3285 = vst.msk [vmem:[#allocation2 + $0xd0] sm:$0xf] %vm3258_vm13, %v3167_v47  ;;  %v2880_v31 = vpop.permute.xlu0 %2879 }
 0x3f3   : > { %v5253_v5 = vpack.c.bf16 %v9099_v14, %v9099_v14  ;;  %2997 = vst.msk [vmem:[#allocation2 + $0xd8] sm:$0xf] %vm2969_vm12, %v2880_v31 }
 0x3f4   : > { %3286 = vst.msk [vmem:[#allocation2 + $0xd8] sm:$0xf] %vm3258_vm13, %v3169_v30  ;;  %v2484_v41 = vpop.permute.xlu2 %2483 }
 0x3f5   : > { %5302 = vst.msk [vmem:[%s8020_s9 + $0x98] sm:$0xf] %vm5263_vm15, %v5253_v5 }
 0x3f8   : > { %v4887_v26 = vpop.f32.mrf.mxu2 }
 0x3f9   : > { %v9109_v32 = vadd.f32 %v5016_v20, %v4887_v26  ;;  %v3895_v2 = vpop.permute.xlu1 %3894 }
 0x3fa   : > { %4012 = vst.msk [vmem:[#allocation2 + $0xd8] sm:$0xf] %vm3984_vm14, %v3895_v2  ;;  %v3893_v34 = vpop.permute.xlu0 %3892 }
 0x3fb   : > { %v5254_v62 = vpack.c.bf16 %v9109_v32, %v9109_v32  ;;  %4011 = vst.msk [vmem:[#allocation2 + $0xd0] sm:$0xf] %vm3984_vm14, %v3893_v34 }
 0x3fc   : > { %v3207_v24 = vpop.permute.xlu2 %3206 }
 0x3fd   : > { %5303 = vst.msk [vmem:[%s8020_s9 + $0x9c] sm:$0xf] %vm5263_vm15, %v5254_v62 }
 0x401   : > { %v2482_v30 = vpop.permute.xlu1 %2481  ;;  %v5809_v18 = vld [vmem:[#allocation2 + $0xd4] sm:$0xf0] }
 0x402   : > { %v1758_v46 = vpop.permute.xlu0 %1757  ;;  %v4840_v17 = vpop.f32.mrf.mxu0  ;;  %2580 = vst.msk [vmem:[#allocation2 + $0x170] sm:$0xf] %vm2533_vm11, %v2482_v30  ;;  %v5634_v29 = vld [vmem:[#allocation2 + $0xd0] sm:$0xf] }
 0x403   : > { %1855 = vst.msk [vmem:[#allocation2 + $0x178] sm:$0xf] %vm1807_vm9, %v1758_v46  ;;  %v9120_v33 = vadd.f32 %v8139_v36, %v4840_v17  ;;  %v5635_v50 = vor.u32 %v5809_v18, %v5634_v29  ;;  %v9456_v18 = vld [vmem:[#allocation9_spill] sm:$0xff] }
 0x404   : > { %2581 = vst.msk [vmem:[#allocation2 + $0x178] sm:$0xf] %vm2533_vm11, %v2484_v41  ;;  %v3935_v61 = vpop.permute.xlu2 %3934 }
 0x405   : > { %v5235_v12 = vpack.c.bf16 %v9120_v33, %v9120_v33  ;;  %4854 = vmatmul.bf16.gmra.mxu0 %v5635_v50 }
 0x407   : > { %5284 = vst.msk [vmem:[%s8020_s9 + $0x50] sm:$0xf] %vm5263_vm15, %v5235_v12 }
 0x409   : > { %v2920_v54 = vpop.permute.xlu1 %2919 }
 0x40a   : > { %v2918_v56 = vpop.permute.xlu0 %2917  ;;  %v4842_v0 = vpop.f32.mrf.mxu0  ;;  %3017 = vst.msk [vmem:[#allocation2 + $0x178] sm:$0xf] %vm2969_vm12, %v2920_v54 }
 0x40b   : > { %3016 = vst.msk [vmem:[#allocation2 + $0x170] sm:$0xf] %vm2969_vm12, %v2918_v56  ;;  %v9130_v36 = vadd.f32 %v8183_v15, %v4842_v0  ;;  %v5019_v15 = vpop.f32.mrf.mxu3 }
 0x40c   : > { %3305 = vst.msk [vmem:[#allocation2 + $0x170] sm:$0xf] %vm3258_vm13, %v3207_v24 }
 0x40d   : > { %v5236_v53 = vpack.c.bf16 %v9130_v36, %v9130_v36 }
 0x40f   : > { %5285 = vst.msk [vmem:[%s8020_s9 + $0x54] sm:$0xf] %vm5263_vm15, %v5236_v53 }
 0x411   : > { %v3933_v63 = vpop.permute.xlu1 %3932 }
 0x412   : > { %v3209_v13 = vpop.permute.xlu0 %3208  ;;  %4031 = vst.msk [vmem:[#allocation2 + $0x170] sm:$0xf] %vm3984_vm14, %v3933_v63 }
 0x413   : > { %3306 = vst.msk [vmem:[#allocation2 + $0x178] sm:$0xf] %vm3258_vm13, %v3209_v13  ;;  %v5021_v20 = vpop.f32.mrf.mxu3 }
 0x414   : > { %4032 = vst.msk [vmem:[#allocation2 + $0x178] sm:$0xf] %vm3984_vm14, %v3935_v61  ;;  %v9457_v61 = vld [vmem:[#allocation10_spill] sm:$0xff] }
 0x419   : > { %v4890_v37 = vpop.f32.mrf.mxu2  ;;  %v5714_v47 = vld [vmem:[#allocation2 + $0x170] sm:$0xf] }
 0x41a   : > { %v9140_v31 = vadd.f32 %v5019_v15, %v4890_v37  ;;  %v9458_v37 = vld [vmem:[#allocation11_spill] sm:$0xff] }
 0x41b   : > { %v5829_v5 = vld [vmem:[#allocation2 + $0x174] sm:$0xf0] }
 0x41c   : > { %v5255_v6 = vpack.c.bf16 %v9140_v31, %v9140_v31  ;;  %v5715_v38 = vor.u32 %v5829_v5, %v5714_v47 }
 0x41e   : > { %5304 = vst.msk [vmem:[%s8020_s9 + $0xa0] sm:$0xf] %vm5263_vm15, %v5255_v6  ;;  %4904 = vmatmul.bf16.gmra.mxu2 %v5715_v38 }
 0x421   : > { %v4892_v35 = vpop.f32.mrf.mxu2 }
 0x422   : > { %v9146_v26 = vadd.f32 %v5021_v20, %v4892_v35 }
 0x424   : > { %v5256_v2 = vpack.c.bf16 %v9146_v26, %v9146_v26 }
 0x426   : > { %5305 = vst.msk [vmem:[%s8020_s9 + $0xa4] sm:$0xf] %vm5263_vm15, %v5256_v2 }
 0x427   : > { %v5024_v29 = vpop.f32.mrf.mxu3 }
 0x42a   : > { %v4845_v34 = vpop.f32.mrf.mxu0 }
 0x42b   : > { %v9153_v62 = vadd.f32 %v8224_v57, %v4845_v34 }
 0x42d   : > { %v5237_v41 = vpack.c.bf16 %v9153_v62, %v9153_v62 }
 0x42f   : > { %5286 = vst.msk [vmem:[%s8020_s9 + $0x58] sm:$0xf] %vm5263_vm15, %v5237_v41  ;;  %v5026_v24 = vpop.f32.mrf.mxu3 }
 0x432   : > { %v4847_v30 = vpop.f32.mrf.mxu0 }
 0x433   : > { %v9160_v46 = vadd.f32 %v9456_v18, %v4847_v30  ;;  %v9207_v18 = vld [vmem:[%s9417_s2] sm:$0x7] }
 0x435   : > { %v5238_v17 = vpack.c.bf16 %v9160_v46, %v9160_v46 }
 0x437   : > { %5287 = vst.msk [vmem:[%s8020_s9 + $0x5c] sm:$0xf] %vm5263_vm15, %v5238_v17  ;;  %v5029_v6 = vpop.f32.mrf.mxu3 }
 0x43f   : > { %v5031_v2 = vpop.f32.mrf.mxu3 }
 0x448   : > { %v4895_v50 = vpop.f32.mrf.mxu2 }
 0x449   : > { %v9166_v57 = vadd.f32 %v5024_v29, %v4895_v50  ;;  %v5041_v29 = vperm.slane %v9207_v18, 0  ;;  %v9459_v50 = vld [vmem:[#allocation12_spill] sm:$0xff] }
 0x44b   : > { %v5257_v12 = vpack.c.bf16 %v9166_v57, %v9166_v57  ;;  %5063 = vmatmul.f32.vlgmr.msrb.gmra.mxu3 %v5041_v29 }
 0x44d   : > { %5306 = vst.msk [vmem:[%s8020_s9 + $0xa8] sm:$0xf] %vm5263_vm15, %v5257_v12 }
 0x450   : > { %v4897_v54 = vpop.f32.mrf.mxu2 }
 0x451   : > { %v9172_v56 = vadd.f32 %v5026_v24, %v4897_v54 }
 0x453   : > { %v5258_v0 = vpack.c.bf16 %v9172_v56, %v9172_v56  ;;  %v4850_v53 = vpop.f32.mrf.mxu0 }
 0x454   : > { %v9177_v63 = vadd.f32 %v9457_v61, %v4850_v53 }
 0x455   : > { %5307 = vst.msk [vmem:[%s8020_s9 + $0xac] sm:$0xf] %vm5263_vm15, %v5258_v0  ;;  %v9460_v0 = vld [vmem:[#allocation13_spill] sm:$0xff] }
 0x456   : > { %v5239_v13 = vpack.c.bf16 %v9177_v63, %v9177_v63 }
 0x458   : > { %5288 = vst.msk [vmem:[%s8020_s9 + $0x60] sm:$0xf] %vm5263_vm15, %v5239_v13 }
 0x45b   : > { %v4852_v15 = vpop.f32.mrf.mxu0 }
 0x45c   : > { %v9186_v47 = vadd.f32 %v9458_v37, %v4852_v15  ;;  %v5042_v37 = vperm.slane %v9207_v18, 1 }
 0x45e   : > { %v5240_v5 = vpack.c.bf16 %v9186_v47, %v9186_v47 }
 0x460   : > { %5289 = vst.msk [vmem:[%s8020_s9 + $0x64] sm:$0xf] %vm5263_vm15, %v5240_v5  ;;  %v5122_v5 = vmul.f32 %v8907_v55, %v8907_v55  ;;  %v5119_v55 = vmul.f32 %v8726_v28, %v8726_v28  ;;  %v5116_v28 = vmul.f32 %v8431_v4, %v8431_v4  ;;  %v5112_v4 = vmul.f32 %v8232_v59, %v8232_v59 }
 0x461   : > { %v5108_v59 = vmul.f32 %v8054_v9, %v8054_v9 }
 0x464   : > { %v5034_v13 = vpop.f32.mrf.mxu3 }
 0x471   : > { %v4900_v38 = vpop.f32.mrf.mxu2 }
 0x472   : > { %v9192_v20 = vadd.f32 %v5029_v6, %v4900_v38 }
 0x474   : > { %v5259_v35 = vpack.c.bf16 %v9192_v20, %v9192_v20 }
 0x476   : > { %5308 = vst.msk [vmem:[%s8020_s9 + $0xb0] sm:$0xf] %vm5263_vm15, %v5259_v35  ;;  %v5121_v35 = vmul.f32 %v8885_v44, %v8885_v44  ;;  %v5118_v44 = vmul.f32 %v8597_v52, %v8597_v52  ;;  %v5114_v52 = vmul.f32 %v8341_v11, %v8341_v11  ;;  %v5110_v11 = vmul.f32 %v8164_v21, %v8164_v21 }
 0x479   : > { %v4902_v34 = vpop.f32.mrf.mxu2 }
 0x47a   : > { %v9198_v41 = vadd.f32 %v5031_v2, %v4902_v34  ;;  %v5120_v2 = vmul.f32 %v8751_v45, %v8751_v45  ;;  %v5036_v34 = vpop.f32.mrf.mxu3  ;;  %v5115_v45 = vmul.f32 %v8397_v42, %v8397_v42  ;;  %v5111_v42 = vmul.f32 %v8201_v22, %v8201_v22 }
 0x47b   : > { %v5107_v22 = vmul.f32 %v8015_v43, %v8015_v43  ;;  %v5151_v43 = vmul.f32 %v9192_v20, %v9192_v20 }
 0x47c   : > { %v5260_v30 = vpack.c.bf16 %v9198_v41, %v9198_v41  ;;  %v5152_v9 = vmul.f32 %v9198_v41, %v9198_v41 }
 0x47e   : > { %5309 = vst.msk [vmem:[%s8020_s9 + $0xb4] sm:$0xf] %vm5263_vm15, %v5260_v30 }
 0x482   : > { %v4855_v17 = vpop.f32.mrf.mxu0 }
 0x483   : > { %v9211_v12 = vadd.f32 %v9459_v50, %v4855_v17 }
 0x485   : > { %v5241_v24 = vpack.c.bf16 %v9211_v12, %v9211_v12 }
 0x487   : > { %5290 = vst.msk [vmem:[%s8020_s9 + $0x68] sm:$0xf] %vm5263_vm15, %v5241_v24  ;;  %v5117_v24 = vmul.f32 %v8567_v51, %v8567_v51  ;;  %v5113_v51 = vmul.f32 %v8301_v49, %v8301_v49  ;;  %v5109_v49 = vmul.f32 %v8120_v7, %v8120_v7  ;;  %v5043_v7 = vperm.slane %v9207_v18, 2 }
 0x48a   : > { %v4857_v54 = vpop.f32.mrf.mxu0 }
 0x48b   : > { %v9220_v53 = vadd.f32 %v9460_v0, %v4857_v54  ;;  %v5138_v0 = vmul.f32 %v8712_v23, %v8712_v23  ;;  %v5136_v23 = vmul.f32 %v8532_v25, %v8532_v25  ;;  %v5133_v25 = vmul.f32 %v9211_v12, %v9211_v12 }
 0x48d   : > { %v5242_v61 = vpack.c.bf16 %v9220_v53, %v9220_v53  ;;  %5071 = vmatpush.msra.mxu3 %v9220_v53 }
 0x48f   : > { %5291 = vst.msk [vmem:[%s8020_s9 + $0x6c] sm:$0xf] %vm5263_vm15, %v5242_v61  ;;  %5072 = vmatpush.msra.mxu3 %v9211_v12  ;;  %v5148_v61 = vmul.f32 %v9146_v26, %v9146_v26  ;;  %v5142_v12 = vmul.f32 %v8983_v39, %v8983_v39 }
 0x491   : > { %5073 = vmatpush.msra.mxu3 %v9186_v47 }
 0x493   : > { %5074 = vmatpush.msra.mxu3 %v9177_v63 }
 0x495   : > { %5075 = vmatpush.msra.mxu3 %v9160_v46 }
 0x497   : > { %5076 = vmatpush.msra.mxu3 %v9153_v62 }
 0x499   : > { %5077 = vmatpush.msra.mxu3 %v9130_v36 }
 0x49b   : > { %5078 = vmatpush.msra.mxu3 %v9120_v33 }
 0x49d   : > { %5079 = vmatpush.msra.mxu3 %v9076_v10 }
 0x49f   : > { %5080 = vmatpush.msra.mxu3 %v9064_v48 }
 0x4a1   : > { %v4905_v15 = vpop.f32.mrf.mxu2  ;;  %5081 = vmatpush.msra.mxu3 %v9019_v27 }
 0x4a2   : > { %v5035_v6 = vadd.f32 %v5034_v13, %v4905_v15  ;;  %v5146_v13 = vmul.f32 %v9109_v32, %v9109_v32 }
 0x4a3   : > { %5082 = vmatpush.msra.mxu3 %v9002_v3 }
 0x4a4   : > { %v5261_v38 = vpack.c.bf16 %v5035_v6, %v5035_v6  ;;  %5083 = vmatmul.f32.vlgmr.msra.gmra.mxu3 %v5042_v37  ;;  %v5153_v21 = vmul.f32 %v5035_v6, %v5035_v6 }
 0x4a5   : > { %5155 = vmatpush.msrb.mxu3 %v5122_v5 }
 0x4a6   : > { %5310 = vst.msk [vmem:[%s8020_s9 + $0xb8] sm:$0xf] %vm5263_vm15, %v5261_v38 }
 0x4a7   : > { %5156 = vmatpush.msrb.mxu3 %v5121_v35 }
 0x4a9   : > { %5157 = vmatpush.msrb.mxu3 %v5120_v2  ;;  %v4907_v30 = vpop.f32.mrf.mxu2 }
 0x4aa   : > { %v5037_v17 = vadd.f32 %v5036_v34, %v4907_v30 }
 0x4ab   : > { %5158 = vmatpush.msrb.mxu3 %v5119_v55 }
 0x4ac   : > { %v5262_v50 = vpack.c.bf16 %v5037_v17, %v5037_v17  ;;  %5087 = vmatpush.msrb.mxu2 %v5037_v17  ;;  %v5154_v54 = vmul.f32 %v5037_v17, %v5037_v17 }
 0x4ad   : > { %5159 = vmatpush.msrb.mxu3 %v5118_v44 }
 0x4ae   : > { %5311 = vst.msk [vmem:[%s8020_s9 + $0xbc] sm:$0xf] %vm5263_vm15, %v5262_v50  ;;  %5088 = vmatpush.msrb.mxu2 %v5035_v6  ;;  %s5937_s9 = scalar_lea.hbm %s9419_s4, 2 }
 0x4af   : > { %5160 = vmatpush.msrb.mxu3 %v5117_v24  ;;  %p5939_p2 = scmp.lt.s32.totalorder %s5937_s9, %s5933_s29 }
 0x4b0   : > { %5089 = vmatpush.msrb.mxu2 %v9198_v41  ;;  %v5137_v41 = vmul.f32 %v8684_v1, %v8684_v1  ;;  %v5147_v1 = vmul.f32 %v9140_v31, %v9140_v31 }
 0x4b1   : > { %5161 = vmatpush.msrb.mxu3 %v5116_v28  ;;  %p5940_p3 = por %p5939_p2, %p5938_p1 }
 0x4b2   : > { %5090 = vmatpush.msrb.mxu2 %v9192_v20  ;;  %v5149_v20 = vmul.f32 %v9166_v57, %v9166_v57 }
 0x4b3   : > { %5162 = vmatpush.msrb.mxu3 %v5115_v45  ;;  %p5941_p5 = pnand %p5940_p3, %p5936_p0 }
 0x4b4   : > { %5091 = vmatpush.msrb.mxu2 %v9172_v56 }
 0x4b5   : > { %5163 = vmatpush.msrb.mxu3 %v5114_v52 }
 0x4b6   : > { %5092 = vmatpush.msrb.mxu2 %v9166_v57  ;;  %v5134_v57 = vmul.f32 %v9220_v53, %v9220_v53  ;;  %v5143_v53 = vmul.f32 %v9046_v16, %v9046_v16 }
 0x4b7   : > { %5164 = vmatpush.msrb.mxu3 %v5113_v51 }
 0x4b8   : > { %5093 = vmatpush.msrb.mxu2 %v9146_v26  ;;  %v5145_v26 = vmul.f32 %v9099_v14, %v9099_v14 }
 0x4b9   : > { %5165 = vmatpush.msrb.mxu3 %v5112_v4 }
 0x4ba   : > { %5094 = vmatpush.msrb.mxu2 %v9140_v31  ;;  %v5144_v31 = vmul.f32 %v9056_v40, %v9056_v40 }
 0x4bb   : > { %5166 = vmatpush.msrb.mxu3 %v5111_v42 }
 0x4bc   : > { %5095 = vmatpush.msrb.mxu2 %v9109_v32  ;;  %v5131_v32 = vmul.f32 %v9177_v63, %v9177_v63  ;;  %v5140_v63 = vmul.f32 %v8856_v19, %v8856_v19 }
 0x4bd   : > { %5167 = vmatpush.msrb.mxu3 %v5110_v11 }
 0x4be   : > { %5096 = vmatpush.msrb.mxu2 %v9099_v14  ;;  %v5130_v14 = vmul.f32 %v9160_v46, %v9160_v46 }
 0x4bf   : > { %5168 = vmatpush.msrb.mxu3 %v5109_v49 }
 0x4c0   : > { %5097 = vmatpush.msrb.mxu2 %v9056_v40  ;;  %v5129_v40 = vmul.f32 %v9153_v62, %v9153_v62  ;;  %v5139_v62 = vmul.f32 %v8831_v8, %v8831_v8 }
 0x4c1   : > { %5169 = vmatpush.msrb.mxu3 %v5108_v59 }
 0x4c2   : > { %5098 = vmatpush.msrb.mxu2 %v9046_v16  ;;  %v5128_v16 = vmul.f32 %v9130_v36, %v9130_v36  ;;  %v5124_v36 = vmul.f32 %v9019_v27, %v9019_v27 }
 0x4c3   : > { %5170 = vmatpush.msrb.mxu3 %v5107_v22 }
 0x4c4   : > { %5099 = vmatpush.msrb.mxu2 %v8983_v39  ;;  %5171 = vmatmul.f32.vlgmr.msrb.gmra.mxu3 %v5041_v29  ;;  %v5150_v29 = vmul.f32 %v9172_v56, %v9172_v56  ;;  %v5135_v56 = vmul.f32 %v8489_v60, %v8489_v60  ;;  %v5132_v60 = vmul.f32 %v9186_v47, %v9186_v47 }
 0x4c5   : > { %5195 = vmatpush.msra.mxu3 %v5154_v54  ;;  %v5141_v47 = vmul.f32 %v8954_v58, %v8954_v58  ;;  %v5127_v39 = vmul.f32 %v9120_v33, %v9120_v33  ;;  %v5123_v33 = vmul.f32 %v9002_v3, %v9002_v3 }
 0x4c6   : > { %5100 = vmatpush.msrb.mxu2 %v8954_v58  ;;  %v5126_v58 = vmul.f32 %v9076_v10, %v9076_v10 }
 0x4c7   : > { %5196 = vmatpush.msra.mxu3 %v5153_v21 }
 0x4c8   : > { %5101 = vmatpush.msrb.mxu2 %v8856_v19  ;;  %v5125_v19 = vmul.f32 %v9064_v48, %v9064_v48 }
 0x4c9   : > { %5197 = vmatpush.msra.mxu3 %v5152_v9 }
 0x4ca   : > { %5102 = vmatpush.msrb.mxu2 %v8831_v8 }
 0x4cb   : > { %5198 = vmatpush.msra.mxu3 %v5151_v43  ;;  %5103 = vmatmul.f32.vlgmr.msrb.gmra.mxu2 %v5043_v7 }
 0x4cc   : > { %5175 = vmatpush.msra.mxu2 %v5138_v0 }
 0x4cd   : > { %5199 = vmatpush.msra.mxu3 %v5150_v29 }
 0x4ce   : > { %5176 = vmatpush.msra.mxu2 %v5137_v41  ;;  %v5064_v8 = vpop.f32.mrf.mxu3 }
 0x4cf   : > { %5200 = vmatpush.msra.mxu3 %v5149_v20 }
 0x4d0   : > { %5177 = vmatpush.msra.mxu2 %v5136_v23 }
 0x4d1   : > { %5201 = vmatpush.msra.mxu3 %v5148_v61 }
 0x4d2   : > { %5178 = vmatpush.msra.mxu2 %v5135_v56 }
 0x4d3   : > { %5202 = vmatpush.msra.mxu3 %v5147_v1 }
 0x4d4   : > { %5179 = vmatpush.msra.mxu2 %v5134_v57 }
 0x4d5   : > { %5203 = vmatpush.msra.mxu3 %v5146_v13 }
 0x4d6   : > { %5180 = vmatpush.msra.mxu2 %v5133_v25 }
 0x4d7   : > { %5204 = vmatpush.msra.mxu3 %v5145_v26 }
 0x4d8   : > { %5181 = vmatpush.msra.mxu2 %v5132_v60 }
 0x4d9   : > { %5205 = vmatpush.msra.mxu3 %v5144_v31 }
 0x4da   : > { %5182 = vmatpush.msra.mxu2 %v5131_v32 }
 0x4db   : > { %5206 = vmatpush.msra.mxu3 %v5143_v53 }
 0x4dc   : > { %5183 = vmatpush.msra.mxu2 %v5130_v14 }
 0x4dd   : > { %5207 = vmatpush.msra.mxu3 %v5142_v12 }
 0x4de   : > { %5184 = vmatpush.msra.mxu2 %v5129_v40 }
 0x4df   : > { %5208 = vmatpush.msra.mxu3 %v5141_v47 }
 0x4e0   : > { %5185 = vmatpush.msra.mxu2 %v5128_v16 }
 0x4e1   : > { %5209 = vmatpush.msra.mxu3 %v5140_v63 }
 0x4e2   : > { %5186 = vmatpush.msra.mxu2 %v5127_v39 }
 0x4e3   : > { %5210 = vmatpush.msra.mxu3 %v5139_v62 }
 0x4e4   : > { %5211 = vmatmul.f32.vlgmr.msra.gmra.mxu3 %v5043_v7  ;;  %5187 = vmatpush.msra.mxu2 %v5126_v58 }
 0x4e6   : > { %5188 = vmatpush.msra.mxu2 %v5125_v19 }
 0x4e8   : > { %5189 = vmatpush.msra.mxu2 %v5124_v36 }
 0x4ea   : > { %5190 = vmatpush.msra.mxu2 %v5123_v33 }
 0x4eb   : > { %5191 = vmatmul.f32.vlgmr.msra.gmra.mxu2 %v5042_v37 }
 0x527   : > { %v5084_v48 = vpop.f32.mrf.mxu3 }
 0x528   : > { %v5085_v27 = vadd.f32 %v5084_v48, %v5064_v8 }
 0x54e   : > { %v5104_v3 = vpop.f32.mrf.mxu2 }
 0x54f   : > { %v5105_v10 = vadd.f32 %v5104_v3, %v5085_v27 }
 0x551   : > { %5313 = vst.msk [vmem:[%s272_s10] sm:$0x1] %vm5312_vm0, %v5105_v10 }
 0x552   : > { %5944 = shalt.err (!%p5941_p5)
}
 0x553   : > { %5850 = dma.vmem_to_hbm [thread:$0]  (%p6106_p4), %s5344_s12, 16, %s5346_s13, %s5325_s15   ;;  %v5172_v46 = vpop.f32.mrf.mxu3 }
 0x554   : > { %s5355_s27 = scalar_lea.hbm %s9420_s5, %s6019_s21  ;;  %s278_s10 = scalar_lea.vmem [#allocation5], %s9357_s17 }
 0x555   : > { %s5357_s16 = sshll.u32 %s278_s10, 4  ;;  %s5359_s29 = sshll.u32 %s5355_s27, 4  ;;  %s5358_s16 = int_to_ptr.vmem [resolvable:$true] %s5357_s16  ;;  %s5360_s29 = int_to_ptr.hbm [resolvable:$true] %s5359_s29 }
 0x556   : > { %s5329_s7 = scalar_lea.sflag [#allocation6], %s9357_s17  ;;  %s5959_s8 = sshra.s32 %s5360_s29, 4  ;;  %s5960_s8 = int_to_ptr.hbm [resolvable:$true] %s5959_s8 }
 0x557   : > { %s5961_s12 = scalar_lea.hbm %s5960_s8, 1  ;;  %s5965_s15 = scalar_lea.hbm %s9420_s5, 2 }
 0x558   : > { %p5962_p6 = scmp.ne.s32.totalorder %s5960_s8, %s5961_s12  ;;  %p5966_p10 = scmp.lt.s32.totalorder %s5960_s8, %s9420_s5 }
 0x559   : > { %p5967_p11 = scmp.lt.s32.totalorder %s5965_s15, %s5961_s12 }
 0x55a   : > { %p5963_p7 = pnand %p5962_p6, %p6106_p4 }
 0x55b   : > { %p5968_p12 = por %p5967_p11, %p5966_p10 }
 0x55c   : > { %p5964_p9 = pneg %p5963_p7 }
 0x55e   : > { %p5969_p13 = pnand %p5968_p12, %p5964_p9 }
 0x567   : > { %v5212_v15 = vpop.f32.mrf.mxu3 }
 0x56e   : > { %v5192_v18 = vpop.f32.mrf.mxu2 }
 0x56f   : > { %v5193_v37 = vadd.f32 %v5192_v18, %v5172_v46 }
 0x571   : > { %v5213_v5 = vadd.f32 %v5212_v15, %v5193_v37 }
 0x573   : > { %5314 = vst.msk [vmem:[%s278_s10] sm:$0x1] %vm5312_vm0, %v5213_v5 }
 0x574   : > { %5972 = shalt.err (!%p5969_p13)
}
 0x575   : > { %5851 = dma.vmem_to_hbm [thread:$0]  (%p6106_p4), %s5358_s16, 16, %s5360_s29, %s5329_s7  }
 0x576 PF: > { %p5861_p0 = scmp.ge.s32.totalorder %s6027_s23, 2  ;;  %s5383_s17 = sand.u32 1, %s6007_s18  }
 0x577   : > { %s5384_s14 = scalar_lea.sflag [#allocation4], %s5383_s17 }
 0x578   : > { %p5855_p1 = pnand %p5861_p0, %p6113_p8 }
 0x57a   : > { %p5856_p2 = pneg %p5855_p1 }
 0x57c   : > { %5998 = dma.done.wait (%p5856_p2), %s5384_s14, 16  }
 0x57d   : > { %6000 = vsyncadd (%p5856_p2), %s5384_s14, 4294967280  ;;  %s5393_s24 = scalar_lea.sflag [#allocation6], %s5383_s17 }
 0x57e   : > { %6002 = dma.done.wait (%p5856_p2), %s5393_s24, 16  }
 0x57f   : > { %6004 = vsyncadd (%p5856_p2), %s5393_s24, 4294967280  ;;  %s22_s23 = sadd.s32 1, %s6027_s23   ;;  %s9461_s18 = smov %s6011_s19 }
 0x580   : > { %p19_p3 = scmp.ge.s32.totalorder %s22_s23, 4   ;;  %s9462_s19 = smov %s6015_s20 }
 0x581   : > { %s9463_s20 = smov %s6119_s6  ;;  %s9464_s21 = smov %s6023_s22 }
 0x582   : > { %s9465_s22 = smov %s9467_s26  ;;  %21 = sbr.rel (!%p19_p3) target bundleno = 6 (0x6), region = 99 }
 0x587   :  { %5398 = vsyncpa [#allocation4], 1 }
 0x588   :  { %5400 = vsyncpa [#allocation4 + $0x1], 1 }
 0x589   :  { %5401 = vsyncpa [#allocation6], 1 }
 0x58a   :  { %5403 = vsyncpa [#allocation6 + $0x1], 1 }

</bundles_post_ra>
